<compile_context>
chip_gen: v5e
topology: v5e:2x2
jax: 0.10.0
libtpu: 0.0.40
codegen_flags: <defaults>
</compile_context>

<pallas_src>
import functools

import jax
import jax.numpy as jnp
from jax.experimental import pallas as pl
from jax.experimental.pallas import tpu as pltpu


# ----------------------------------------------------------------------------
# tiling helpers (VMEM-budget + grid-step aware)
# ----------------------------------------------------------------------------
# Double-buffered block working-set budget.  Kept under v5e's 16 MiB default
# scoped-VMEM so no vmem_limit_bytes override is needed on any generation
# (v6e/v7x defaults are 32 MiB).
_VMEM_BLOCK_BUDGET = 10 * 1024 * 1024


def _pick_lane_tile(n, unit_bytes, vmem_budget=_VMEM_BLOCK_BUDGET):
    """Lane tile (multiple of 128 dividing n) for the pointwise kernels.

    Prefers >=4 grid steps (v7x 2-TC sharding + per-core double buffering) as
    long as the tile stays >=512 lanes (~85% of HBM roofline); otherwise >=2
    steps; otherwise the largest tile that fits the VMEM budget.
    `unit_bytes` = bytes per lane across all blocks touched by the kernel.
    """
    if n % 128 != 0:
        # TODO(synk): pad N to a multiple of 128 upstream; full-N fallback
        # yields masked stores and a 1-step grid.
        return n
    cands = [t for t in range(128, n + 1, 128)
             if n % t == 0 and 2 * t * unit_bytes <= vmem_budget]
    if not cands:
        return 128
    for steps_floor, lane_floor in ((4, 512), (2, 128), (1, 128)):
        ok = [t for t in cands if n // t >= steps_floor and t >= lane_floor]
        if ok:
            return max(ok)
    return max(cands)


def _pick_mode_block(m, unit_bytes, vmem_budget=_VMEM_BLOCK_BUDGET):
    """Mode-block size for the spectral kernel: largest divisor of m whose
    double-buffered footprint fits the VMEM budget, preferring >=4 grid steps
    (v7x megacore + pipelining), then >=2, then whatever fits."""
    cands = [d for d in range(1, m + 1)
             if m % d == 0 and 2 * d * unit_bytes <= vmem_budget]
    if not cands:
        return 1
    for steps_floor in (4, 2, 1):
        ok = [d for d in cands if m // d >= steps_floor]
        if ok:
            return max(ok)
    return max(cands)


# ----------------------------------------------------------------------------
# Pallas kernel 1: fused 2-layer channel MLP (lifting / projection)
#   y = W2 @ gelu(W1 @ x + b1) + b2     on (C, N) channels-first slabs
# ----------------------------------------------------------------------------
def _mlp2_kernel(x_ref, w1t_ref, b1_ref, w2t_ref, b2_ref, o_ref):
    # TODO(synk): PyTorch F.gelu is erf-exact; tanh-approx GELU used here.
    h = jnp.dot(w1t_ref[...], x_ref[...], preferred_element_type=jnp.float32)
    h = jax.nn.gelu(h + b1_ref[...])
    y = jnp.dot(w2t_ref[...], h.astype(jnp.bfloat16),
                preferred_element_type=jnp.float32)
    o_ref[...] = (y + b2_ref[...]).astype(o_ref.dtype)


def channel_mlp2(x_cn, w1t, b1, w2t, b2, *, out_dtype):
    """x: (Cin, N) bf16, w1t: (Cmid, Cin) bf16, w2t: (Cout, Cmid) bf16."""
    Cin, N = x_cn.shape
    Cmid = w1t.shape[0]
    Cout = w2t.shape[0]
    unit = Cin * 2 + Cmid * 4 + Cout * jnp.dtype(out_dtype).itemsize
    tile = _pick_lane_tile(N, unit)
    return pl.pallas_call(
        _mlp2_kernel,
        out_shape=jax.ShapeDtypeStruct((Cout, N), out_dtype),
        grid_spec=pltpu.PrefetchScalarGridSpec(
            num_scalar_prefetch=0,
            grid=(N // tile,),
            in_specs=[
                pl.BlockSpec((Cin, tile), lambda i: (0, i)),
                pl.BlockSpec((Cmid, Cin), lambda i: (0, 0)),
                pl.BlockSpec((Cmid, 1), lambda i: (0, 0)),
                pl.BlockSpec((Cout, Cmid), lambda i: (0, 0)),
                pl.BlockSpec((Cout, 1), lambda i: (0, 0)),
            ],
            out_specs=pl.BlockSpec((Cout, tile), lambda i: (0, i)),
        ),
        compiler_params=pltpu.CompilerParams(dimension_semantics=("parallel",)),
    )(x_cn, w1t, b1, w2t, b2)


# ----------------------------------------------------------------------------
# Pallas kernel 2: fused FNO-block epilogue
#   y = skip_W @ x + spec_bias + x_spec     (+ GELU except after last layer)
# ----------------------------------------------------------------------------
def _block_epilogue_kernel(x_ref, wt_ref, b_ref, spec_ref, o_ref, *, apply_gelu):
    y = jnp.dot(wt_ref[...], x_ref[...], preferred_element_type=jnp.float32)
    y = y + b_ref[...] + spec_ref[...]
    if apply_gelu:
        y = jax.nn.gelu(y)
    o_ref[...] = y.astype(o_ref.dtype)


def fno_block_epilogue(x_cn, skip_wt, spec_bias, x_spec_cn, *, apply_gelu, out_dtype):
    Cin, N = x_cn.shape
    Cout = skip_wt.shape[0]
    unit = Cin * 2 + Cout * 4 + Cout * jnp.dtype(out_dtype).itemsize
    tile = _pick_lane_tile(N, unit)
    return pl.pallas_call(
        functools.partial(_block_epilogue_kernel, apply_gelu=apply_gelu),
        out_shape=jax.ShapeDtypeStruct((Cout, N), out_dtype),
        grid_spec=pltpu.PrefetchScalarGridSpec(
            num_scalar_prefetch=0,
            grid=(N // tile,),
            in_specs=[
                pl.BlockSpec((Cin, tile), lambda i: (0, i)),
                pl.BlockSpec((Cout, Cin), lambda i: (0, 0)),
                pl.BlockSpec((Cout, 1), lambda i: (0, 0)),
                pl.BlockSpec((Cout, tile), lambda i: (0, i)),
            ],
            out_specs=pl.BlockSpec((Cout, tile), lambda i: (0, i)),
        ),
        compiler_params=pltpu.CompilerParams(dimension_semantics=("parallel",)),
    )(x_cn, skip_wt, spec_bias, x_spec_cn)


# ----------------------------------------------------------------------------
# Pallas kernel 3: spectral channel mixing.  Unpacked complex weights:
#   yr = xr@wr - xi@wi,  yi = xr@wi + xi@wr   (4 real matmuls per mode block,
# modes batched via dot_general; wr/wi are streamed exactly once, in bf16).
# Output blocks are lane-dense whenever hidden_channels >= 128.
# TODO(synk): for hidden_channels < 128 the (B, Cout) output tile is a masked
# store; merge B*Cout onto lanes if that case ever becomes hot.
# ----------------------------------------------------------------------------
def _spectral_mix_kernel(xr_ref, xi_ref, wr_ref, wi_ref, yr_ref, yi_ref):
    dn = (((2,), (1,)), ((0,), (0,)))   # contract Cin; modes are the batch dim
    xr, xi = xr_ref[...], xi_ref[...]
    wr, wi = wr_ref[...], wi_ref[...]
    f32 = jnp.float32
    yr_ref[...] = (jax.lax.dot_general(xr, wr, dn, preferred_element_type=f32)
                   - jax.lax.dot_general(xi, wi, dn, preferred_element_type=f32)
                   ).astype(yr_ref.dtype)
    yi_ref[...] = (jax.lax.dot_general(xr, wi, dn, preferred_element_type=f32)
                   + jax.lax.dot_general(xi, wr, dn, preferred_element_type=f32)
                   ).astype(yi_ref.dtype)


def spectral_mix(xr, xi, wr, wi):
    """xr/xi: (M, B, Cin) bf16; wr/wi: (M, Cin, Cout) bf16 -> yr, yi (M, B, Cout) f32."""
    M, B, Cin = xr.shape
    Cout = wr.shape[2]
    unit = (2 * B * Cin * 2          # xr + xi blocks (bf16)
            + 2 * Cin * Cout * 2     # wr + wi blocks (bf16) <- dominant stream
            + 2 * B * Cout * 4)      # yr + yi blocks (f32)
    mb = _pick_mode_block(M, unit)
    out_sds = jax.ShapeDtypeStruct((M, B, Cout), jnp.float32)
    return pl.pallas_call(
        _spectral_mix_kernel,
        out_shape=(out_sds, out_sds),
        grid_spec=pltpu.PrefetchScalarGridSpec(
            num_scalar_prefetch=0,
            grid=(M // mb,),
            in_specs=[
                pl.BlockSpec((mb, B, Cin), lambda m: (m, 0, 0)),
                pl.BlockSpec((mb, B, Cin), lambda m: (m, 0, 0)),
                pl.BlockSpec((mb, Cin, Cout), lambda m: (m, 0, 0)),
                pl.BlockSpec((mb, Cin, Cout), lambda m: (m, 0, 0)),
            ],
            out_specs=[
                pl.BlockSpec((mb, B, Cout), lambda m: (m, 0, 0)),
                pl.BlockSpec((mb, B, Cout), lambda m: (m, 0, 0)),
            ],
        ),
        compiler_params=pltpu.CompilerParams(dimension_semantics=("parallel",)),
    )(xr, xi, wr, wi)


def spectral_conv2d_cn(x_cn, wr, wi, shape_cbhw, n_modes):
    """Spectral conv core on the (C, N) layout.  Returns (Cout, N) f32, no bias."""
    Cin, B, H, W = shape_cbhw
    m1, m2 = n_modes
    m1h = m1 // 2
    m2h = m2 // 2 + 1
    M = m1 * m2h
    Cout = wr.shape[2]
    Wh = W // 2 + 1

    x = x_cn.astype(jnp.float32).reshape(Cin, B, H, W)
    x_hat = jnp.fft.rfft2(x, axes=(-2, -1))                    # (Cin, B, H, Wh) c64

    # Retained modes (neuralop convention): rows [:m1//2] and [-m1//2:],
    # columns [:m2//2+1] -> two contiguous row slabs, pure slicing.
    top = x_hat[:, :, :m1h, :m2h]
    bot = x_hat[:, :, H - m1h:, :m2h]
    x_modes = jnp.concatenate([top, bot], axis=2)              # (Cin, B, m1, m2h)
    # TODO(synk): fuse this pack/transpose and the inverse scatter into the
    # Pallas kernel (feed the two FFT slabs via BlockSpecs) to drop the extra
    # HBM passes; left as XLA glue for now.
    x_modes = jnp.transpose(x_modes, (2, 3, 1, 0)).reshape(M, B, Cin)
    xr = jnp.real(x_modes).astype(jnp.bfloat16)
    xi = jnp.imag(x_modes).astype(jnp.bfloat16)

    yr, yi = spectral_mix(xr, xi, wr, wi)                      # (M, B, Cout) f32
    y_modes = (yr + 1j * yi).reshape(m1, m2h, B, Cout)
    y_modes = jnp.transpose(y_modes, (3, 2, 0, 1))             # (Cout, B, m1, m2h)

    # Inverse scatter: single concatenate + pad (no zeros + .at[].set()).
    zmid = jnp.zeros((Cout, B, H - m1, m2h), dtype=y_modes.dtype)
    rows = jnp.concatenate(
        [y_modes[:, :, :m1h, :], zmid, y_modes[:, :, m1h:, :]], axis=2)
    out_fft = jnp.pad(rows, ((0, 0), (0, 0), (0, 0), (0, Wh - m2h)))
    y = jnp.fft.irfft2(out_fft, s=(H, W), axes=(-2, -1)).astype(jnp.float32)
    return y.reshape(Cout, B * H * W)


# ----------------------------------------------------------------------------
# FNO module (parameters built deterministically in-script)
# ----------------------------------------------------------------------------
class FNO2D:
    def __init__(self, n_modes, in_channels, hidden_channels, lifting_channels,
                 projection_channels, out_channels, n_layers, key):
        m1, m2 = n_modes
        assert m1 % 2 == 0, "n_modes[0] must be even (+/- frequency halves)"
        self.n_modes = n_modes
        self.n_layers = n_layers
        self.hidden = hidden_channels
        m2h = m2 // 2 + 1
        M = m1 * m2h

        def nrm(k, shape, scale, dtype=jnp.bfloat16):
            return (scale * jax.random.normal(k, shape)).astype(dtype)

        keys = jax.random.split(key, 4 + 3 * n_layers)
        ki = iter(range(len(keys)))

        # Lifting MLP (in -> lifting -gelu-> hidden).  Weights stored
        # transposed (Cout, Cin) bf16 for the channels-on-sublane layout.
        self.lift_w1t = nrm(keys[next(ki)], (lifting_channels, in_channels),
                            (2.0 / (in_channels + lifting_channels)) ** 0.5)
        self.lift_b1 = jnp.zeros((lifting_channels, 1), jnp.float32)
        self.lift_w2t = nrm(keys[next(ki)], (hidden_channels, lifting_channels),
                            (2.0 / (lifting_channels + hidden_channels)) ** 0.5)
        self.lift_b2 = jnp.zeros((hidden_channels, 1), jnp.float32)

        # FNO blocks: unpacked complex spectral weights + bias + linear skip.
        self.spec_wr, self.spec_wi, self.spec_b, self.skip_wt = [], [], [], []
        spec_scale = (2.0 / (2 * hidden_channels)) ** 0.5
        for _ in range(n_layers):
            self.spec_wr.append(nrm(keys[next(ki)],
                                    (M, hidden_channels, hidden_channels),
                                    spec_scale))
            self.spec_wi.append(nrm(keys[next(ki)],
                                    (M, hidden_channels, hidden_channels),
                                    spec_scale))
            self.spec_b.append(jnp.zeros((hidden_channels, 1), jnp.float32))
            self.skip_wt.append(nrm(keys[next(ki)],
                                    (hidden_channels, hidden_channels),
                                    (1.0 / hidden_channels) ** 0.5))

        # Projection MLP (hidden -> projection -gelu-> out)
        self.proj_w1t = nrm(keys[next(ki)], (projection_channels, hidden_channels),
                            (2.0 / (hidden_channels + projection_channels)) ** 0.5)
        self.proj_b1 = jnp.zeros((projection_channels, 1), jnp.float32)
        self.proj_w2t = nrm(keys[next(ki)], (out_channels, projection_channels),
                            (2.0 / (projection_channels + out_channels)) ** 0.5)
        self.proj_b2 = jnp.zeros((out_channels, 1), jnp.float32)

    # ----- single FNO application on (B, C, H, W) -----------------------------
    def fno_forward(self, x_bchw):
        B, Cin, H, W = x_bchw.shape
        m1, m2 = self.n_modes
        assert m1 <= H and (m2 // 2 + 1) <= (W // 2 + 1), "n_modes exceed grid"
        N = B * H * W
        # single layout change at entry: NCHW -> (C, B*H*W), bf16 activations
        x = jnp.transpose(x_bchw.astype(jnp.bfloat16), (1, 0, 2, 3)).reshape(Cin, N)

        x = channel_mlp2(x, self.lift_w1t, self.lift_b1, self.lift_w2t,
                         self.lift_b2, out_dtype=jnp.bfloat16)

        hid = self.hidden
        for i in range(self.n_layers):
            x_spec = spectral_conv2d_cn(x, self.spec_wr[i], self.spec_wi[i],
                                        (hid, B, H, W), self.n_modes)
            x = fno_block_epilogue(x, self.skip_wt[i], self.spec_b[i], x_spec,
                                   apply_gelu=(i < self.n_layers - 1),
                                   out_dtype=jnp.bfloat16)

        x = channel_mlp2(x, self.proj_w1t, self.proj_b1, self.proj_w2t,
                         self.proj_b2, out_dtype=jnp.float32)
        Cout = x.shape[0]
        # single layout change at exit: (C, B*H*W) -> NCHW
        return jnp.transpose(x.reshape(Cout, B, H, W), (1, 0, 2, 3))

    # ----- FNOModule.forward: teacher-forced autoregressive rollout -----------
    def forward(self, x, teacher_forcing_steps=50):
        B, T = x.shape[0], x.shape[1]
        tf = min(teacher_forcing_steps, T)
        assert tf >= 1, "need at least one teacher-forced step"
        # Teacher-forced steps are mutually independent: fold them into the
        # batch dimension and run one large fno_forward (fills sublanes/lanes,
        # single FFT dispatch, amortized per-call/per-grid-step overhead).
        x_tf = x[:, :tf].reshape((B * tf,) + x.shape[2:])
        y_tf = self.fno_forward(x_tf)
        y_tf = y_tf.reshape((B, tf) + y_tf.shape[1:])
        outs = [y_tf[:, t] for t in range(tf)]
        # Autoregressive tail: inherently sequential.
        x_t = outs[-1]
        for _ in range(tf, T):
            x_t = self.fno_forward(x_t)
            outs.append(x_t)
        return jnp.stack(outs, axis=1)


# ----------------------------------------------------------------------------
if __name__ == "__main__":
    key = jax.random.PRNGKey(0)
    k_model, k_data = jax.random.split(key)

    # small shapes consistent with the module's forward
    B, T, C, H, W = 2, 6, 4, 16, 16
    teacher_forcing_steps = 4

    model = FNO2D(
        n_modes=(8, 8),
        in_channels=C,
        hidden_channels=16,
        lifting_channels=16,
        projection_channels=16,
        out_channels=C,          # fed back autoregressively after teacher forcing
        n_layers=2,
        key=k_model,
    )

    x = jax.random.normal(k_data, (B, T, C, H, W), dtype=jnp.float32)
    fwd = jax.jit(functools.partial(model.forward,
                                    teacher_forcing_steps=teacher_forcing_steps))
    y = jax.block_until_ready(fwd(x))

    assert y.shape == (B, T, C, H, W), y.shape
    assert bool(jnp.all(jnp.isfinite(y)))
    print("KERNEL_OK")
</pallas_src>

<mosaic_0001>
module attributes {stable_mosaic.version = 11 : i64} {
  func.func @_mlp2_kernel(%arg0: i32, %arg1: memref<4x512xbf16, #tpu.memory_space<vmem>>, %arg2: memref<16x4xbf16, #tpu.memory_space<vmem>>, %arg3: memref<16x1xf32, #tpu.memory_space<vmem>>, %arg4: memref<16x16xbf16, #tpu.memory_space<vmem>>, %arg5: memref<16x1xf32, #tpu.memory_space<vmem>>, %arg6: memref<16x512xbf16, #tpu.memory_space<vmem>>) attributes {dimension_semantics = [#tpu.dimension_semantics<parallel>], iteration_bounds = array<i64: 4>, scalar_prefetch = 0 : i64, scratch_operands = 0 : i64, tpu.core_type = #tpu.core_type<tc>, window_params = [{transform_indices = @transform_0, window_bounds = array<i64: 4, 512>}, {pipeline_mode = #tpu.pipeline_mode<synchronous>, transform_indices = @transform_1, window_bounds = array<i64: 16, 4>}, {pipeline_mode = #tpu.pipeline_mode<synchronous>, transform_indices = @transform_2, window_bounds = array<i64: 16, 1>}, {pipeline_mode = #tpu.pipeline_mode<synchronous>, transform_indices = @transform_3, window_bounds = array<i64: 16, 16>}, {pipeline_mode = #tpu.pipeline_mode<synchronous>, transform_indices = @transform_4, window_bounds = array<i64: 16, 1>}, {transform_indices = @transform_5, window_bounds = array<i64: 16, 512>}]} {
    %c0 = arith.constant 0 : index
    %c0_0 = arith.constant 0 : index
    %0 = vector.load %arg2[%c0, %c0_0] : memref<16x4xbf16, #tpu.memory_space<vmem>>, vector<16x4xbf16>
    %c0_1 = arith.constant 0 : index
    %c0_2 = arith.constant 0 : index
    %1 = vector.load %arg1[%c0_1, %c0_2] : memref<4x512xbf16, #tpu.memory_space<vmem>>, vector<4x512xbf16>
    %cst = arith.constant dense<0.000000e+00> : vector<16x512xf32>
    %2 = tpu.matmul %0, %1, %cst {dimension_numbers = #tpu.dot_dimension_numbers<[1], [0], [0], [1], [0, 0, 1, 1], [], []>} : vector<16x4xbf16>, vector<4x512xbf16>, vector<16x512xf32> -> vector<16x512xf32>
    %c0_3 = arith.constant 0 : index
    %c0_4 = arith.constant 0 : index
    %3 = vector.load %arg3[%c0_3, %c0_4] : memref<16x1xf32, #tpu.memory_space<vmem>>, vector<16x1xf32>
    %4 = vector.broadcast %3 : vector<16x1xf32> to vector<16x512xf32>
    %5 = arith.addf %2, %4 : vector<16x512xf32>
    %6 = arith.mulf %5, %5 : vector<16x512xf32>
    %7 = arith.mulf %5, %6 : vector<16x512xf32>
    %cst_5 = arith.constant 4.471500e-02 : f32
    %8 = vector.broadcast %cst_5 : f32 to vector<16x512xf32>
    %9 = arith.mulf %8, %7 : vector<16x512xf32>
    %10 = arith.addf %5, %9 : vector<16x512xf32>
    %cst_6 = arith.constant 0.797884583 : f32
    %11 = vector.broadcast %cst_6 : f32 to vector<16x512xf32>
    %12 = arith.mulf %11, %10 : vector<16x512xf32>
    %13 = math.tanh %12 : vector<16x512xf32>
    %cst_7 = arith.constant 1.000000e+00 : f32
    %14 = vector.broadcast %cst_7 : f32 to vector<16x512xf32>
    %15 = arith.addf %14, %13 : vector<16x512xf32>
    %cst_8 = arith.constant 5.000000e-01 : f32
    %16 = vector.broadcast %cst_8 : f32 to vector<16x512xf32>
    %17 = arith.mulf %16, %15 : vector<16x512xf32>
    %18 = arith.mulf %5, %17 : vector<16x512xf32>
    %c0_9 = arith.constant 0 : index
    %c0_10 = arith.constant 0 : index
    %19 = vector.load %arg4[%c0_9, %c0_10] : memref<16x16xbf16, #tpu.memory_space<vmem>>, vector<16x16xbf16>
    %20 = arith.truncf %18 : vector<16x512xf32> to vector<16x512xbf16>
    %cst_11 = arith.constant dense<0.000000e+00> : vector<16x512xf32>
    %21 = tpu.matmul %19, %20, %cst_11 {dimension_numbers = #tpu.dot_dimension_numbers<[1], [0], [0], [1], [0, 0, 1, 1], [], []>} : vector<16x16xbf16>, vector<16x512xbf16>, vector<16x512xf32> -> vector<16x512xf32>
    %c0_12 = arith.constant 0 : index
    %c0_13 = arith.constant 0 : index
    %22 = vector.load %arg5[%c0_12, %c0_13] : memref<16x1xf32, #tpu.memory_space<vmem>>, vector<16x1xf32>
    %23 = vector.broadcast %22 : vector<16x1xf32> to vector<16x512xf32>
    %24 = arith.addf %21, %23 : vector<16x512xf32>
    %25 = arith.truncf %24 : vector<16x512xf32> to vector<16x512xbf16>
    %c0_14 = arith.constant 0 : index
    %c0_15 = arith.constant 0 : index
    %26 = vector.load %arg6[%c0_14, %c0_15] : memref<16x512xbf16, #tpu.memory_space<vmem>>, vector<16x512xbf16>
    tpu.vector_store %arg6[%c0_14, %c0_15], %25 {strides = array<i32>} : memref<16x512xbf16, #tpu.memory_space<vmem>>, vector<16x512xbf16>,
    return
  }
  func.func @transform_0(%arg0: i32) -> (i32, i32) {
    %c0_i32 = arith.constant 0 : i32
    %c0_i32_0 = arith.constant 0 : i32
    return %c0_i32, %arg0 : i32, i32
  }
  func.func @transform_1(%arg0: i32) -> (i32, i32) {
    %c0_i32 = arith.constant 0 : i32
    %c0_i32_0 = arith.constant 0 : i32
    %c0_i32_1 = arith.constant 0 : i32
    return %c0_i32, %c0_i32_0 : i32, i32
  }
  func.func @transform_2(%arg0: i32) -> (i32, i32) {
    %c0_i32 = arith.constant 0 : i32
    %c0_i32_0 = arith.constant 0 : i32
    %c0_i32_1 = arith.constant 0 : i32
    return %c0_i32, %c0_i32_0 : i32, i32
  }
  func.func @transform_3(%arg0: i32) -> (i32, i32) {
    %c0_i32 = arith.constant 0 : i32
    %c0_i32_0 = arith.constant 0 : i32
    %c0_i32_1 = arith.constant 0 : i32
    return %c0_i32, %c0_i32_0 : i32, i32
  }
  func.func @transform_4(%arg0: i32) -> (i32, i32) {
    %c0_i32 = arith.constant 0 : i32
    %c0_i32_0 = arith.constant 0 : i32
    %c0_i32_1 = arith.constant 0 : i32
    return %c0_i32, %c0_i32_0 : i32, i32
  }
  func.func @transform_5(%arg0: i32) -> (i32, i32) {
    %c0_i32 = arith.constant 0 : i32
    %c0_i32_0 = arith.constant 0 : i32
    return %c0_i32, %arg0 : i32, i32
  }
}

module attributes {stable_mosaic.version = 11 : i64} {
  func.func @_spectral_mix_kernel(%arg0: i32, %arg1: memref<10x8x16xbf16, #tpu.memory_space<vmem>>, %arg2: memref<10x8x16xbf16, #tpu.memory_space<vmem>>, %arg3: memref<10x16x16xbf16, #tpu.memory_space<vmem>>, %arg4: memref<10x16x16xbf16, #tpu.memory_space<vmem>>, %arg5: memref<10x8x16xf32, #tpu.memory_space<vmem>>, %arg6: memref<10x8x16xf32, #tpu.memory_space<vmem>>) attributes {dimension_semantics = [#tpu.dimension_semantics<parallel>], iteration_bounds = array<i64: 4>, scalar_prefetch = 0 : i64, scratch_operands = 0 : i64, tpu.core_type = #tpu.core_type<tc>, window_params = [{transform_indices = @transform_0, window_bounds = array<i64: 10, 8, 16>}, {transform_indices = @transform_1, window_bounds = array<i64: 10, 8, 16>}, {transform_indices = @transform_2, window_bounds = array<i64: 10, 16, 16>}, {transform_indices = @transform_3, window_bounds = array<i64: 10, 16, 16>}, {transform_indices = @transform_4, window_bounds = array<i64: 10, 8, 16>}, {transform_indices = @transform_5, window_bounds = array<i64: 10, 8, 16>}]} {
    %c0 = arith.constant 0 : index
    %c0_0 = arith.constant 0 : index
    %c0_1 = arith.constant 0 : index
    %0 = vector.load %arg1[%c0, %c0_0, %c0_1] : memref<10x8x16xbf16, #tpu.memory_space<vmem>>, vector<10x8x16xbf16>
    %c0_2 = arith.constant 0 : index
    %c0_3 = arith.constant 0 : index
    %c0_4 = arith.constant 0 : index
    %1 = vector.load %arg2[%c0_2, %c0_3, %c0_4] : memref<10x8x16xbf16, #tpu.memory_space<vmem>>, vector<10x8x16xbf16>
    %c0_5 = arith.constant 0 : index
    %c0_6 = arith.constant 0 : index
    %c0_7 = arith.constant 0 : index
    %2 = vector.load %arg3[%c0_5, %c0_6, %c0_7] : memref<10x16x16xbf16, #tpu.memory_space<vmem>>, vector<10x16x16xbf16>
    %c0_8 = arith.constant 0 : index
    %c0_9 = arith.constant 0 : index
    %c0_10 = arith.constant 0 : index
    %3 = vector.load %arg4[%c0_8, %c0_9, %c0_10] : memref<10x16x16xbf16, #tpu.memory_space<vmem>>, vector<10x16x16xbf16>
    %cst = arith.constant dense<0.000000e+00> : vector<10x8x16xf32>
    %4 = tpu.matmul %0, %2, %cst {dimension_numbers = #tpu.dot_dimension_numbers<[2], [1], [1], [2], [0, 0, 0, 1, 1, 2], [0], [0]>} : vector<10x8x16xbf16>, vector<10x16x16xbf16>, vector<10x8x16xf32> -> vector<10x8x16xf32>
    %cst_11 = arith.constant dense<0.000000e+00> : vector<10x8x16xf32>
    %5 = tpu.matmul %1, %3, %cst_11 {dimension_numbers = #tpu.dot_dimension_numbers<[2], [1], [1], [2], [0, 0, 0, 1, 1, 2], [0], [0]>} : vector<10x8x16xbf16>, vector<10x16x16xbf16>, vector<10x8x16xf32> -> vector<10x8x16xf32>
    %6 = arith.subf %4, %5 : vector<10x8x16xf32>
    %c0_12 = arith.constant 0 : index
    %c0_13 = arith.constant 0 : index
    %c0_14 = arith.constant 0 : index
    %7 = vector.load %arg5[%c0_12, %c0_13, %c0_14] : memref<10x8x16xf32, #tpu.memory_space<vmem>>, vector<10x8x16xf32>
    tpu.vector_store %arg5[%c0_12, %c0_13, %c0_14], %6 {strides = array<i32>} : memref<10x8x16xf32, #tpu.memory_space<vmem>>, vector<10x8x16xf32>,
    %cst_15 = arith.constant dense<0.000000e+00> : vector<10x8x16xf32>
    %8 = tpu.matmul %0, %3, %cst_15 {dimension_numbers = #tpu.dot_dimension_numbers<[2], [1], [1], [2], [0, 0, 0, 1, 1, 2], [0], [0]>} : vector<10x8x16xbf16>, vector<10x16x16xbf16>, vector<10x8x16xf32> -> vector<10x8x16xf32>
    %cst_16 = arith.constant dense<0.000000e+00> : vector<10x8x16xf32>
    %9 = tpu.matmul %1, %2, %cst_16 {dimension_numbers = #tpu.dot_dimension_numbers<[2], [1], [1], [2], [0, 0, 0, 1, 1, 2], [0], [0]>} : vector<10x8x16xbf16>, vector<10x16x16xbf16>, vector<10x8x16xf32> -> vector<10x8x16xf32>
    %10 = arith.addf %8, %9 : vector<10x8x16xf32>
    %c0_17 = arith.constant 0 : index
    %c0_18 = arith.constant 0 : index
    %c0_19 = arith.constant 0 : index
    %11 = vector.load %arg6[%c0_17, %c0_18, %c0_19] : memref<10x8x16xf32, #tpu.memory_space<vmem>>, vector<10x8x16xf32>
    tpu.vector_store %arg6[%c0_17, %c0_18, %c0_19], %10 {strides = array<i32>} : memref<10x8x16xf32, #tpu.memory_space<vmem>>, vector<10x8x16xf32>,
    return
  }
  func.func @transform_0(%arg0: i32) -> (i32, i32, i32) {
    %c0_i32 = arith.constant 0 : i32
    %c0_i32_0 = arith.constant 0 : i32
    %c0_i32_1 = arith.constant 0 : i32
    return %arg0, %c0_i32, %c0_i32_0 : i32, i32, i32
  }
  func.func @transform_1(%arg0: i32) -> (i32, i32, i32) {
    %c0_i32 = arith.constant 0 : i32
    %c0_i32_0 = arith.constant 0 : i32
    %c0_i32_1 = arith.constant 0 : i32
    return %arg0, %c0_i32, %c0_i32_0 : i32, i32, i32
  }
  func.func @transform_2(%arg0: i32) -> (i32, i32, i32) {
    %c0_i32 = arith.constant 0 : i32
    %c0_i32_0 = arith.constant 0 : i32
    %c0_i32_1 = arith.constant 0 : i32
    return %arg0, %c0_i32, %c0_i32_0 : i32, i32, i32
  }
  func.func @transform_3(%arg0: i32) -> (i32, i32, i32) {
    %c0_i32 = arith.constant 0 : i32
    %c0_i32_0 = arith.constant 0 : i32
    %c0_i32_1 = arith.constant 0 : i32
    return %arg0, %c0_i32, %c0_i32_0 : i32, i32, i32
  }
  func.func @transform_4(%arg0: i32) -> (i32, i32, i32) {
    %c0_i32 = arith.constant 0 : i32
    %c0_i32_0 = arith.constant 0 : i32
    %c0_i32_1 = arith.constant 0 : i32
    return %arg0, %c0_i32, %c0_i32_0 : i32, i32, i32
  }
  func.func @transform_5(%arg0: i32) -> (i32, i32, i32) {
    %c0_i32 = arith.constant 0 : i32
    %c0_i32_0 = arith.constant 0 : i32
    %c0_i32_1 = arith.constant 0 : i32
    return %arg0, %c0_i32, %c0_i32_0 : i32, i32, i32
  }
}

module attributes {stable_mosaic.version = 11 : i64} {
  func.func @_block_epilogue_kernel(%arg0: i32, %arg1: memref<16x512xbf16, #tpu.memory_space<vmem>>, %arg2: memref<16x16xbf16, #tpu.memory_space<vmem>>, %arg3: memref<16x1xf32, #tpu.memory_space<vmem>>, %arg4: memref<16x512xf32, #tpu.memory_space<vmem>>, %arg5: memref<16x512xbf16, #tpu.memory_space<vmem>>) attributes {dimension_semantics = [#tpu.dimension_semantics<parallel>], iteration_bounds = array<i64: 4>, scalar_prefetch = 0 : i64, scratch_operands = 0 : i64, tpu.core_type = #tpu.core_type<tc>, window_params = [{transform_indices = @transform_0, window_bounds = array<i64: 16, 512>}, {pipeline_mode = #tpu.pipeline_mode<synchronous>, transform_indices = @transform_1, window_bounds = array<i64: 16, 16>}, {pipeline_mode = #tpu.pipeline_mode<synchronous>, transform_indices = @transform_2, window_bounds = array<i64: 16, 1>}, {transform_indices = @transform_3, window_bounds = array<i64: 16, 512>}, {transform_indices = @transform_4, window_bounds = array<i64: 16, 512>}]} {
    %c0 = arith.constant 0 : index
    %c0_0 = arith.constant 0 : index
    %0 = vector.load %arg2[%c0, %c0_0] : memref<16x16xbf16, #tpu.memory_space<vmem>>, vector<16x16xbf16>
    %c0_1 = arith.constant 0 : index
    %c0_2 = arith.constant 0 : index
    %1 = vector.load %arg1[%c0_1, %c0_2] : memref<16x512xbf16, #tpu.memory_space<vmem>>, vector<16x512xbf16>
    %cst = arith.constant dense<0.000000e+00> : vector<16x512xf32>
    %2 = tpu.matmul %0, %1, %cst {dimension_numbers = #tpu.dot_dimension_numbers<[1], [0], [0], [1], [0, 0, 1, 1], [], []>} : vector<16x16xbf16>, vector<16x512xbf16>, vector<16x512xf32> -> vector<16x512xf32>
    %c0_3 = arith.constant 0 : index
    %c0_4 = arith.constant 0 : index
    %3 = vector.load %arg3[%c0_3, %c0_4] : memref<16x1xf32, #tpu.memory_space<vmem>>, vector<16x1xf32>
    %4 = vector.broadcast %3 : vector<16x1xf32> to vector<16x512xf32>
    %5 = arith.addf %2, %4 : vector<16x512xf32>
    %c0_5 = arith.constant 0 : index
    %c0_6 = arith.constant 0 : index
    %6 = vector.load %arg4[%c0_5, %c0_6] : memref<16x512xf32, #tpu.memory_space<vmem>>, vector<16x512xf32>
    %7 = arith.addf %5, %6 : vector<16x512xf32>
    %8 = arith.mulf %7, %7 : vector<16x512xf32>
    %9 = arith.mulf %7, %8 : vector<16x512xf32>
    %cst_7 = arith.constant 4.471500e-02 : f32
    %10 = vector.broadcast %cst_7 : f32 to vector<16x512xf32>
    %11 = arith.mulf %10, %9 : vector<16x512xf32>
    %12 = arith.addf %7, %11 : vector<16x512xf32>
    %cst_8 = arith.constant 0.797884583 : f32
    %13 = vector.broadcast %cst_8 : f32 to vector<16x512xf32>
    %14 = arith.mulf %13, %12 : vector<16x512xf32>
    %15 = math.tanh %14 : vector<16x512xf32>
    %cst_9 = arith.constant 1.000000e+00 : f32
    %16 = vector.broadcast %cst_9 : f32 to vector<16x512xf32>
    %17 = arith.addf %16, %15 : vector<16x512xf32>
    %cst_10 = arith.constant 5.000000e-01 : f32
    %18 = vector.broadcast %cst_10 : f32 to vector<16x512xf32>
    %19 = arith.mulf %18, %17 : vector<16x512xf32>
    %20 = arith.mulf %7, %19 : vector<16x512xf32>
    %21 = arith.truncf %20 : vector<16x512xf32> to vector<16x512xbf16>
    %c0_11 = arith.constant 0 : index
    %c0_12 = arith.constant 0 : index
    %22 = vector.load %arg5[%c0_11, %c0_12] : memref<16x512xbf16, #tpu.memory_space<vmem>>, vector<16x512xbf16>
    tpu.vector_store %arg5[%c0_11, %c0_12], %21 {strides = array<i32>} : memref<16x512xbf16, #tpu.memory_space<vmem>>, vector<16x512xbf16>,
    return
  }
  func.func @transform_0(%arg0: i32) -> (i32, i32) {
    %c0_i32 = arith.constant 0 : i32
    %c0_i32_0 = arith.constant 0 : i32
    return %c0_i32, %arg0 : i32, i32
  }
  func.func @transform_1(%arg0: i32) -> (i32, i32) {
    %c0_i32 = arith.constant 0 : i32
    %c0_i32_0 = arith.constant 0 : i32
    %c0_i32_1 = arith.constant 0 : i32
    return %c0_i32, %c0_i32_0 : i32, i32
  }
  func.func @transform_2(%arg0: i32) -> (i32, i32) {
    %c0_i32 = arith.constant 0 : i32
    %c0_i32_0 = arith.constant 0 : i32
    %c0_i32_1 = arith.constant 0 : i32
    return %c0_i32, %c0_i32_0 : i32, i32
  }
  func.func @transform_3(%arg0: i32) -> (i32, i32) {
    %c0_i32 = arith.constant 0 : i32
    %c0_i32_0 = arith.constant 0 : i32
    return %c0_i32, %arg0 : i32, i32
  }
  func.func @transform_4(%arg0: i32) -> (i32, i32) {
    %c0_i32 = arith.constant 0 : i32
    %c0_i32_0 = arith.constant 0 : i32
    return %c0_i32, %arg0 : i32, i32
  }
}

module attributes {stable_mosaic.version = 11 : i64} {
  func.func @_block_epilogue_kernel(%arg0: i32, %arg1: memref<16x512xbf16, #tpu.memory_space<vmem>>, %arg2: memref<16x16xbf16, #tpu.memory_space<vmem>>, %arg3: memref<16x1xf32, #tpu.memory_space<vmem>>, %arg4: memref<16x512xf32, #tpu.memory_space<vmem>>, %arg5: memref<16x512xbf16, #tpu.memory_space<vmem>>) attributes {dimension_semantics = [#tpu.dimension_semantics<parallel>], iteration_bounds = array<i64: 4>, scalar_prefetch = 0 : i64, scratch_operands = 0 : i64, tpu.core_type = #tpu.core_type<tc>, window_params = [{transform_indices = @transform_0, window_bounds = array<i64: 16, 512>}, {pipeline_mode = #tpu.pipeline_mode<synchronous>, transform_indices = @transform_1, window_bounds = array<i64: 16, 16>}, {pipeline_mode = #tpu.pipeline_mode<synchronous>, transform_indices = @transform_2, window_bounds = array<i64: 16, 1>}, {transform_indices = @transform_3, window_bounds = array<i64: 16, 512>}, {transform_indices = @transform_4, window_bounds = array<i64: 16, 512>}]} {
    %c0 = arith.constant 0 : index
    %c0_0 = arith.constant 0 : index
    %0 = vector.load %arg2[%c0, %c0_0] : memref<16x16xbf16, #tpu.memory_space<vmem>>, vector<16x16xbf16>
    %c0_1 = arith.constant 0 : index
    %c0_2 = arith.constant 0 : index
    %1 = vector.load %arg1[%c0_1, %c0_2] : memref<16x512xbf16, #tpu.memory_space<vmem>>, vector<16x512xbf16>
    %cst = arith.constant dense<0.000000e+00> : vector<16x512xf32>
    %2 = tpu.matmul %0, %1, %cst {dimension_numbers = #tpu.dot_dimension_numbers<[1], [0], [0], [1], [0, 0, 1, 1], [], []>} : vector<16x16xbf16>, vector<16x512xbf16>, vector<16x512xf32> -> vector<16x512xf32>
    %c0_3 = arith.constant 0 : index
    %c0_4 = arith.constant 0 : index
    %3 = vector.load %arg3[%c0_3, %c0_4] : memref<16x1xf32, #tpu.memory_space<vmem>>, vector<16x1xf32>
    %4 = vector.broadcast %3 : vector<16x1xf32> to vector<16x512xf32>
    %5 = arith.addf %2, %4 : vector<16x512xf32>
    %c0_5 = arith.constant 0 : index
    %c0_6 = arith.constant 0 : index
    %6 = vector.load %arg4[%c0_5, %c0_6] : memref<16x512xf32, #tpu.memory_space<vmem>>, vector<16x512xf32>
    %7 = arith.addf %5, %6 : vector<16x512xf32>
    %8 = arith.truncf %7 : vector<16x512xf32> to vector<16x512xbf16>
    %c0_7 = arith.constant 0 : index
    %c0_8 = arith.constant 0 : index
    %9 = vector.load %arg5[%c0_7, %c0_8] : memref<16x512xbf16, #tpu.memory_space<vmem>>, vector<16x512xbf16>
    tpu.vector_store %arg5[%c0_7, %c0_8], %8 {strides = array<i32>} : memref<16x512xbf16, #tpu.memory_space<vmem>>, vector<16x512xbf16>,
    return
  }
  func.func @transform_0(%arg0: i32) -> (i32, i32) {
    %c0_i32 = arith.constant 0 : i32
    %c0_i32_0 = arith.constant 0 : i32
    return %c0_i32, %arg0 : i32, i32
  }
  func.func @transform_1(%arg0: i32) -> (i32, i32) {
    %c0_i32 = arith.constant 0 : i32
    %c0_i32_0 = arith.constant 0 : i32
    %c0_i32_1 = arith.constant 0 : i32
    return %c0_i32, %c0_i32_0 : i32, i32
  }
  func.func @transform_2(%arg0: i32) -> (i32, i32) {
    %c0_i32 = arith.constant 0 : i32
    %c0_i32_0 = arith.constant 0 : i32
    %c0_i32_1 = arith.constant 0 : i32
    return %c0_i32, %c0_i32_0 : i32, i32
  }
  func.func @transform_3(%arg0: i32) -> (i32, i32) {
    %c0_i32 = arith.constant 0 : i32
    %c0_i32_0 = arith.constant 0 : i32
    return %c0_i32, %arg0 : i32, i32
  }
  func.func @transform_4(%arg0: i32) -> (i32, i32) {
    %c0_i32 = arith.constant 0 : i32
    %c0_i32_0 = arith.constant 0 : i32
    return %c0_i32, %arg0 : i32, i32
  }
}

module attributes {stable_mosaic.version = 11 : i64} {
  func.func @_mlp2_kernel(%arg0: i32, %arg1: memref<16x512xbf16, #tpu.memory_space<vmem>>, %arg2: memref<16x16xbf16, #tpu.memory_space<vmem>>, %arg3: memref<16x1xf32, #tpu.memory_space<vmem>>, %arg4: memref<4x16xbf16, #tpu.memory_space<vmem>>, %arg5: memref<4x1xf32, #tpu.memory_space<vmem>>, %arg6: memref<4x512xf32, #tpu.memory_space<vmem>>) attributes {dimension_semantics = [#tpu.dimension_semantics<parallel>], iteration_bounds = array<i64: 4>, scalar_prefetch = 0 : i64, scratch_operands = 0 : i64, tpu.core_type = #tpu.core_type<tc>, window_params = [{transform_indices = @transform_0, window_bounds = array<i64: 16, 512>}, {pipeline_mode = #tpu.pipeline_mode<synchronous>, transform_indices = @transform_1, window_bounds = array<i64: 16, 16>}, {pipeline_mode = #tpu.pipeline_mode<synchronous>, transform_indices = @transform_2, window_bounds = array<i64: 16, 1>}, {pipeline_mode = #tpu.pipeline_mode<synchronous>, transform_indices = @transform_3, window_bounds = array<i64: 4, 16>}, {pipeline_mode = #tpu.pipeline_mode<synchronous>, transform_indices = @transform_4, window_bounds = array<i64: 4, 1>}, {transform_indices = @transform_5, window_bounds = array<i64: 4, 512>}]} {
    %c0 = arith.constant 0 : index
    %c0_0 = arith.constant 0 : index
    %0 = vector.load %arg2[%c0, %c0_0] : memref<16x16xbf16, #tpu.memory_space<vmem>>, vector<16x16xbf16>
    %c0_1 = arith.constant 0 : index
    %c0_2 = arith.constant 0 : index
    %1 = vector.load %arg1[%c0_1, %c0_2] : memref<16x512xbf16, #tpu.memory_space<vmem>>, vector<16x512xbf16>
    %cst = arith.constant dense<0.000000e+00> : vector<16x512xf32>
    %2 = tpu.matmul %0, %1, %cst {dimension_numbers = #tpu.dot_dimension_numbers<[1], [0], [0], [1], [0, 0, 1, 1], [], []>} : vector<16x16xbf16>, vector<16x512xbf16>, vector<16x512xf32> -> vector<16x512xf32>
    %c0_3 = arith.constant 0 : index
    %c0_4 = arith.constant 0 : index
    %3 = vector.load %arg3[%c0_3, %c0_4] : memref<16x1xf32, #tpu.memory_space<vmem>>, vector<16x1xf32>
    %4 = vector.broadcast %3 : vector<16x1xf32> to vector<16x512xf32>
    %5 = arith.addf %2, %4 : vector<16x512xf32>
    %6 = arith.mulf %5, %5 : vector<16x512xf32>
    %7 = arith.mulf %5, %6 : vector<16x512xf32>
    %cst_5 = arith.constant 4.471500e-02 : f32
    %8 = vector.broadcast %cst_5 : f32 to vector<16x512xf32>
    %9 = arith.mulf %8, %7 : vector<16x512xf32>
    %10 = arith.addf %5, %9 : vector<16x512xf32>
    %cst_6 = arith.constant 0.797884583 : f32
    %11 = vector.broadcast %cst_6 : f32 to vector<16x512xf32>
    %12 = arith.mulf %11, %10 : vector<16x512xf32>
    %13 = math.tanh %12 : vector<16x512xf32>
    %cst_7 = arith.constant 1.000000e+00 : f32
    %14 = vector.broadcast %cst_7 : f32 to vector<16x512xf32>
    %15 = arith.addf %14, %13 : vector<16x512xf32>
    %cst_8 = arith.constant 5.000000e-01 : f32
    %16 = vector.broadcast %cst_8 : f32 to vector<16x512xf32>
    %17 = arith.mulf %16, %15 : vector<16x512xf32>
    %18 = arith.mulf %5, %17 : vector<16x512xf32>
    %c0_9 = arith.constant 0 : index
    %c0_10 = arith.constant 0 : index
    %19 = vector.load %arg4[%c0_9, %c0_10] : memref<4x16xbf16, #tpu.memory_space<vmem>>, vector<4x16xbf16>
    %20 = arith.truncf %18 : vector<16x512xf32> to vector<16x512xbf16>
    %cst_11 = arith.constant dense<0.000000e+00> : vector<4x512xf32>
    %21 = tpu.matmul %19, %20, %cst_11 {dimension_numbers = #tpu.dot_dimension_numbers<[1], [0], [0], [1], [0, 0, 1, 1], [], []>} : vector<4x16xbf16>, vector<16x512xbf16>, vector<4x512xf32> -> vector<4x512xf32>
    %c0_12 = arith.constant 0 : index
    %c0_13 = arith.constant 0 : index
    %22 = vector.load %arg5[%c0_12, %c0_13] : memref<4x1xf32, #tpu.memory_space<vmem>>, vector<4x1xf32>
    %23 = vector.broadcast %22 : vector<4x1xf32> to vector<4x512xf32>
    %24 = arith.addf %21, %23 : vector<4x512xf32>
    %c0_14 = arith.constant 0 : index
    %c0_15 = arith.constant 0 : index
    %25 = vector.load %arg6[%c0_14, %c0_15] : memref<4x512xf32, #tpu.memory_space<vmem>>, vector<4x512xf32>
    tpu.vector_store %arg6[%c0_14, %c0_15], %24 {strides = array<i32>} : memref<4x512xf32, #tpu.memory_space<vmem>>, vector<4x512xf32>,
    return
  }
  func.func @transform_0(%arg0: i32) -> (i32, i32) {
    %c0_i32 = arith.constant 0 : i32
    %c0_i32_0 = arith.constant 0 : i32
    return %c0_i32, %arg0 : i32, i32
  }
  func.func @transform_1(%arg0: i32) -> (i32, i32) {
    %c0_i32 = arith.constant 0 : i32
    %c0_i32_0 = arith.constant 0 : i32
    %c0_i32_1 = arith.constant 0 : i32
    return %c0_i32, %c0_i32_0 : i32, i32
  }
  func.func @transform_2(%arg0: i32) -> (i32, i32) {
    %c0_i32 = arith.constant 0 : i32
    %c0_i32_0 = arith.constant 0 : i32
    %c0_i32_1 = arith.constant 0 : i32
    return %c0_i32, %c0_i32_0 : i32, i32
  }
  func.func @transform_3(%arg0: i32) -> (i32, i32) {
    %c0_i32 = arith.constant 0 : i32
    %c0_i32_0 = arith.constant 0 : i32
    %c0_i32_1 = arith.constant 0 : i32
    return %c0_i32, %c0_i32_0 : i32, i32
  }
  func.func @transform_4(%arg0: i32) -> (i32, i32) {
    %c0_i32 = arith.constant 0 : i32
    %c0_i32_0 = arith.constant 0 : i32
    %c0_i32_1 = arith.constant 0 : i32
    return %c0_i32, %c0_i32_0 : i32, i32
  }
  func.func @transform_5(%arg0: i32) -> (i32, i32) {
    %c0_i32 = arith.constant 0 : i32
    %c0_i32_0 = arith.constant 0 : i32
    return %c0_i32, %arg0 : i32, i32
  }
}

module attributes {stable_mosaic.version = 11 : i64} {
  func.func @_mlp2_kernel(%arg0: i32, %arg1: memref<4x256xbf16, #tpu.memory_space<vmem>>, %arg2: memref<16x4xbf16, #tpu.memory_space<vmem>>, %arg3: memref<16x1xf32, #tpu.memory_space<vmem>>, %arg4: memref<16x16xbf16, #tpu.memory_space<vmem>>, %arg5: memref<16x1xf32, #tpu.memory_space<vmem>>, %arg6: memref<16x256xbf16, #tpu.memory_space<vmem>>) attributes {dimension_semantics = [#tpu.dimension_semantics<parallel>], iteration_bounds = array<i64: 2>, scalar_prefetch = 0 : i64, scratch_operands = 0 : i64, tpu.core_type = #tpu.core_type<tc>, window_params = [{transform_indices = @transform_0, window_bounds = array<i64: 4, 256>}, {pipeline_mode = #tpu.pipeline_mode<synchronous>, transform_indices = @transform_1, window_bounds = array<i64: 16, 4>}, {pipeline_mode = #tpu.pipeline_mode<synchronous>, transform_indices = @transform_2, window_bounds = array<i64: 16, 1>}, {pipeline_mode = #tpu.pipeline_mode<synchronous>, transform_indices = @transform_3, window_bounds = array<i64: 16, 16>}, {pipeline_mode = #tpu.pipeline_mode<synchronous>, transform_indices = @transform_4, window_bounds = array<i64: 16, 1>}, {transform_indices = @transform_5, window_bounds = array<i64: 16, 256>}]} {
    %c0 = arith.constant 0 : index
    %c0_0 = arith.constant 0 : index
    %0 = vector.load %arg2[%c0, %c0_0] : memref<16x4xbf16, #tpu.memory_space<vmem>>, vector<16x4xbf16>
    %c0_1 = arith.constant 0 : index
    %c0_2 = arith.constant 0 : index
    %1 = vector.load %arg1[%c0_1, %c0_2] : memref<4x256xbf16, #tpu.memory_space<vmem>>, vector<4x256xbf16>
    %cst = arith.constant dense<0.000000e+00> : vector<16x256xf32>
    %2 = tpu.matmul %0, %1, %cst {dimension_numbers = #tpu.dot_dimension_numbers<[1], [0], [0], [1], [0, 0, 1, 1], [], []>} : vector<16x4xbf16>, vector<4x256xbf16>, vector<16x256xf32> -> vector<16x256xf32>
    %c0_3 = arith.constant 0 : index
    %c0_4 = arith.constant 0 : index
    %3 = vector.load %arg3[%c0_3, %c0_4] : memref<16x1xf32, #tpu.memory_space<vmem>>, vector<16x1xf32>
    %4 = vector.broadcast %3 : vector<16x1xf32> to vector<16x256xf32>
    %5 = arith.addf %2, %4 : vector<16x256xf32>
    %6 = arith.mulf %5, %5 : vector<16x256xf32>
    %7 = arith.mulf %5, %6 : vector<16x256xf32>
    %cst_5 = arith.constant 4.471500e-02 : f32
    %8 = vector.broadcast %cst_5 : f32 to vector<16x256xf32>
    %9 = arith.mulf %8, %7 : vector<16x256xf32>
    %10 = arith.addf %5, %9 : vector<16x256xf32>
    %cst_6 = arith.constant 0.797884583 : f32
    %11 = vector.broadcast %cst_6 : f32 to vector<16x256xf32>
    %12 = arith.mulf %11, %10 : vector<16x256xf32>
    %13 = math.tanh %12 : vector<16x256xf32>
    %cst_7 = arith.constant 1.000000e+00 : f32
    %14 = vector.broadcast %cst_7 : f32 to vector<16x256xf32>
    %15 = arith.addf %14, %13 : vector<16x256xf32>
    %cst_8 = arith.constant 5.000000e-01 : f32
    %16 = vector.broadcast %cst_8 : f32 to vector<16x256xf32>
    %17 = arith.mulf %16, %15 : vector<16x256xf32>
    %18 = arith.mulf %5, %17 : vector<16x256xf32>
    %c0_9 = arith.constant 0 : index
    %c0_10 = arith.constant 0 : index
    %19 = vector.load %arg4[%c0_9, %c0_10] : memref<16x16xbf16, #tpu.memory_space<vmem>>, vector<16x16xbf16>
    %20 = arith.truncf %18 : vector<16x256xf32> to vector<16x256xbf16>
    %cst_11 = arith.constant dense<0.000000e+00> : vector<16x256xf32>
    %21 = tpu.matmul %19, %20, %cst_11 {dimension_numbers = #tpu.dot_dimension_numbers<[1], [0], [0], [1], [0, 0, 1, 1], [], []>} : vector<16x16xbf16>, vector<16x256xbf16>, vector<16x256xf32> -> vector<16x256xf32>
    %c0_12 = arith.constant 0 : index
    %c0_13 = arith.constant 0 : index
    %22 = vector.load %arg5[%c0_12, %c0_13] : memref<16x1xf32, #tpu.memory_space<vmem>>, vector<16x1xf32>
    %23 = vector.broadcast %22 : vector<16x1xf32> to vector<16x256xf32>
    %24 = arith.addf %21, %23 : vector<16x256xf32>
    %25 = arith.truncf %24 : vector<16x256xf32> to vector<16x256xbf16>
    %c0_14 = arith.constant 0 : index
    %c0_15 = arith.constant 0 : index
    %26 = vector.load %arg6[%c0_14, %c0_15] : memref<16x256xbf16, #tpu.memory_space<vmem>>, vector<16x256xbf16>
    tpu.vector_store %arg6[%c0_14, %c0_15], %25 {strides = array<i32>} : memref<16x256xbf16, #tpu.memory_space<vmem>>, vector<16x256xbf16>,
    return
  }
  func.func @transform_0(%arg0: i32) -> (i32, i32) {
    %c0_i32 = arith.constant 0 : i32
    %c0_i32_0 = arith.constant 0 : i32
    return %c0_i32, %arg0 : i32, i32
  }
  func.func @transform_1(%arg0: i32) -> (i32, i32) {
    %c0_i32 = arith.constant 0 : i32
    %c0_i32_0 = arith.constant 0 : i32
    %c0_i32_1 = arith.constant 0 : i32
    return %c0_i32, %c0_i32_0 : i32, i32
  }
  func.func @transform_2(%arg0: i32) -> (i32, i32) {
    %c0_i32 = arith.constant 0 : i32
    %c0_i32_0 = arith.constant 0 : i32
    %c0_i32_1 = arith.constant 0 : i32
    return %c0_i32, %c0_i32_0 : i32, i32
  }
  func.func @transform_3(%arg0: i32) -> (i32, i32) {
    %c0_i32 = arith.constant 0 : i32
    %c0_i32_0 = arith.constant 0 : i32
    %c0_i32_1 = arith.constant 0 : i32
    return %c0_i32, %c0_i32_0 : i32, i32
  }
  func.func @transform_4(%arg0: i32) -> (i32, i32) {
    %c0_i32 = arith.constant 0 : i32
    %c0_i32_0 = arith.constant 0 : i32
    %c0_i32_1 = arith.constant 0 : i32
    return %c0_i32, %c0_i32_0 : i32, i32
  }
  func.func @transform_5(%arg0: i32) -> (i32, i32) {
    %c0_i32 = arith.constant 0 : i32
    %c0_i32_0 = arith.constant 0 : i32
    return %c0_i32, %arg0 : i32, i32
  }
}

module attributes {stable_mosaic.version = 11 : i64} {
  func.func @_spectral_mix_kernel(%arg0: i32, %arg1: memref<10x2x16xbf16, #tpu.memory_space<vmem>>, %arg2: memref<10x2x16xbf16, #tpu.memory_space<vmem>>, %arg3: memref<10x16x16xbf16, #tpu.memory_space<vmem>>, %arg4: memref<10x16x16xbf16, #tpu.memory_space<vmem>>, %arg5: memref<10x2x16xf32, #tpu.memory_space<vmem>>, %arg6: memref<10x2x16xf32, #tpu.memory_space<vmem>>) attributes {dimension_semantics = [#tpu.dimension_semantics<parallel>], iteration_bounds = array<i64: 4>, scalar_prefetch = 0 : i64, scratch_operands = 0 : i64, tpu.core_type = #tpu.core_type<tc>, window_params = [{transform_indices = @transform_0, window_bounds = array<i64: 10, 2, 16>}, {transform_indices = @transform_1, window_bounds = array<i64: 10, 2, 16>}, {transform_indices = @transform_2, window_bounds = array<i64: 10, 16, 16>}, {transform_indices = @transform_3, window_bounds = array<i64: 10, 16, 16>}, {transform_indices = @transform_4, window_bounds = array<i64: 10, 2, 16>}, {transform_indices = @transform_5, window_bounds = array<i64: 10, 2, 16>}]} {
    %c0 = arith.constant 0 : index
    %c0_0 = arith.constant 0 : index
    %c0_1 = arith.constant 0 : index
    %0 = vector.load %arg1[%c0, %c0_0, %c0_1] : memref<10x2x16xbf16, #tpu.memory_space<vmem>>, vector<10x2x16xbf16>
    %c0_2 = arith.constant 0 : index
    %c0_3 = arith.constant 0 : index
    %c0_4 = arith.constant 0 : index
    %1 = vector.load %arg2[%c0_2, %c0_3, %c0_4] : memref<10x2x16xbf16, #tpu.memory_space<vmem>>, vector<10x2x16xbf16>
    %c0_5 = arith.constant 0 : index
    %c0_6 = arith.constant 0 : index
    %c0_7 = arith.constant 0 : index
    %2 = vector.load %arg3[%c0_5, %c0_6, %c0_7] : memref<10x16x16xbf16, #tpu.memory_space<vmem>>, vector<10x16x16xbf16>
    %c0_8 = arith.constant 0 : index
    %c0_9 = arith.constant 0 : index
    %c0_10 = arith.constant 0 : index
    %3 = vector.load %arg4[%c0_8, %c0_9, %c0_10] : memref<10x16x16xbf16, #tpu.memory_space<vmem>>, vector<10x16x16xbf16>
    %cst = arith.constant dense<0.000000e+00> : vector<10x2x16xf32>
    %4 = tpu.matmul %0, %2, %cst {dimension_numbers = #tpu.dot_dimension_numbers<[2], [1], [1], [2], [0, 0, 0, 1, 1, 2], [0], [0]>} : vector<10x2x16xbf16>, vector<10x16x16xbf16>, vector<10x2x16xf32> -> vector<10x2x16xf32>
    %cst_11 = arith.constant dense<0.000000e+00> : vector<10x2x16xf32>
    %5 = tpu.matmul %1, %3, %cst_11 {dimension_numbers = #tpu.dot_dimension_numbers<[2], [1], [1], [2], [0, 0, 0, 1, 1, 2], [0], [0]>} : vector<10x2x16xbf16>, vector<10x16x16xbf16>, vector<10x2x16xf32> -> vector<10x2x16xf32>
    %6 = arith.subf %4, %5 : vector<10x2x16xf32>
    %c0_12 = arith.constant 0 : index
    %c0_13 = arith.constant 0 : index
    %c0_14 = arith.constant 0 : index
    %7 = vector.load %arg5[%c0_12, %c0_13, %c0_14] : memref<10x2x16xf32, #tpu.memory_space<vmem>>, vector<10x2x16xf32>
    tpu.vector_store %arg5[%c0_12, %c0_13, %c0_14], %6 {strides = array<i32>} : memref<10x2x16xf32, #tpu.memory_space<vmem>>, vector<10x2x16xf32>,
    %cst_15 = arith.constant dense<0.000000e+00> : vector<10x2x16xf32>
    %8 = tpu.matmul %0, %3, %cst_15 {dimension_numbers = #tpu.dot_dimension_numbers<[2], [1], [1], [2], [0, 0, 0, 1, 1, 2], [0], [0]>} : vector<10x2x16xbf16>, vector<10x16x16xbf16>, vector<10x2x16xf32> -> vector<10x2x16xf32>
    %cst_16 = arith.constant dense<0.000000e+00> : vector<10x2x16xf32>
    %9 = tpu.matmul %1, %2, %cst_16 {dimension_numbers = #tpu.dot_dimension_numbers<[2], [1], [1], [2], [0, 0, 0, 1, 1, 2], [0], [0]>} : vector<10x2x16xbf16>, vector<10x16x16xbf16>, vector<10x2x16xf32> -> vector<10x2x16xf32>
    %10 = arith.addf %8, %9 : vector<10x2x16xf32>
    %c0_17 = arith.constant 0 : index
    %c0_18 = arith.constant 0 : index
    %c0_19 = arith.constant 0 : index
    %11 = vector.load %arg6[%c0_17, %c0_18, %c0_19] : memref<10x2x16xf32, #tpu.memory_space<vmem>>, vector<10x2x16xf32>
    tpu.vector_store %arg6[%c0_17, %c0_18, %c0_19], %10 {strides = array<i32>} : memref<10x2x16xf32, #tpu.memory_space<vmem>>, vector<10x2x16xf32>,
    return
  }
  func.func @transform_0(%arg0: i32) -> (i32, i32, i32) {
    %c0_i32 = arith.constant 0 : i32
    %c0_i32_0 = arith.constant 0 : i32
    %c0_i32_1 = arith.constant 0 : i32
    return %arg0, %c0_i32, %c0_i32_0 : i32, i32, i32
  }
  func.func @transform_1(%arg0: i32) -> (i32, i32, i32) {
    %c0_i32 = arith.constant 0 : i32
    %c0_i32_0 = arith.constant 0 : i32
    %c0_i32_1 = arith.constant 0 : i32
    return %arg0, %c0_i32, %c0_i32_0 : i32, i32, i32
  }
  func.func @transform_2(%arg0: i32) -> (i32, i32, i32) {
    %c0_i32 = arith.constant 0 : i32
    %c0_i32_0 = arith.constant 0 : i32
    %c0_i32_1 = arith.constant 0 : i32
    return %arg0, %c0_i32, %c0_i32_0 : i32, i32, i32
  }
  func.func @transform_3(%arg0: i32) -> (i32, i32, i32) {
    %c0_i32 = arith.constant 0 : i32
    %c0_i32_0 = arith.constant 0 : i32
    %c0_i32_1 = arith.constant 0 : i32
    return %arg0, %c0_i32, %c0_i32_0 : i32, i32, i32
  }
  func.func @transform_4(%arg0: i32) -> (i32, i32, i32) {
    %c0_i32 = arith.constant 0 : i32
    %c0_i32_0 = arith.constant 0 : i32
    %c0_i32_1 = arith.constant 0 : i32
    return %arg0, %c0_i32, %c0_i32_0 : i32, i32, i32
  }
  func.func @transform_5(%arg0: i32) -> (i32, i32, i32) {
    %c0_i32 = arith.constant 0 : i32
    %c0_i32_0 = arith.constant 0 : i32
    %c0_i32_1 = arith.constant 0 : i32
    return %arg0, %c0_i32, %c0_i32_0 : i32, i32, i32
  }
}

module attributes {stable_mosaic.version = 11 : i64} {
  func.func @_block_epilogue_kernel(%arg0: i32, %arg1: memref<16x256xbf16, #tpu.memory_space<vmem>>, %arg2: memref<16x16xbf16, #tpu.memory_space<vmem>>, %arg3: memref<16x1xf32, #tpu.memory_space<vmem>>, %arg4: memref<16x256xf32, #tpu.memory_space<vmem>>, %arg5: memref<16x256xbf16, #tpu.memory_space<vmem>>) attributes {dimension_semantics = [#tpu.dimension_semantics<parallel>], iteration_bounds = array<i64: 2>, scalar_prefetch = 0 : i64, scratch_operands = 0 : i64, tpu.core_type = #tpu.core_type<tc>, window_params = [{transform_indices = @transform_0, window_bounds = array<i64: 16, 256>}, {pipeline_mode = #tpu.pipeline_mode<synchronous>, transform_indices = @transform_1, window_bounds = array<i64: 16, 16>}, {pipeline_mode = #tpu.pipeline_mode<synchronous>, transform_indices = @transform_2, window_bounds = array<i64: 16, 1>}, {transform_indices = @transform_3, window_bounds = array<i64: 16, 256>}, {transform_indices = @transform_4, window_bounds = array<i64: 16, 256>}]} {
    %c0 = arith.constant 0 : index
    %c0_0 = arith.constant 0 : index
    %0 = vector.load %arg2[%c0, %c0_0] : memref<16x16xbf16, #tpu.memory_space<vmem>>, vector<16x16xbf16>
    %c0_1 = arith.constant 0 : index
    %c0_2 = arith.constant 0 : index
    %1 = vector.load %arg1[%c0_1, %c0_2] : memref<16x256xbf16, #tpu.memory_space<vmem>>, vector<16x256xbf16>
    %cst = arith.constant dense<0.000000e+00> : vector<16x256xf32>
    %2 = tpu.matmul %0, %1, %cst {dimension_numbers = #tpu.dot_dimension_numbers<[1], [0], [0], [1], [0, 0, 1, 1], [], []>} : vector<16x16xbf16>, vector<16x256xbf16>, vector<16x256xf32> -> vector<16x256xf32>
    %c0_3 = arith.constant 0 : index
    %c0_4 = arith.constant 0 : index
    %3 = vector.load %arg3[%c0_3, %c0_4] : memref<16x1xf32, #tpu.memory_space<vmem>>, vector<16x1xf32>
    %4 = vector.broadcast %3 : vector<16x1xf32> to vector<16x256xf32>
    %5 = arith.addf %2, %4 : vector<16x256xf32>
    %c0_5 = arith.constant 0 : index
    %c0_6 = arith.constant 0 : index
    %6 = vector.load %arg4[%c0_5, %c0_6] : memref<16x256xf32, #tpu.memory_space<vmem>>, vector<16x256xf32>
    %7 = arith.addf %5, %6 : vector<16x256xf32>
    %8 = arith.mulf %7, %7 : vector<16x256xf32>
    %9 = arith.mulf %7, %8 : vector<16x256xf32>
    %cst_7 = arith.constant 4.471500e-02 : f32
    %10 = vector.broadcast %cst_7 : f32 to vector<16x256xf32>
    %11 = arith.mulf %10, %9 : vector<16x256xf32>
    %12 = arith.addf %7, %11 : vector<16x256xf32>
    %cst_8 = arith.constant 0.797884583 : f32
    %13 = vector.broadcast %cst_8 : f32 to vector<16x256xf32>
    %14 = arith.mulf %13, %12 : vector<16x256xf32>
    %15 = math.tanh %14 : vector<16x256xf32>
    %cst_9 = arith.constant 1.000000e+00 : f32
    %16 = vector.broadcast %cst_9 : f32 to vector<16x256xf32>
    %17 = arith.addf %16, %15 : vector<16x256xf32>
    %cst_10 = arith.constant 5.000000e-01 : f32
    %18 = vector.broadcast %cst_10 : f32 to vector<16x256xf32>
    %19 = arith.mulf %18, %17 : vector<16x256xf32>
    %20 = arith.mulf %7, %19 : vector<16x256xf32>
    %21 = arith.truncf %20 : vector<16x256xf32> to vector<16x256xbf16>
    %c0_11 = arith.constant 0 : index
    %c0_12 = arith.constant 0 : index
    %22 = vector.load %arg5[%c0_11, %c0_12] : memref<16x256xbf16, #tpu.memory_space<vmem>>, vector<16x256xbf16>
    tpu.vector_store %arg5[%c0_11, %c0_12], %21 {strides = array<i32>} : memref<16x256xbf16, #tpu.memory_space<vmem>>, vector<16x256xbf16>,
    return
  }
  func.func @transform_0(%arg0: i32) -> (i32, i32) {
    %c0_i32 = arith.constant 0 : i32
    %c0_i32_0 = arith.constant 0 : i32
    return %c0_i32, %arg0 : i32, i32
  }
  func.func @transform_1(%arg0: i32) -> (i32, i32) {
    %c0_i32 = arith.constant 0 : i32
    %c0_i32_0 = arith.constant 0 : i32
    %c0_i32_1 = arith.constant 0 : i32
    return %c0_i32, %c0_i32_0 : i32, i32
  }
  func.func @transform_2(%arg0: i32) -> (i32, i32) {
    %c0_i32 = arith.constant 0 : i32
    %c0_i32_0 = arith.constant 0 : i32
    %c0_i32_1 = arith.constant 0 : i32
    return %c0_i32, %c0_i32_0 : i32, i32
  }
  func.func @transform_3(%arg0: i32) -> (i32, i32) {
    %c0_i32 = arith.constant 0 : i32
    %c0_i32_0 = arith.constant 0 : i32
    return %c0_i32, %arg0 : i32, i32
  }
  func.func @transform_4(%arg0: i32) -> (i32, i32) {
    %c0_i32 = arith.constant 0 : i32
    %c0_i32_0 = arith.constant 0 : i32
    return %c0_i32, %arg0 : i32, i32
  }
}

module attributes {stable_mosaic.version = 11 : i64} {
  func.func @_block_epilogue_kernel(%arg0: i32, %arg1: memref<16x256xbf16, #tpu.memory_space<vmem>>, %arg2: memref<16x16xbf16, #tpu.memory_space<vmem>>, %arg3: memref<16x1xf32, #tpu.memory_space<vmem>>, %arg4: memref<16x256xf32, #tpu.memory_space<vmem>>, %arg5: memref<16x256xbf16, #tpu.memory_space<vmem>>) attributes {dimension_semantics = [#tpu.dimension_semantics<parallel>], iteration_bounds = array<i64: 2>, scalar_prefetch = 0 : i64, scratch_operands = 0 : i64, tpu.core_type = #tpu.core_type<tc>, window_params = [{transform_indices = @transform_0, window_bounds = array<i64: 16, 256>}, {pipeline_mode = #tpu.pipeline_mode<synchronous>, transform_indices = @transform_1, window_bounds = array<i64: 16, 16>}, {pipeline_mode = #tpu.pipeline_mode<synchronous>, transform_indices = @transform_2, window_bounds = array<i64: 16, 1>}, {transform_indices = @transform_3, window_bounds = array<i64: 16, 256>}, {transform_indices = @transform_4, window_bounds = array<i64: 16, 256>}]} {
    %c0 = arith.constant 0 : index
    %c0_0 = arith.constant 0 : index
    %0 = vector.load %arg2[%c0, %c0_0] : memref<16x16xbf16, #tpu.memory_space<vmem>>, vector<16x16xbf16>
    %c0_1 = arith.constant 0 : index
    %c0_2 = arith.constant 0 : index
    %1 = vector.load %arg1[%c0_1, %c0_2] : memref<16x256xbf16, #tpu.memory_space<vmem>>, vector<16x256xbf16>
    %cst = arith.constant dense<0.000000e+00> : vector<16x256xf32>
    %2 = tpu.matmul %0, %1, %cst {dimension_numbers = #tpu.dot_dimension_numbers<[1], [0], [0], [1], [0, 0, 1, 1], [], []>} : vector<16x16xbf16>, vector<16x256xbf16>, vector<16x256xf32> -> vector<16x256xf32>
    %c0_3 = arith.constant 0 : index
    %c0_4 = arith.constant 0 : index
    %3 = vector.load %arg3[%c0_3, %c0_4] : memref<16x1xf32, #tpu.memory_space<vmem>>, vector<16x1xf32>
    %4 = vector.broadcast %3 : vector<16x1xf32> to vector<16x256xf32>
    %5 = arith.addf %2, %4 : vector<16x256xf32>
    %c0_5 = arith.constant 0 : index
    %c0_6 = arith.constant 0 : index
    %6 = vector.load %arg4[%c0_5, %c0_6] : memref<16x256xf32, #tpu.memory_space<vmem>>, vector<16x256xf32>
    %7 = arith.addf %5, %6 : vector<16x256xf32>
    %8 = arith.truncf %7 : vector<16x256xf32> to vector<16x256xbf16>
    %c0_7 = arith.constant 0 : index
    %c0_8 = arith.constant 0 : index
    %9 = vector.load %arg5[%c0_7, %c0_8] : memref<16x256xbf16, #tpu.memory_space<vmem>>, vector<16x256xbf16>
    tpu.vector_store %arg5[%c0_7, %c0_8], %8 {strides = array<i32>} : memref<16x256xbf16, #tpu.memory_space<vmem>>, vector<16x256xbf16>,
    return
  }
  func.func @transform_0(%arg0: i32) -> (i32, i32) {
    %c0_i32 = arith.constant 0 : i32
    %c0_i32_0 = arith.constant 0 : i32
    return %c0_i32, %arg0 : i32, i32
  }
  func.func @transform_1(%arg0: i32) -> (i32, i32) {
    %c0_i32 = arith.constant 0 : i32
    %c0_i32_0 = arith.constant 0 : i32
    %c0_i32_1 = arith.constant 0 : i32
    return %c0_i32, %c0_i32_0 : i32, i32
  }
  func.func @transform_2(%arg0: i32) -> (i32, i32) {
    %c0_i32 = arith.constant 0 : i32
    %c0_i32_0 = arith.constant 0 : i32
    %c0_i32_1 = arith.constant 0 : i32
    return %c0_i32, %c0_i32_0 : i32, i32
  }
  func.func @transform_3(%arg0: i32) -> (i32, i32) {
    %c0_i32 = arith.constant 0 : i32
    %c0_i32_0 = arith.constant 0 : i32
    return %c0_i32, %arg0 : i32, i32
  }
  func.func @transform_4(%arg0: i32) -> (i32, i32) {
    %c0_i32 = arith.constant 0 : i32
    %c0_i32_0 = arith.constant 0 : i32
    return %c0_i32, %arg0 : i32, i32
  }
}

module attributes {stable_mosaic.version = 11 : i64} {
  func.func @_mlp2_kernel(%arg0: i32, %arg1: memref<16x256xbf16, #tpu.memory_space<vmem>>, %arg2: memref<16x16xbf16, #tpu.memory_space<vmem>>, %arg3: memref<16x1xf32, #tpu.memory_space<vmem>>, %arg4: memref<4x16xbf16, #tpu.memory_space<vmem>>, %arg5: memref<4x1xf32, #tpu.memory_space<vmem>>, %arg6: memref<4x256xf32, #tpu.memory_space<vmem>>) attributes {dimension_semantics = [#tpu.dimension_semantics<parallel>], iteration_bounds = array<i64: 2>, scalar_prefetch = 0 : i64, scratch_operands = 0 : i64, tpu.core_type = #tpu.core_type<tc>, window_params = [{transform_indices = @transform_0, window_bounds = array<i64: 16, 256>}, {pipeline_mode = #tpu.pipeline_mode<synchronous>, transform_indices = @transform_1, window_bounds = array<i64: 16, 16>}, {pipeline_mode = #tpu.pipeline_mode<synchronous>, transform_indices = @transform_2, window_bounds = array<i64: 16, 1>}, {pipeline_mode = #tpu.pipeline_mode<synchronous>, transform_indices = @transform_3, window_bounds = array<i64: 4, 16>}, {pipeline_mode = #tpu.pipeline_mode<synchronous>, transform_indices = @transform_4, window_bounds = array<i64: 4, 1>}, {transform_indices = @transform_5, window_bounds = array<i64: 4, 256>}]} {
    %c0 = arith.constant 0 : index
    %c0_0 = arith.constant 0 : index
    %0 = vector.load %arg2[%c0, %c0_0] : memref<16x16xbf16, #tpu.memory_space<vmem>>, vector<16x16xbf16>
    %c0_1 = arith.constant 0 : index
    %c0_2 = arith.constant 0 : index
    %1 = vector.load %arg1[%c0_1, %c0_2] : memref<16x256xbf16, #tpu.memory_space<vmem>>, vector<16x256xbf16>
    %cst = arith.constant dense<0.000000e+00> : vector<16x256xf32>
    %2 = tpu.matmul %0, %1, %cst {dimension_numbers = #tpu.dot_dimension_numbers<[1], [0], [0], [1], [0, 0, 1, 1], [], []>} : vector<16x16xbf16>, vector<16x256xbf16>, vector<16x256xf32> -> vector<16x256xf32>
    %c0_3 = arith.constant 0 : index
    %c0_4 = arith.constant 0 : index
    %3 = vector.load %arg3[%c0_3, %c0_4] : memref<16x1xf32, #tpu.memory_space<vmem>>, vector<16x1xf32>
    %4 = vector.broadcast %3 : vector<16x1xf32> to vector<16x256xf32>
    %5 = arith.addf %2, %4 : vector<16x256xf32>
    %6 = arith.mulf %5, %5 : vector<16x256xf32>
    %7 = arith.mulf %5, %6 : vector<16x256xf32>
    %cst_5 = arith.constant 4.471500e-02 : f32
    %8 = vector.broadcast %cst_5 : f32 to vector<16x256xf32>
    %9 = arith.mulf %8, %7 : vector<16x256xf32>
    %10 = arith.addf %5, %9 : vector<16x256xf32>
    %cst_6 = arith.constant 0.797884583 : f32
    %11 = vector.broadcast %cst_6 : f32 to vector<16x256xf32>
    %12 = arith.mulf %11, %10 : vector<16x256xf32>
    %13 = math.tanh %12 : vector<16x256xf32>
    %cst_7 = arith.constant 1.000000e+00 : f32
    %14 = vector.broadcast %cst_7 : f32 to vector<16x256xf32>
    %15 = arith.addf %14, %13 : vector<16x256xf32>
    %cst_8 = arith.constant 5.000000e-01 : f32
    %16 = vector.broadcast %cst_8 : f32 to vector<16x256xf32>
    %17 = arith.mulf %16, %15 : vector<16x256xf32>
    %18 = arith.mulf %5, %17 : vector<16x256xf32>
    %c0_9 = arith.constant 0 : index
    %c0_10 = arith.constant 0 : index
    %19 = vector.load %arg4[%c0_9, %c0_10] : memref<4x16xbf16, #tpu.memory_space<vmem>>, vector<4x16xbf16>
    %20 = arith.truncf %18 : vector<16x256xf32> to vector<16x256xbf16>
    %cst_11 = arith.constant dense<0.000000e+00> : vector<4x256xf32>
    %21 = tpu.matmul %19, %20, %cst_11 {dimension_numbers = #tpu.dot_dimension_numbers<[1], [0], [0], [1], [0, 0, 1, 1], [], []>} : vector<4x16xbf16>, vector<16x256xbf16>, vector<4x256xf32> -> vector<4x256xf32>
    %c0_12 = arith.constant 0 : index
    %c0_13 = arith.constant 0 : index
    %22 = vector.load %arg5[%c0_12, %c0_13] : memref<4x1xf32, #tpu.memory_space<vmem>>, vector<4x1xf32>
    %23 = vector.broadcast %22 : vector<4x1xf32> to vector<4x256xf32>
    %24 = arith.addf %21, %23 : vector<4x256xf32>
    %c0_14 = arith.constant 0 : index
    %c0_15 = arith.constant 0 : index
    %25 = vector.load %arg6[%c0_14, %c0_15] : memref<4x256xf32, #tpu.memory_space<vmem>>, vector<4x256xf32>
    tpu.vector_store %arg6[%c0_14, %c0_15], %24 {strides = array<i32>} : memref<4x256xf32, #tpu.memory_space<vmem>>, vector<4x256xf32>,
    return
  }
  func.func @transform_0(%arg0: i32) -> (i32, i32) {
    %c0_i32 = arith.constant 0 : i32
    %c0_i32_0 = arith.constant 0 : i32
    return %c0_i32, %arg0 : i32, i32
  }
  func.func @transform_1(%arg0: i32) -> (i32, i32) {
    %c0_i32 = arith.constant 0 : i32
    %c0_i32_0 = arith.constant 0 : i32
    %c0_i32_1 = arith.constant 0 : i32
    return %c0_i32, %c0_i32_0 : i32, i32
  }
  func.func @transform_2(%arg0: i32) -> (i32, i32) {
    %c0_i32 = arith.constant 0 : i32
    %c0_i32_0 = arith.constant 0 : i32
    %c0_i32_1 = arith.constant 0 : i32
    return %c0_i32, %c0_i32_0 : i32, i32
  }
  func.func @transform_3(%arg0: i32) -> (i32, i32) {
    %c0_i32 = arith.constant 0 : i32
    %c0_i32_0 = arith.constant 0 : i32
    %c0_i32_1 = arith.constant 0 : i32
    return %c0_i32, %c0_i32_0 : i32, i32
  }
  func.func @transform_4(%arg0: i32) -> (i32, i32) {
    %c0_i32 = arith.constant 0 : i32
    %c0_i32_0 = arith.constant 0 : i32
    %c0_i32_1 = arith.constant 0 : i32
    return %c0_i32, %c0_i32_0 : i32, i32
  }
  func.func @transform_5(%arg0: i32) -> (i32, i32) {
    %c0_i32 = arith.constant 0 : i32
    %c0_i32_0 = arith.constant 0 : i32
    return %c0_i32, %arg0 : i32, i32
  }
}

</mosaic_0001>

<bundles_post_ra>
// kernel: forward.18
= control target key start
LH: loop header
LB: loop body
LE: loop exit
PB: predicated region body
PF: predicated region fallthrough
CT: control target
= control target key end

     0   :  { %s694_s18 = smov 0   ;;  %s696_s19 = smov 0   ;;  %s811_s0 = inlined_call_operand.vmem [shape: bf16[4,2048], index: 0, kind: input, shape index: {}]   ;;  %s812_s1 = inlined_call_operand.vmem [shape: bf16[16,4], index: 1, kind: input, shape index: {}]   ;;  %s813_s2 = inlined_call_operand.vmem [shape: f32[16,1], index: 2, kind: input, shape index: {}, may-alias: {2,4}]   ;;  %s814_s3 = inlined_call_operand.vmem [shape: bf16[16,16], index: 3, kind: input, shape index: {}]   ;;  %s815_s4 = inlined_call_operand.vmem [shape: f32[16,1], index: 4, kind: input, shape index: {}, may-alias: {2,4}]   ;;  %s816_s5 = inlined_call_operand.vmem [shape: bf16[16,2048], index: 5, kind: output, shape index: {}]  }
   0x1   :  { %s698_s20 = smov 0  }
   0x2 LB: > { %s707_s21 = sadd.s32 4294967295, %s661_s20   ;;  %s709_s22 = sadd.s32 1, %s661_s20   ;;  %s661_s20 = sphi %s698_s20, %s820_s20   ;;  %s657_s19 = sphi %s696_s19, %s819_s19   ;;  %s653_s18 = sphi %s694_s18, %s818_s18  }
   0x3   : > { %s129_s23 = ssub.s32 %s661_s20, %s709_s22  ;;  %s132_s24 = sadd.s32 1, %s657_s19 }
   0x4   : > { %p130_p0 = scmp.eq.s32.totalorder %s129_s23, 0  ;;  %p142_p1 = scmp.ne.s32.totalorder %s657_s19, %s653_s18 }
   0x5   : > { %p143_p2 = scmp.eq.s32.totalorder %s707_s21, 3  ;;  %p568_p3 = scmp.ge.s32.totalorder %s661_s20, 1 }
   0x6   : > { %s717_s25 = scalar_select %p130_p0, %s657_s19, %s132_s24  }
   0x7   : > { %p719_p4 = por %p143_p2, %p142_p1  ;;  %p188_p5 = scmp.lt.s32.totalorder %s661_s20, 5 }
   0x9   : > { %p189_p6 = pnand %p568_p3, %p188_p5 }
   0xa   : > { %s570_s27 = sshll.u32 (!%p189_p6), %s707_s21, 2  ;;  %s212_s23 = sand.u32 (!%p189_p6), 1, %s653_s18  }
   0xb   : > { %192 = sbr.rel (%p189_p6) target bundleno = 357 (0x165), region = 40  ;;  %p216_p7 = scmp.lt.s32.totalorder (!%p189_p6), %s570_s27, 15 }
   0xc   : > { %s569_s24 = sshll.u32 (!%p189_p6), %s212_s23, 5 }
  0x10   : > { %v226_v0 = vld [vmem:[%s813_s2] sm:$0xff]  ;;  %v663_v1 = vmov 0   ;;  %s822_s27 = smov (!%p216_p7, %s570_s27), 15  ;;  %v227_v3 = vld [vmem:[%s813_s2 + $0x8] sm:$0xff]  ;;  %vm253_vm0 = vcmask 1041408   ;;  %vm249_vm1 = vcmask 31744  }
  0x11   : > { %621 = vset.pattern.permute.xlu0 %v663_v1  ;;  %622 = vset.pattern.permute.xlu1 %v663_v1  ;;  %s571_s30 = sshll.u32 %s822_s27, 1  ;;  %v593_v9 = vld [vmem:[%s812_s1] sm:$0xff]  ;;  %vm413_vm2 = vcmask 130048   ;;  %s214_s27 = scalar_lea.vmem [#allocation2], %s569_s24 }
  0x12   : > { %230 = vperm.xlu0 %621, %v226_v0   ;;  %s219_s8 = scalar_lea.vmem %s811_s0, %s571_s30  ;;  %v396_v49 = vld [vmem:[%s815_s4] sm:$0xff]  ;;  %s595_s18 = sshll.u32 (%p719_p4), %s707_s21, 4 }
  0x13   : > { %v225_v2 = vld [vmem:[%s219_s8] sm:$0xff]  ;;  %400 = vperm.xlu1 %622, %v396_v49   ;;  %s490_s30 = scalar_lea.vmem (%p719_p4), %s816_s5, %s595_s18 }
  0x14   : > { %244 = vst [vmem:[#allocation1] ss:$4 sm:$0xff] %v225_v2 }
  0x1a   : > { %235 = vperm.xlu0 %621, %v227_v3   ;;  %v397_v3 = vld [vmem:[%s815_s4 + $0x8] sm:$0xff] }
  0x1b   : > { %v245_v4 = vld.sshfl [vmem:[#allocation1] sm:$0xff pattern:$0x73625140]  ;;  %v246_v5 = vld.sshfl [vmem:[#allocation1 + $0x8] sm:$0xff pattern:$0x73625140]  ;;  %405 = vperm.xlu1 %622, %v397_v3  }
  0x1c   : > { %v254_v6 = vsel %vm253_vm0, %v245_v4, 0  ;;  %v256_v7 = vsel %vm253_vm0, %v246_v5, 0  ;;  %v247_v8 = vld.sshfl [vmem:[#allocation1 + $0x10] sm:$0xff pattern:$0x73625140] }
  0x1d   : > { %269 = vmatpush.bf16.msra.mxu0 %v254_v6  ;;  %283 = vmatpush.bf16.msra.mxu1 %v256_v7  ;;  %v258_v10 = vsel %vm253_vm0, %v247_v8, 0  ;;  %v248_v11 = vld.sshfl [vmem:[#allocation1 + $0x18] sm:$0xff pattern:$0x73625140] }
  0x1e   : > { %297 = vmatpush.bf16.msra.mxu2 %v258_v10  ;;  %v260_v12 = vsel %vm253_vm0, %v248_v11, 0 }
  0x1f   : > { %311 = vmatpush.bf16.msra.mxu3 %v260_v12 }
  0x20   : > { %576 = vmatmul.msk.bf16.vlgmr.msra.gmra.mxu0 %vm249_vm1, %v593_v9  ;;  %577 = vmatmul.msk.bf16.vlgmr.msra.gmra.mxu1 %vm249_vm1, %v593_v9 }
  0x21   : > { %578 = vmatmul.msk.bf16.vlgmr.msra.gmra.mxu2 %vm249_vm1, %v593_v9 }
  0x22   : > { %579 = vmatmul.msk.bf16.vlgmr.msra.gmra.mxu3 %vm249_vm1, %v593_v9 }
  0x84   : > { %v231_v13 = vpop.permute.xlu0 %230 }
  0x8c   : > { %v236_v24 = vpop.permute.xlu0 %235 }
  0x9d   : > { %v271_v14 = vpop.f32.mrf.mxu0  ;;  %v285_v15 = vpop.f32.mrf.mxu1 }
  0x9e   : > { %v736_v16 = vadd.f32 %v271_v14, %v231_v13  ;;  %v738_v17 = vadd.f32 %v285_v15, %v231_v13 }
  0xa0   : > { %v318_v18 = vmul.f32 %v736_v16, %v736_v16  ;;  %v319_v19 = vmul.f32 %v738_v17, %v738_v17 }
  0xa2   : > { %v326_v20 = vmul.f32 %v318_v18, %v736_v16  ;;  %v327_v21 = vmul.f32 %v319_v19, %v738_v17 }
  0xa4   : > { %v334_v22 = vmul.f32 0.044715, %v326_v20  ;;  %v335_v23 = vmul.f32 0.044715, %v327_v21  ;;  %v299_v25 = vpop.f32.mrf.mxu2 }
  0xa5   : > { %v746_v26 = vadd.f32 %v299_v25, %v231_v13  ;;  %v313_v27 = vpop.f32.mrf.mxu3  ;;  %v273_v28 = vpop.f32.mrf.mxu0 }
  0xa6   : > { %v342_v29 = vadd.f32 %v334_v22, %v736_v16  ;;  %v343_v30 = vadd.f32 %v335_v23, %v738_v17  ;;  %v750_v31 = vadd.f32 %v313_v27, %v231_v13  ;;  %v752_v32 = vadd.f32 %v273_v28, %v236_v24  ;;  %v287_v33 = vpop.f32.mrf.mxu1 }
  0xa7   : > { %v320_v34 = vmul.f32 %v746_v26, %v746_v26  ;;  %v756_v35 = vadd.f32 %v287_v33, %v236_v24 }
  0xa8   : > { %v321_v36 = vmul.f32 %v750_v31, %v750_v31  ;;  %v322_v37 = vmul.f32 %v752_v32, %v752_v32  ;;  %v350_v38 = vmul.f32 0.7978846, %v342_v29  ;;  %v351_v41 = vmul.f32 0.7978846, %v343_v30 }
  0xa9   : > { %v328_v39 = vmul.f32 %v320_v34, %v746_v26  ;;  %v323_v40 = vmul.f32 %v756_v35, %v756_v35 }
  0xaa   : > { %v329_v42 = vmul.f32 %v321_v36, %v750_v31  ;;  %v330_v43 = vmul.f32 %v322_v37, %v752_v32  ;;  %623 = vtanh.f32 %v350_v38 }
  0xab   : > { %v336_v44 = vmul.f32 0.044715, %v328_v39  ;;  %v331_v45 = vmul.f32 %v323_v40, %v756_v35  ;;  %625 = vtanh.f32 %v351_v41  ;;  %v594_v41 = vld [vmem:[%s814_s3] sm:$0xff] }
  0xac   : > { %v337_v46 = vmul.f32 0.044715, %v329_v42  ;;  %v338_v47 = vmul.f32 0.044715, %v330_v43  ;;  %v301_v48 = vpop.f32.mrf.mxu2 }
  0xad   : > { %v344_v50 = vadd.f32 %v336_v44, %v746_v26  ;;  %v339_v51 = vmul.f32 0.044715, %v331_v45  ;;  %v772_v52 = vadd.f32 %v301_v48, %v236_v24  ;;  %v315_v53 = vpop.f32.mrf.mxu3  ;;  %v401_v48 = vpop.permute.xlu1 %400 }
  0xae   : > { %v345_v54 = vadd.f32 %v337_v46, %v750_v31  ;;  %v346_v55 = vadd.f32 %v338_v47, %v752_v32  ;;  %v316_v56 = vadd.f32 %v315_v53, %v236_v24 }
  0xaf   : > { %v347_v57 = vadd.f32 %v339_v51, %v756_v35  ;;  %v324_v58 = vmul.f32 %v772_v52, %v772_v52  ;;  %v352_v59 = vmul.f32 0.7978846, %v344_v50 }
  0xb0   : > { %v325_v60 = vmul.f32 %v316_v56, %v316_v56  ;;  %v354_v61 = vmul.f32 0.7978846, %v346_v55  ;;  %v353_v62 = vmul.f32 0.7978846, %v345_v54  ;;  %v624_v1 = vpop.eup %623 }
  0xb1   : > { %v332_v63 = vmul.f32 %v324_v58, %v772_v52  ;;  %v355_v0 = vmul.f32 0.7978846, %v347_v57  ;;  %627 = vtanh.f32 %v352_v59  ;;  %v626_v4 = vpop.eup %625  ;;  %v366_v8 = vadd.f32 1.0, %v624_v1 }
  0xb2   : > { %v333_v2 = vmul.f32 %v325_v60, %v316_v56  ;;  %629 = vtanh.f32 %v354_v61  ;;  %v367_v10 = vadd.f32 1.0, %v626_v4 }
  0xb3   : > { %v340_v5 = vmul.f32 0.044715, %v332_v63  ;;  %631 = vtanh.f32 %v355_v0  ;;  %v374_v19 = vmul.f32 0.5, %v366_v8 }
  0xb4   : > { %v341_v6 = vmul.f32 0.044715, %v333_v2  ;;  %633 = vtanh.f32 %v353_v62  ;;  %v375_v22 = vmul.f32 0.5, %v367_v10 }
  0xb5   : > { %v348_v7 = vadd.f32 %v340_v5, %v772_v52  ;;  %v382_v27 = vmul.f32 %v374_v19, %v736_v16 }
  0xb6   : > { %v349_v9 = vadd.f32 %v341_v6, %v316_v56  ;;  %v383_v30 = vmul.f32 %v375_v22, %v738_v17 }
  0xb7   : > { %v628_v11 = vpop.eup %627  ;;  %v356_v12 = vmul.f32 0.7978846, %v348_v7 }
  0xb8   : > { %v630_v13 = vpop.eup %629  ;;  %v357_v14 = vmul.f32 0.7978846, %v349_v9  ;;  %v368_v25 = vadd.f32 1.0, %v628_v11 }
  0xb9   : > { %v632_v15 = vpop.eup %631  ;;  %v370_v18 = vadd.f32 1.0, %v630_v13  ;;  %635 = vtanh.f32 %v356_v12 }
  0xba   : > { %v634_v20 = vpop.eup %633  ;;  %v371_v21 = vadd.f32 1.0, %v632_v15  ;;  %637 = vtanh.f32 %v357_v14  ;;  %v376_v40 = vmul.f32 0.5, %v368_v25 }
  0xbb   : > { %v378_v23 = vmul.f32 0.5, %v370_v18  ;;  %v369_v29 = vadd.f32 1.0, %v634_v20 }
  0xbc   : > { %v379_v24 = vmul.f32 0.5, %v371_v21 }
  0xbd   : > { %v386_v28 = vmul.f32 %v378_v23, %v752_v32  ;;  %v377_v16 = vmul.f32 0.5, %v369_v29 }
  0xbe   : > { %v387_v33 = vmul.f32 %v379_v24, %v756_v35  ;;  %v384_v35 = vmul.f32 %v376_v40, %v746_v26 }
  0xbf   : > { %v636_v34 = vpop.eup %635  ;;  %v392_v36 = vpack.c.bf16 %v386_v28, %v382_v27  ;;  %v385_v44 = vmul.f32 %v377_v16, %v750_v31 }
  0xc0   : > { %v638_v37 = vpop.eup %637  ;;  %v393_v38 = vpack.c.bf16 %v387_v33, %v383_v30  ;;  %v372_v39 = vadd.f32 1.0, %v636_v34 }
  0xc1   : > { %424 = vmatpush.bf16.msrb.mxu0 %v392_v36  ;;  %v373_v42 = vadd.f32 1.0, %v638_v37 }
  0xc2   : > { %438 = vmatpush.bf16.msrb.mxu1 %v393_v38  ;;  %v380_v32 = vmul.f32 0.5, %v372_v39 }
  0xc3   : > { %v381_v17 = vmul.f32 0.5, %v373_v42 }
  0xc4   : > { %v388_v43 = vmul.f32 %v380_v32, %v772_v52  ;;  %584 = vmatmul.msk.bf16.vlgmr.msrb.gmra.mxu0 %vm413_vm2, %v594_v41  ;;  %v406_v52 = vpop.permute.xlu1 %405 }
  0xc5   : > { %v389_v45 = vmul.f32 %v381_v17, %v316_v56  ;;  %585 = vmatmul.msk.bf16.vlgmr.msrb.gmra.mxu1 %vm413_vm2, %v594_v41 }
  0xc6   : > { %v394_v46 = vpack.c.bf16 %v388_v43, %v384_v35 }
  0xc7   : > { %v395_v47 = vpack.c.bf16 %v389_v45, %v385_v44 }
  0xc8   : > { %452 = vmatpush.bf16.msrb.mxu2 %v394_v46 }
  0xc9   : > { %466 = vmatpush.bf16.msrb.mxu3 %v395_v47 }
  0xcb   : > { %586 = vmatmul.msk.bf16.vlgmr.msrb.gmra.mxu2 %vm413_vm2, %v594_v41 }
  0xcc   : > { %587 = vmatmul.msk.bf16.vlgmr.msrb.gmra.mxu3 %vm413_vm2, %v594_v41 }
 0x141   : > { %v426_v49 = vpop.f32.mrf.mxu0 }
 0x142   : > { %v427_v50 = vadd.f32 %v426_v49, %v401_v48  ;;  %v440_v51 = vpop.f32.mrf.mxu1 }
 0x143   : > { %v441_v26 = vadd.f32 %v440_v51, %v401_v48 }
 0x145   : > { %v473_v53 = vpack.c.bf16 %v441_v26, %v427_v50 }
 0x147   : > { %477 = vst [vmem:[%s214_s27] sm:$0xff] %v473_v53 }
 0x149   : > { %v428_v31 = vpop.f32.mrf.mxu0 }
 0x14a   : > { %v429_v54 = vadd.f32 %v428_v31, %v406_v52  ;;  %v442_v55 = vpop.f32.mrf.mxu1 }
 0x14b   : > { %v443_v56 = vadd.f32 %v442_v55, %v406_v52 }
 0x14d   : > { %v475_v57 = vpack.c.bf16 %v443_v56, %v429_v54 }
 0x14e   : > { %v454_v58 = vpop.f32.mrf.mxu2  ;;  %v503_v4 = vld [vmem:[%s214_s27] sm:$0xff] (%p719_p4) }
 0x14f   : > { %v455_v59 = vadd.f32 %v454_v58, %v401_v48  ;;  %v468_v60 = vpop.f32.mrf.mxu3  ;;  %479 = vst [vmem:[%s214_s27 + $0x10] sm:$0xff] %v475_v57 }
 0x150   : > { %v469_v61 = vadd.f32 %v468_v60, %v401_v48  ;;  %504 = vst [vmem:[%s490_s30] sm:$0xff] (%p719_p4), %v503_v4 }
 0x152   : > { %v474_v62 = vpack.c.bf16 %v469_v61, %v455_v59 }
 0x154   : > { %478 = vst [vmem:[%s214_s27 + $0x8] sm:$0xff] %v474_v62 }
 0x156   : > { %v456_v63 = vpop.f32.mrf.mxu2  ;;  %v507_v6 = vld [vmem:[%s214_s27 + $0x10] sm:$0xff] (%p719_p4) }
 0x157   : > { %v457_v0 = vadd.f32 %v456_v63, %v406_v52  ;;  %v470_v1 = vpop.f32.mrf.mxu3  ;;  %508 = vst [vmem:[%s490_s30 + $0x40] sm:$0xff] (%p719_p4), %v507_v6 }
 0x158   : > { %v471_v2 = vadd.f32 %v470_v1, %v406_v52  ;;  %487 = sbr.rel (!%p719_p4) target bundleno = 357 (0x165), region = 44 }
 0x15a   : > { %v476_v3 = vpack.c.bf16 %v471_v2, %v457_v0 }
 0x15b   : > { %v505_v5 = vld [vmem:[%s214_s27 + $0x8] sm:$0xff] (%p719_p4) }
 0x15c   : > { %480 = vst [vmem:[%s214_s27 + $0x18] sm:$0xff] %v476_v3 }
 0x15d   : > { %506 = vst [vmem:[%s490_s30 + $0x8] sm:$0xff] %v505_v5 }
 0x163   : > { %v509_v7 = vld [vmem:[%s214_s27 + $0x18] sm:$0xff] }
 0x164   : > { %510 = vst [vmem:[%s490_s30 + $0x48] sm:$0xff] %v509_v7 }
 0x165 PF: > { %p12_p8 = scmp.ge.s32.totalorder %s709_s22, 6   ;;  %s818_s18 = smov %s657_s19 }
 0x166   : > { %s819_s19 = smov %s717_s25  ;;  %s820_s20 = smov %s709_s22 }
 0x167   :  { %14 = sbr.rel (!%p12_p8) target bundleno = 2 (0x2), region = 93 }

// kernel: forward.19
= control target key start
LH: loop header
LB: loop body
LE: loop exit
PB: predicated region body
PF: predicated region fallthrough
CT: control target
= control target key end

     0   :  { %s1435_s18 = smov 0   ;;  %s1702_s0 = inlined_call_operand.vmem [shape: bf16[40,8,16], index: 0, kind: input, shape index: {}]   ;;  %s1703_s1 = inlined_call_operand.vmem [shape: bf16[40,8,16], index: 1, kind: input, shape index: {}]   ;;  %s1704_s2 = inlined_call_operand.vmem [shape: bf16[40,16,16], index: 2, kind: input, shape index: {}]   ;;  %s1705_s3 = inlined_call_operand.vmem [shape: bf16[40,16,16], index: 3, kind: input, shape index: {}]   ;;  %s1706_s4 = inlined_call_operand.vmem [shape: f32[40,8,16], index: 4, kind: output, shape index: {0}]   ;;  %s1707_s5 = inlined_call_operand.vmem [shape: f32[40,8,16], index: 5, kind: output, shape index: {1}]  }
   0x1 LB: > { %s1232_s19 = sadd.s32 4294967295, %s1403_s18   ;;  %p1236_p0 = scmp.ge.s32.totalorder %s1403_s18, 1  ;;  %s1403_s18 = sphi %s1435_s18, %s16_s18  }
   0x2   : > { %p226_p1 = scmp.lt.s32.totalorder %s1403_s18, 5 }
   0x4   : > { %p227_p2 = pnand %p1236_p0, %p226_p1 }
   0x5   : > { %s276_s20 = smul.u32 (!%p227_p2), 10, %s1232_s19 }
   0x6   : > { %230 = sbr.rel (%p227_p2) target bundleno = 303 (0x12f), region = 36 }
   0x7   : > { %p277_p3 = scmp.lt.s32.totalorder (!%p227_p2), %s276_s20, 39 }
   0xb   : > { %s1709_s20 = smov (!%p277_p3, %s276_s20), 39  ;;  %vm381_vm0 = vcmask 130048  }
   0xc   : > { %s1446_s21 = sshll.u32 %s1709_s20, 3  ;;  %s1237_s22 = sshll.u32 %s1709_s20, 2 }
   0xd   : > { %s293_s25 = scalar_lea.vmem %s1704_s2, %s1446_s21  ;;  %s1458_s28 = scalar_lea.vmem %s1702_s0, %s1237_s22 }
   0xe   : > { %v1460_v0 = vld [vmem:[%s293_s25] sm:$0xff]  ;;  %v1462_v1 = vld [vmem:[%s293_s25 + $0x8] sm:$0xff]  ;;  %v1464_v2 = vld [vmem:[%s293_s25 + $0x10] sm:$0xff]  ;;  %s1485_s6 = scalar_lea.vmem %s1705_s3, %s1446_s21  ;;  %s1565_s9 = scalar_lea.vmem %s1703_s1, %s1237_s22 }
   0xf   : > { %v1466_v3 = vld [vmem:[%s293_s25 + $0x18] sm:$0xff]  ;;  %v1469_v4 = vld [vmem:[%s1458_s28] sm:$0xf]  ;;  %392 = vmatpush.bf16.msra.mxu0 %v1460_v0  ;;  %414 = vmatpush.bf16.msra.mxu1 %v1462_v1  ;;  %v1474_v5 = vld [vmem:[%s1458_s28 + $0x4] sm:$0xf]  ;;  %s1651_s12 = scalar_lea.vmem %s1706_s4, %s1446_s21  ;;  %s1677_s15 = scalar_lea.vmem %s1707_s5, %s1446_s21 }
  0x10   : > { %v1477_v6 = vld [vmem:[%s1458_s28 + $0x8] sm:$0xf]  ;;  %v1479_v7 = vld [vmem:[%s293_s25 + $0x30] sm:$0xff]  ;;  %436 = vmatpush.bf16.msra.mxu2 %v1464_v2  ;;  %458 = vmatpush.bf16.msra.mxu3 %v1466_v3  ;;  %v1490_v8 = vld [vmem:[%s1458_s28 + $0xc] sm:$0xf] }
  0x11   : > { %v1492_v9 = vld [vmem:[%s293_s25 + $0x38] sm:$0xff]  ;;  %v1494_v10 = vld [vmem:[%s293_s25 + $0x20] sm:$0xff]  ;;  %v1497_v11 = vld [vmem:[%s293_s25 + $0x28] sm:$0xff] }
  0x12   : > { %1249 = vmatmul.msk.bf16.vlgmr.msra.gmra.mxu0 %vm381_vm0, %v1469_v4  ;;  %1254 = vmatmul.msk.bf16.vlgmr.msra.gmra.mxu1 %vm381_vm0, %v1474_v5  ;;  %v1504_v12 = vld [vmem:[%s1485_s6] sm:$0xff]  ;;  %v1507_v13 = vld [vmem:[%s1485_s6 + $0x8] sm:$0xff]  ;;  %v1525_v16 = vld [vmem:[%s1458_s28 + $0x10] sm:$0xf] }
  0x13   : > { %1259 = vmatmul.msk.bf16.vlgmr.msra.gmra.mxu2 %vm381_vm0, %v1477_v6  ;;  %1264 = vmatmul.msk.bf16.vlgmr.msra.gmra.mxu3 %vm381_vm0, %v1490_v8  ;;  %v1513_v14 = vld [vmem:[%s293_s25 + $0x40] sm:$0xff]  ;;  %v1515_v15 = vld [vmem:[%s293_s25 + $0x48] sm:$0xff]  ;;  %v1528_v17 = vld [vmem:[%s1458_s28 + $0x14] sm:$0xf] }
  0x14   : > { %524 = vmatpush.bf16.msrb.mxu2 %v1479_v7  ;;  %546 = vmatpush.bf16.msrb.mxu3 %v1492_v9  ;;  %v1531_v18 = vld [vmem:[%s1458_s28 + $0x18] sm:$0xf]  ;;  %v1534_v19 = vld [vmem:[%s1458_s28 + $0x1c] sm:$0xf]  ;;  %v1537_v20 = vld [vmem:[%s1485_s6 + $0x20] sm:$0xff] }
  0x15   : > { %480 = vmatpush.bf16.msrb.mxu0 %v1494_v10  ;;  %502 = vmatpush.bf16.msrb.mxu1 %v1497_v11  ;;  %v1540_v21 = vld [vmem:[%s1485_s6 + $0x28] sm:$0xff]  ;;  %v1543_v22 = vld [vmem:[%s1485_s6 + $0x10] sm:$0xff]  ;;  %v1546_v23 = vld [vmem:[%s1485_s6 + $0x18] sm:$0xff] }
  0x16   : > { %v1568_v24 = vld [vmem:[%s1458_s28 + $0x20] sm:$0xf]  ;;  %v1571_v25 = vld [vmem:[%s1458_s28 + $0x24] sm:$0xf]  ;;  %v1388_v29 = vld [vmem:[%s1485_s6 + $0x48] sm:$0xff] }
  0x17   : > { %v325_v26 = vld [vmem:[%s1565_s9] sm:$0xf]  ;;  %v326_v27 = vld [vmem:[%s1565_s9 + $0x4] sm:$0xf]  ;;  %v1385_v30 = vld [vmem:[%s1485_s6 + $0x30] sm:$0xff] }
  0x18   : > { %612 = vmatpush.bf16.msra.mxu2 %v1504_v12  ;;  %634 = vmatpush.bf16.msra.mxu3 %v1507_v13  ;;  %v1387_v28 = vld [vmem:[%s1485_s6 + $0x40] sm:$0xff]  ;;  %v1386_v31 = vld [vmem:[%s1485_s6 + $0x38] sm:$0xff]  ;;  %v327_v32 = vld [vmem:[%s1565_s9 + $0x8] sm:$0xf] }
  0x19   : > { %568 = vmatpush.bf16.msra.mxu0 %v1513_v14  ;;  %590 = vmatpush.bf16.msra.mxu1 %v1515_v15  ;;  %v328_v33 = vld [vmem:[%s1565_s9 + $0xc] sm:$0xf]  ;;  %v329_v34 = vld [vmem:[%s1565_s9 + $0x10] sm:$0xf]  ;;  %v330_v35 = vld [vmem:[%s1565_s9 + $0x14] sm:$0xf] }
  0x1a   : > { %v331_v36 = vld [vmem:[%s1565_s9 + $0x18] sm:$0xf]  ;;  %v332_v37 = vld [vmem:[%s1565_s9 + $0x1c] sm:$0xf]  ;;  %v333_v38 = vld [vmem:[%s1565_s9 + $0x20] sm:$0xf] }
  0x1b   : > { %v334_v39 = vld [vmem:[%s1565_s9 + $0x24] sm:$0xf] }
  0x22   : > { %1269 = vmatmul.msk.bf16.vlgmr.msrb.gmra.mxu0 %vm381_vm0, %v1525_v16  ;;  %1274 = vmatmul.msk.bf16.vlgmr.msrb.gmra.mxu1 %vm381_vm0, %v1528_v17 }
  0x23   : > { %1279 = vmatmul.msk.bf16.vlgmr.msrb.gmra.mxu2 %vm381_vm0, %v1531_v18  ;;  %1284 = vmatmul.msk.bf16.vlgmr.msrb.gmra.mxu3 %vm381_vm0, %v1534_v19 }
  0x24   : > { %700 = vmatpush.bf16.msrb.mxu2 %v1537_v20  ;;  %722 = vmatpush.bf16.msrb.mxu3 %v1540_v21 }
  0x25   : > { %656 = vmatpush.bf16.msrb.mxu0 %v1543_v22  ;;  %678 = vmatpush.bf16.msrb.mxu1 %v1546_v23 }
  0x32   : > { %1289 = vmatmul.msk.bf16.vlgmr.msra.gmra.mxu0 %vm381_vm0, %v1568_v24  ;;  %1294 = vmatmul.msk.bf16.vlgmr.msra.gmra.mxu1 %vm381_vm0, %v1571_v25 }
  0x33   : > { %1299 = vmatmul.msk.bf16.vlgmr.msra.gmra.mxu2 %vm381_vm0, %v325_v26  ;;  %1304 = vmatmul.msk.bf16.vlgmr.msra.gmra.mxu3 %vm381_vm0, %v326_v27 }
  0x34   : > { %788 = vmatpush.bf16.msra.mxu2 %v1387_v28  ;;  %810 = vmatpush.bf16.msra.mxu3 %v1388_v29 }
  0x35   : > { %744 = vmatpush.bf16.msra.mxu0 %v1385_v30  ;;  %766 = vmatpush.bf16.msra.mxu1 %v1386_v31 }
  0x42   : > { %1309 = vmatmul.msk.bf16.vlgmr.msrb.gmra.mxu0 %vm381_vm0, %v327_v32  ;;  %1314 = vmatmul.msk.bf16.vlgmr.msrb.gmra.mxu1 %vm381_vm0, %v328_v33 }
  0x43   : > { %1319 = vmatmul.msk.bf16.vlgmr.msrb.gmra.mxu2 %vm381_vm0, %v329_v34  ;;  %1324 = vmatmul.msk.bf16.vlgmr.msrb.gmra.mxu3 %vm381_vm0, %v330_v35 }
  0x44   : > { %869 = vmatpush.bf16.msrb.mxu2 %v1464_v2  ;;  %882 = vmatpush.bf16.msrb.mxu3 %v1466_v3 }
  0x45   : > { %843 = vmatpush.bf16.msrb.mxu0 %v1460_v0  ;;  %856 = vmatpush.bf16.msrb.mxu1 %v1462_v1 }
  0x52   : > { %1329 = vmatmul.msk.bf16.vlgmr.msra.gmra.mxu0 %vm381_vm0, %v331_v36  ;;  %1334 = vmatmul.msk.bf16.vlgmr.msra.gmra.mxu1 %vm381_vm0, %v332_v37 }
  0x53   : > { %1339 = vmatmul.msk.bf16.vlgmr.msra.gmra.mxu2 %vm381_vm0, %v333_v38  ;;  %1344 = vmatmul.msk.bf16.vlgmr.msra.gmra.mxu3 %vm381_vm0, %v334_v39 }
  0x54   : > { %921 = vmatpush.bf16.msra.mxu2 %v1479_v7  ;;  %934 = vmatpush.bf16.msra.mxu3 %v1492_v9 }
  0x55   : > { %895 = vmatpush.bf16.msra.mxu0 %v1494_v10  ;;  %908 = vmatpush.bf16.msra.mxu1 %v1497_v11 }
  0x62   : > { %1345 = vmatmul.msk.bf16.vlgmr.msrb.gmra.mxu0 %vm381_vm0, %v325_v26  ;;  %1346 = vmatmul.msk.bf16.vlgmr.msrb.gmra.mxu1 %vm381_vm0, %v326_v27 }
  0x63   : > { %1347 = vmatmul.msk.bf16.vlgmr.msrb.gmra.mxu2 %vm381_vm0, %v327_v32  ;;  %1348 = vmatmul.msk.bf16.vlgmr.msrb.gmra.mxu3 %vm381_vm0, %v328_v33 }
  0x64   : > { %973 = vmatpush.bf16.msrb.mxu2 %v1504_v12  ;;  %986 = vmatpush.bf16.msrb.mxu3 %v1507_v13 }
  0x65   : > { %947 = vmatpush.bf16.msrb.mxu0 %v1513_v14  ;;  %960 = vmatpush.bf16.msrb.mxu1 %v1515_v15 }
  0x72   : > { %1349 = vmatmul.msk.bf16.vlgmr.msra.gmra.mxu0 %vm381_vm0, %v329_v34  ;;  %1350 = vmatmul.msk.bf16.vlgmr.msra.gmra.mxu1 %vm381_vm0, %v330_v35 }
  0x73   : > { %1351 = vmatmul.msk.bf16.vlgmr.msra.gmra.mxu2 %vm381_vm0, %v331_v36  ;;  %1352 = vmatmul.msk.bf16.vlgmr.msra.gmra.mxu3 %vm381_vm0, %v332_v37 }
  0x74   : > { %1025 = vmatpush.bf16.msra.mxu2 %v1537_v20  ;;  %1038 = vmatpush.bf16.msra.mxu3 %v1540_v21 }
  0x75   : > { %999 = vmatpush.bf16.msra.mxu0 %v1543_v22  ;;  %1012 = vmatpush.bf16.msra.mxu1 %v1546_v23 }
  0x82   : > { %1353 = vmatmul.msk.bf16.vlgmr.msrb.gmra.mxu0 %vm381_vm0, %v333_v38  ;;  %1354 = vmatmul.msk.bf16.vlgmr.msrb.gmra.mxu1 %vm381_vm0, %v334_v39 }
  0x83   : > { %1355 = vmatmul.msk.bf16.vlgmr.msrb.gmra.mxu2 %vm381_vm0, %v1469_v4  ;;  %1356 = vmatmul.msk.bf16.vlgmr.msrb.gmra.mxu3 %vm381_vm0, %v1474_v5 }
  0x84   : > { %1077 = vmatpush.bf16.msrb.mxu2 %v1387_v28  ;;  %1090 = vmatpush.bf16.msrb.mxu3 %v1388_v29 }
  0x85   : > { %1051 = vmatpush.bf16.msrb.mxu0 %v1385_v30  ;;  %1064 = vmatpush.bf16.msrb.mxu1 %v1386_v31 }
  0x8f   : > { %v394_v40 = vpop.f32.mrf.mxu0  ;;  %v416_v41 = vpop.f32.mrf.mxu1 }
  0x92   : > { %1357 = vmatmul.msk.bf16.vlgmr.msra.gmra.mxu0 %vm381_vm0, %v1477_v6  ;;  %1358 = vmatmul.msk.bf16.vlgmr.msra.gmra.mxu1 %vm381_vm0, %v1490_v8 }
  0x93   : > { %1359 = vmatmul.msk.bf16.vlgmr.msra.gmra.mxu2 %vm381_vm0, %v1525_v16  ;;  %1360 = vmatmul.msk.bf16.vlgmr.msra.gmra.mxu3 %vm381_vm0, %v1528_v17 }
  0x96   : > { %v438_v42 = vpop.f32.mrf.mxu2  ;;  %v460_v43 = vpop.f32.mrf.mxu3 }
  0x97   : > { %v396_v44 = vpop.f32.mrf.mxu0  ;;  %v418_v45 = vpop.f32.mrf.mxu1 }
  0x9e   : > { %v440_v46 = vpop.f32.mrf.mxu2  ;;  %v462_v47 = vpop.f32.mrf.mxu3 }
  0x9f   : > { %v482_v48 = vpop.f32.mrf.mxu0  ;;  %v504_v49 = vpop.f32.mrf.mxu1 }
  0xa2   : > { %1361 = vmatmul.msk.bf16.vlgmr.msrb.gmra.mxu0 %vm381_vm0, %v1531_v18  ;;  %1362 = vmatmul.msk.bf16.vlgmr.msrb.gmra.mxu1 %vm381_vm0, %v1534_v19 }
  0xa3   : > { %1363 = vmatmul.msk.bf16.vlgmr.msrb.gmra.mxu2 %vm381_vm0, %v1568_v24  ;;  %1364 = vmatmul.msk.bf16.vlgmr.msrb.gmra.mxu3 %vm381_vm0, %v1571_v25 }
  0xa6   : > { %v526_v50 = vpop.f32.mrf.mxu2  ;;  %v548_v51 = vpop.f32.mrf.mxu3 }
  0xa7   : > { %v484_v52 = vpop.f32.mrf.mxu0  ;;  %v506_v53 = vpop.f32.mrf.mxu1 }
  0xae   : > { %v528_v54 = vpop.f32.mrf.mxu2  ;;  %v550_v55 = vpop.f32.mrf.mxu3 }
  0xaf   : > { %v570_v56 = vpop.f32.mrf.mxu0  ;;  %v592_v57 = vpop.f32.mrf.mxu1 }
  0xb6   : > { %v614_v58 = vpop.f32.mrf.mxu2  ;;  %v636_v59 = vpop.f32.mrf.mxu3 }
  0xb7   : > { %v816_v60 = vsub.f32 %v394_v40, %v614_v58  ;;  %v817_v61 = vsub.f32 %v416_v41, %v636_v59  ;;  %v572_v62 = vpop.f32.mrf.mxu0  ;;  %v594_v63 = vpop.f32.mrf.mxu1 }
  0xb9   : > { %826 = vst.msk [vmem:[%s1651_s12] sm:$0xff] %vm381_vm0, %v816_v60 }
  0xba   : > { %827 = vst.msk [vmem:[%s1651_s12 + $0x8] sm:$0xff] %vm381_vm0, %v817_v61 }
  0xbe   : > { %v616_v0 = vpop.f32.mrf.mxu2  ;;  %v638_v1 = vpop.f32.mrf.mxu3 }
  0xbf   : > { %v658_v2 = vpop.f32.mrf.mxu0  ;;  %v680_v3 = vpop.f32.mrf.mxu1 }
  0xc0   : > { %v818_v4 = vsub.f32 %v438_v42, %v658_v2  ;;  %v819_v5 = vsub.f32 %v460_v43, %v680_v3 }
  0xc2   : > { %828 = vst.msk [vmem:[%s1651_s12 + $0x10] sm:$0xff] %vm381_vm0, %v818_v4 }
  0xc3   : > { %829 = vst.msk [vmem:[%s1651_s12 + $0x18] sm:$0xff] %vm381_vm0, %v819_v5 }
  0xc6   : > { %v702_v6 = vpop.f32.mrf.mxu2  ;;  %v724_v7 = vpop.f32.mrf.mxu3 }
  0xc7   : > { %v820_v8 = vsub.f32 %v482_v48, %v702_v6  ;;  %v821_v9 = vsub.f32 %v504_v49, %v724_v7  ;;  %v660_v10 = vpop.f32.mrf.mxu0  ;;  %v682_v11 = vpop.f32.mrf.mxu1 }
  0xc9   : > { %830 = vst.msk [vmem:[%s1651_s12 + $0x20] sm:$0xff] %vm381_vm0, %v820_v8 }
  0xca   : > { %831 = vst.msk [vmem:[%s1651_s12 + $0x28] sm:$0xff] %vm381_vm0, %v821_v9 }
  0xce   : > { %v704_v12 = vpop.f32.mrf.mxu2  ;;  %v726_v13 = vpop.f32.mrf.mxu3 }
  0xcf   : > { %v746_v14 = vpop.f32.mrf.mxu0  ;;  %v768_v15 = vpop.f32.mrf.mxu1 }
  0xd0   : > { %v822_v16 = vsub.f32 %v526_v50, %v746_v14  ;;  %v823_v17 = vsub.f32 %v548_v51, %v768_v15 }
  0xd2   : > { %832 = vst.msk [vmem:[%s1651_s12 + $0x30] sm:$0xff] %vm381_vm0, %v822_v16 }
  0xd3   : > { %833 = vst.msk [vmem:[%s1651_s12 + $0x38] sm:$0xff] %vm381_vm0, %v823_v17 }
  0xd6   : > { %v790_v18 = vpop.f32.mrf.mxu2  ;;  %v812_v19 = vpop.f32.mrf.mxu3 }
  0xd7   : > { %v824_v20 = vsub.f32 %v570_v56, %v790_v18  ;;  %v825_v21 = vsub.f32 %v592_v57, %v812_v19  ;;  %v748_v22 = vpop.f32.mrf.mxu0  ;;  %v770_v23 = vpop.f32.mrf.mxu1 }
  0xd9   : > { %834 = vst.msk [vmem:[%s1651_s12 + $0x40] sm:$0xff] %vm381_vm0, %v824_v20 }
  0xda   : > { %835 = vst.msk [vmem:[%s1651_s12 + $0x48] sm:$0xff] %vm381_vm0, %v825_v21 }
  0xde   : > { %v792_v24 = vpop.f32.mrf.mxu2  ;;  %v814_v25 = vpop.f32.mrf.mxu3 }
  0xdf   : > { %v845_v26 = vpop.f32.mrf.mxu0  ;;  %v858_v27 = vpop.f32.mrf.mxu1 }
  0xe6   : > { %v871_v28 = vpop.f32.mrf.mxu2  ;;  %v884_v29 = vpop.f32.mrf.mxu3 }
  0xe7   : > { %v847_v30 = vpop.f32.mrf.mxu0  ;;  %v860_v31 = vpop.f32.mrf.mxu1 }
  0xee   : > { %v873_v32 = vpop.f32.mrf.mxu2  ;;  %v886_v33 = vpop.f32.mrf.mxu3 }
  0xef   : > { %v897_v34 = vpop.f32.mrf.mxu0  ;;  %v910_v35 = vpop.f32.mrf.mxu1 }
  0xf6   : > { %v923_v36 = vpop.f32.mrf.mxu2  ;;  %v936_v37 = vpop.f32.mrf.mxu3 }
  0xf7   : > { %v899_v38 = vpop.f32.mrf.mxu0  ;;  %v912_v39 = vpop.f32.mrf.mxu1 }
  0xfe   : > { %v925_v40 = vpop.f32.mrf.mxu2  ;;  %v938_v41 = vpop.f32.mrf.mxu3 }
  0xff   : > { %v949_v42 = vpop.f32.mrf.mxu0  ;;  %v962_v43 = vpop.f32.mrf.mxu1 }
 0x106   : > { %v975_v44 = vpop.f32.mrf.mxu2  ;;  %v988_v45 = vpop.f32.mrf.mxu3 }
 0x107   : > { %v976_v46 = vadd.f32 %v975_v44, %v845_v26  ;;  %v989_v47 = vadd.f32 %v988_v45, %v858_v27  ;;  %v951_v48 = vpop.f32.mrf.mxu0  ;;  %v964_v49 = vpop.f32.mrf.mxu1 }
 0x109   : > { %1096 = vst.msk [vmem:[%s1677_s15] sm:$0xff] %vm381_vm0, %v976_v46 }
 0x10a   : > { %1097 = vst.msk [vmem:[%s1677_s15 + $0x8] sm:$0xff] %vm381_vm0, %v989_v47 }
 0x10e   : > { %v977_v50 = vpop.f32.mrf.mxu2  ;;  %v990_v51 = vpop.f32.mrf.mxu3 }
 0x10f   : > { %v1001_v52 = vpop.f32.mrf.mxu0  ;;  %v1014_v53 = vpop.f32.mrf.mxu1 }
 0x110   : > { %v1002_v54 = vadd.f32 %v1001_v52, %v871_v28  ;;  %v1015_v55 = vadd.f32 %v1014_v53, %v884_v29 }
 0x112   : > { %1098 = vst.msk [vmem:[%s1677_s15 + $0x10] sm:$0xff] %vm381_vm0, %v1002_v54 }
 0x113   : > { %1099 = vst.msk [vmem:[%s1677_s15 + $0x18] sm:$0xff] %vm381_vm0, %v1015_v55 }
 0x116   : > { %v1027_v56 = vpop.f32.mrf.mxu2  ;;  %v1040_v57 = vpop.f32.mrf.mxu3 }
 0x117   : > { %v1028_v58 = vadd.f32 %v1027_v56, %v897_v34  ;;  %v1041_v59 = vadd.f32 %v1040_v57, %v910_v35  ;;  %v1003_v60 = vpop.f32.mrf.mxu0  ;;  %v1016_v61 = vpop.f32.mrf.mxu1 }
 0x119   : > { %1100 = vst.msk [vmem:[%s1677_s15 + $0x20] sm:$0xff] %vm381_vm0, %v1028_v58 }
 0x11a   : > { %1101 = vst.msk [vmem:[%s1677_s15 + $0x28] sm:$0xff] %vm381_vm0, %v1041_v59 }
 0x11e   : > { %v1029_v62 = vpop.f32.mrf.mxu2  ;;  %v1042_v63 = vpop.f32.mrf.mxu3 }
 0x11f   : > { %v1053_v0 = vpop.f32.mrf.mxu0  ;;  %v1066_v1 = vpop.f32.mrf.mxu1 }
 0x120   : > { %v1054_v2 = vadd.f32 %v1053_v0, %v923_v36  ;;  %v1067_v3 = vadd.f32 %v1066_v1, %v936_v37 }
 0x122   : > { %1102 = vst.msk [vmem:[%s1677_s15 + $0x30] sm:$0xff] %vm381_vm0, %v1054_v2 }
 0x123   : > { %1103 = vst.msk [vmem:[%s1677_s15 + $0x38] sm:$0xff] %vm381_vm0, %v1067_v3 }
 0x126   : > { %v1079_v4 = vpop.f32.mrf.mxu2  ;;  %v1092_v5 = vpop.f32.mrf.mxu3 }
 0x127   : > { %v1080_v6 = vadd.f32 %v1079_v4, %v949_v42  ;;  %v1093_v7 = vadd.f32 %v1092_v5, %v962_v43  ;;  %v1055_v8 = vpop.f32.mrf.mxu0  ;;  %v1068_v9 = vpop.f32.mrf.mxu1 }
 0x129   : > { %1104 = vst.msk [vmem:[%s1677_s15 + $0x40] sm:$0xff] %vm381_vm0, %v1080_v6 }
 0x12a   : > { %1105 = vst.msk [vmem:[%s1677_s15 + $0x48] sm:$0xff] %vm381_vm0, %v1093_v7 }
 0x12e   : > { %v1081_v10 = vpop.f32.mrf.mxu2  ;;  %v1094_v11 = vpop.f32.mrf.mxu3 }
 0x12f PF: > { %s16_s18 = sadd.s32 1, %s1403_s18  }
 0x130   : > { %p13_p4 = scmp.ge.s32.totalorder %s16_s18, 6  }
 0x132   :  { %15 = sbr.rel (!%p13_p4) target bundleno = 1 (0x1), region = 87 }

// kernel: reverse.12
= control target key start
LH: loop header
LB: loop body
LE: loop exit
PB: predicated region body
PF: predicated region fallthrough
CT: control target
= control target key end

     0   :  { %s1352_s0 = inlined_call_operand.vmem [shape: f32[16,8,16,7], index: 0, kind: input, shape index: {}]   ;;  %s1353_s1 = inlined_call_operand.vmem [shape: f32[16,8,16,7], index: 1, kind: output, shape index: {}]  }
   0x1   :  { %v448_v0 = vld [vmem:[%s1352_s0 + $0x60] sm:$0xff]  ;;  %v449_v1 = vld [vmem:[%s1352_s0 + $0xd0] sm:$0xff]  ;;  %v558_v56 = vld [vmem:[%s1352_s0 + $0x68] sm:$0xff] }
   0x2   :  { %v451_v2 = vld [vmem:[%s1352_s0 + $0x140] sm:$0xff]  ;;  %4 = vst [vmem:[%s1353_s1] sm:$0xff] %v448_v0  ;;  %v453_v3 = vld [vmem:[%s1352_s0 + $0x1b0] sm:$0xff]  ;;  %v560_v57 = vld [vmem:[%s1352_s0 + $0xd8] sm:$0xff] }
   0x3   :  { %450 = vst [vmem:[%s1353_s1 + $0x70] sm:$0xff] %v449_v1  ;;  %v455_v4 = vld [vmem:[%s1352_s0 + $0x220] sm:$0xff]  ;;  %v457_v5 = vld [vmem:[%s1352_s0 + $0x290] sm:$0xff]  ;;  %v562_v58 = vld [vmem:[%s1352_s0 + $0x148] sm:$0xff] }
   0x4   :  { %452 = vst [vmem:[%s1353_s1 + $0xe0] sm:$0xff] %v451_v2  ;;  %v459_v6 = vld [vmem:[%s1352_s0 + $0x300] sm:$0xff]  ;;  %v461_v7 = vld [vmem:[%s1352_s0 + $0x370] sm:$0xff]  ;;  %v564_v59 = vld [vmem:[%s1352_s0 + $0x1b8] sm:$0xff] }
   0x5   :  { %454 = vst [vmem:[%s1353_s1 + $0x150] sm:$0xff] %v453_v3  ;;  %v463_v8 = vld [vmem:[%s1352_s0 + $0x50] sm:$0xff]  ;;  %v465_v9 = vld [vmem:[%s1352_s0 + $0xc0] sm:$0xff]  ;;  %v566_v60 = vld [vmem:[%s1352_s0 + $0x228] sm:$0xff] }
   0x6   :  { %456 = vst [vmem:[%s1353_s1 + $0x1c0] sm:$0xff] %v455_v4  ;;  %v467_v10 = vld [vmem:[%s1352_s0 + $0x130] sm:$0xff]  ;;  %v469_v11 = vld [vmem:[%s1352_s0 + $0x1a0] sm:$0xff]  ;;  %v568_v61 = vld [vmem:[%s1352_s0 + $0x298] sm:$0xff] }
   0x7   :  { %458 = vst [vmem:[%s1353_s1 + $0x230] sm:$0xff] %v457_v5  ;;  %v471_v12 = vld [vmem:[%s1352_s0 + $0x210] sm:$0xff]  ;;  %v473_v13 = vld [vmem:[%s1352_s0 + $0x280] sm:$0xff]  ;;  %v570_v62 = vld [vmem:[%s1352_s0 + $0x308] sm:$0xff] }
   0x8   :  { %460 = vst [vmem:[%s1353_s1 + $0x2a0] sm:$0xff] %v459_v6  ;;  %v475_v14 = vld [vmem:[%s1352_s0 + $0x2f0] sm:$0xff]  ;;  %v477_v15 = vld [vmem:[%s1352_s0 + $0x360] sm:$0xff]  ;;  %v572_v63 = vld [vmem:[%s1352_s0 + $0x378] sm:$0xff] }
   0x9   :  { %462 = vst [vmem:[%s1353_s1 + $0x310] sm:$0xff] %v461_v7  ;;  %v479_v16 = vld [vmem:[%s1352_s0 + $0x40] sm:$0xff]  ;;  %v481_v17 = vld [vmem:[%s1352_s0 + $0xb0] sm:$0xff]  ;;  %v574_v0 = vld [vmem:[%s1352_s0 + $0x58] sm:$0xff] }
   0xa   :  { %464 = vst [vmem:[%s1353_s1 + $0x10] sm:$0xff] %v463_v8  ;;  %v483_v18 = vld [vmem:[%s1352_s0 + $0x120] sm:$0xff]  ;;  %v485_v19 = vld [vmem:[%s1352_s0 + $0x190] sm:$0xff]  ;;  %v576_v1 = vld [vmem:[%s1352_s0 + $0xc8] sm:$0xff] }
   0xb   :  { %466 = vst [vmem:[%s1353_s1 + $0x80] sm:$0xff] %v465_v9  ;;  %v487_v20 = vld [vmem:[%s1352_s0 + $0x200] sm:$0xff]  ;;  %v489_v21 = vld [vmem:[%s1352_s0 + $0x270] sm:$0xff]  ;;  %v578_v2 = vld [vmem:[%s1352_s0 + $0x138] sm:$0xff] }
   0xc   :  { %468 = vst [vmem:[%s1353_s1 + $0xf0] sm:$0xff] %v467_v10  ;;  %v491_v22 = vld [vmem:[%s1352_s0 + $0x2e0] sm:$0xff]  ;;  %v493_v23 = vld [vmem:[%s1352_s0 + $0x350] sm:$0xff]  ;;  %v580_v3 = vld [vmem:[%s1352_s0 + $0x1a8] sm:$0xff] }
   0xd   :  { %470 = vst [vmem:[%s1353_s1 + $0x160] sm:$0xff] %v469_v11  ;;  %v495_v24 = vld [vmem:[%s1352_s0 + $0x30] sm:$0xff]  ;;  %v497_v25 = vld [vmem:[%s1352_s0 + $0xa0] sm:$0xff]  ;;  %v582_v4 = vld [vmem:[%s1352_s0 + $0x218] sm:$0xff] }
   0xe   :  { %472 = vst [vmem:[%s1353_s1 + $0x1d0] sm:$0xff] %v471_v12  ;;  %v499_v26 = vld [vmem:[%s1352_s0 + $0x110] sm:$0xff]  ;;  %v501_v27 = vld [vmem:[%s1352_s0 + $0x180] sm:$0xff]  ;;  %v584_v5 = vld [vmem:[%s1352_s0 + $0x288] sm:$0xff] }
   0xf   :  { %474 = vst [vmem:[%s1353_s1 + $0x240] sm:$0xff] %v473_v13  ;;  %v503_v28 = vld [vmem:[%s1352_s0 + $0x1f0] sm:$0xff]  ;;  %v505_v29 = vld [vmem:[%s1352_s0 + $0x260] sm:$0xff]  ;;  %v586_v6 = vld [vmem:[%s1352_s0 + $0x2f8] sm:$0xff] }
  0x10   :  { %476 = vst [vmem:[%s1353_s1 + $0x2b0] sm:$0xff] %v475_v14  ;;  %v507_v30 = vld [vmem:[%s1352_s0 + $0x2d0] sm:$0xff]  ;;  %v509_v31 = vld [vmem:[%s1352_s0 + $0x340] sm:$0xff]  ;;  %v588_v7 = vld [vmem:[%s1352_s0 + $0x368] sm:$0xff] }
  0x11   :  { %478 = vst [vmem:[%s1353_s1 + $0x320] sm:$0xff] %v477_v15  ;;  %v511_v32 = vld [vmem:[%s1352_s0 + $0x20] sm:$0xff]  ;;  %v513_v33 = vld [vmem:[%s1352_s0 + $0x90] sm:$0xff]  ;;  %v590_v8 = vld [vmem:[%s1352_s0 + $0x48] sm:$0xff] }
  0x12   :  { %480 = vst [vmem:[%s1353_s1 + $0x20] sm:$0xff] %v479_v16  ;;  %v515_v34 = vld [vmem:[%s1352_s0 + $0x100] sm:$0xff]  ;;  %v517_v35 = vld [vmem:[%s1352_s0 + $0x170] sm:$0xff]  ;;  %v592_v9 = vld [vmem:[%s1352_s0 + $0xb8] sm:$0xff] }
  0x13   :  { %482 = vst [vmem:[%s1353_s1 + $0x90] sm:$0xff] %v481_v17  ;;  %v519_v36 = vld [vmem:[%s1352_s0 + $0x1e0] sm:$0xff]  ;;  %v521_v37 = vld [vmem:[%s1352_s0 + $0x250] sm:$0xff]  ;;  %v594_v10 = vld [vmem:[%s1352_s0 + $0x128] sm:$0xff] }
  0x14   :  { %484 = vst [vmem:[%s1353_s1 + $0x100] sm:$0xff] %v483_v18  ;;  %v523_v38 = vld [vmem:[%s1352_s0 + $0x2c0] sm:$0xff]  ;;  %v525_v39 = vld [vmem:[%s1352_s0 + $0x330] sm:$0xff]  ;;  %v596_v11 = vld [vmem:[%s1352_s0 + $0x198] sm:$0xff] }
  0x15   :  { %486 = vst [vmem:[%s1353_s1 + $0x170] sm:$0xff] %v485_v19  ;;  %v527_v40 = vld [vmem:[%s1352_s0 + $0x10] sm:$0xff]  ;;  %v529_v41 = vld [vmem:[%s1352_s0 + $0x80] sm:$0xff]  ;;  %v598_v12 = vld [vmem:[%s1352_s0 + $0x208] sm:$0xff] }
  0x16   :  { %488 = vst [vmem:[%s1353_s1 + $0x1e0] sm:$0xff] %v487_v20  ;;  %v531_v42 = vld [vmem:[%s1352_s0 + $0xf0] sm:$0xff]  ;;  %v533_v43 = vld [vmem:[%s1352_s0 + $0x160] sm:$0xff]  ;;  %v600_v13 = vld [vmem:[%s1352_s0 + $0x278] sm:$0xff] }
  0x17   :  { %490 = vst [vmem:[%s1353_s1 + $0x250] sm:$0xff] %v489_v21  ;;  %v535_v44 = vld [vmem:[%s1352_s0 + $0x1d0] sm:$0xff]  ;;  %v537_v45 = vld [vmem:[%s1352_s0 + $0x240] sm:$0xff]  ;;  %v602_v14 = vld [vmem:[%s1352_s0 + $0x2e8] sm:$0xff] }
  0x18   :  { %492 = vst [vmem:[%s1353_s1 + $0x2c0] sm:$0xff] %v491_v22  ;;  %v539_v46 = vld [vmem:[%s1352_s0 + $0x2b0] sm:$0xff]  ;;  %v541_v47 = vld [vmem:[%s1352_s0 + $0x320] sm:$0xff]  ;;  %v604_v15 = vld [vmem:[%s1352_s0 + $0x358] sm:$0xff] }
  0x19   :  { %494 = vst [vmem:[%s1353_s1 + $0x330] sm:$0xff] %v493_v23  ;;  %v193_v48 = vld [vmem:[%s1352_s0] sm:$0xff]  ;;  %v544_v49 = vld [vmem:[%s1352_s0 + $0x70] sm:$0xff]  ;;  %v606_v16 = vld [vmem:[%s1352_s0 + $0x38] sm:$0xff] }
  0x1a   :  { %496 = vst [vmem:[%s1353_s1 + $0x30] sm:$0xff] %v495_v24  ;;  %v546_v50 = vld [vmem:[%s1352_s0 + $0xe0] sm:$0xff]  ;;  %v548_v51 = vld [vmem:[%s1352_s0 + $0x150] sm:$0xff]  ;;  %v608_v17 = vld [vmem:[%s1352_s0 + $0xa8] sm:$0xff] }
  0x1b   :  { %498 = vst [vmem:[%s1353_s1 + $0xa0] sm:$0xff] %v497_v25  ;;  %v550_v52 = vld [vmem:[%s1352_s0 + $0x1c0] sm:$0xff]  ;;  %v552_v53 = vld [vmem:[%s1352_s0 + $0x230] sm:$0xff]  ;;  %v610_v18 = vld [vmem:[%s1352_s0 + $0x118] sm:$0xff] }
  0x1c   :  { %500 = vst [vmem:[%s1353_s1 + $0x110] sm:$0xff] %v499_v26  ;;  %v554_v54 = vld [vmem:[%s1352_s0 + $0x2a0] sm:$0xff]  ;;  %v556_v55 = vld [vmem:[%s1352_s0 + $0x310] sm:$0xff]  ;;  %v612_v19 = vld [vmem:[%s1352_s0 + $0x188] sm:$0xff] }
  0x1d   :  { %502 = vst [vmem:[%s1353_s1 + $0x180] sm:$0xff] %v501_v27  ;;  %v614_v20 = vld [vmem:[%s1352_s0 + $0x1f8] sm:$0xff]  ;;  %v616_v21 = vld [vmem:[%s1352_s0 + $0x268] sm:$0xff] }
  0x1e   :  { %504 = vst [vmem:[%s1353_s1 + $0x1f0] sm:$0xff] %v503_v28  ;;  %v618_v22 = vld [vmem:[%s1352_s0 + $0x2d8] sm:$0xff]  ;;  %v620_v23 = vld [vmem:[%s1352_s0 + $0x348] sm:$0xff] }
  0x1f   :  { %506 = vst [vmem:[%s1353_s1 + $0x260] sm:$0xff] %v505_v29  ;;  %v622_v24 = vld [vmem:[%s1352_s0 + $0x28] sm:$0xff]  ;;  %v624_v25 = vld [vmem:[%s1352_s0 + $0x98] sm:$0xff] }
  0x20   :  { %508 = vst [vmem:[%s1353_s1 + $0x2d0] sm:$0xff] %v507_v30  ;;  %v626_v26 = vld [vmem:[%s1352_s0 + $0x108] sm:$0xff]  ;;  %v628_v27 = vld [vmem:[%s1352_s0 + $0x178] sm:$0xff] }
  0x21   :  { %510 = vst [vmem:[%s1353_s1 + $0x340] sm:$0xff] %v509_v31  ;;  %v630_v28 = vld [vmem:[%s1352_s0 + $0x1e8] sm:$0xff]  ;;  %v632_v29 = vld [vmem:[%s1352_s0 + $0x258] sm:$0xff] }
  0x22   :  { %512 = vst [vmem:[%s1353_s1 + $0x40] sm:$0xff] %v511_v32  ;;  %v634_v30 = vld [vmem:[%s1352_s0 + $0x2c8] sm:$0xff]  ;;  %v636_v31 = vld [vmem:[%s1352_s0 + $0x338] sm:$0xff] }
  0x23   :  { %514 = vst [vmem:[%s1353_s1 + $0xb0] sm:$0xff] %v513_v33  ;;  %v638_v32 = vld [vmem:[%s1352_s0 + $0x18] sm:$0xff]  ;;  %v640_v33 = vld [vmem:[%s1352_s0 + $0x88] sm:$0xff] }
  0x24   :  { %516 = vst [vmem:[%s1353_s1 + $0x120] sm:$0xff] %v515_v34  ;;  %v642_v34 = vld [vmem:[%s1352_s0 + $0xf8] sm:$0xff] }
  0x25   :  { %518 = vst [vmem:[%s1353_s1 + $0x190] sm:$0xff] %v517_v35  ;;  %v644_v35 = vld [vmem:[%s1352_s0 + $0x168] sm:$0xff] }
  0x26   :  { %520 = vst [vmem:[%s1353_s1 + $0x200] sm:$0xff] %v519_v36  ;;  %v646_v36 = vld [vmem:[%s1352_s0 + $0x1d8] sm:$0xff] }
  0x27   :  { %522 = vst [vmem:[%s1353_s1 + $0x270] sm:$0xff] %v521_v37  ;;  %v648_v37 = vld [vmem:[%s1352_s0 + $0x248] sm:$0xff] }
  0x28   :  { %524 = vst [vmem:[%s1353_s1 + $0x2e0] sm:$0xff] %v523_v38  ;;  %v650_v38 = vld [vmem:[%s1352_s0 + $0x2b8] sm:$0xff] }
  0x29   :  { %526 = vst [vmem:[%s1353_s1 + $0x350] sm:$0xff] %v525_v39  ;;  %v652_v39 = vld [vmem:[%s1352_s0 + $0x328] sm:$0xff] }
  0x2a   :  { %528 = vst [vmem:[%s1353_s1 + $0x50] sm:$0xff] %v527_v40  ;;  %v654_v40 = vld [vmem:[%s1352_s0 + $0x8] sm:$0xff] }
  0x2b   :  { %530 = vst [vmem:[%s1353_s1 + $0xc0] sm:$0xff] %v529_v41  ;;  %v656_v41 = vld [vmem:[%s1352_s0 + $0x78] sm:$0xff] }
  0x2c   :  { %532 = vst [vmem:[%s1353_s1 + $0x130] sm:$0xff] %v531_v42  ;;  %v658_v42 = vld [vmem:[%s1352_s0 + $0xe8] sm:$0xff] }
  0x2d   :  { %534 = vst [vmem:[%s1353_s1 + $0x1a0] sm:$0xff] %v533_v43  ;;  %v660_v43 = vld [vmem:[%s1352_s0 + $0x158] sm:$0xff] }
  0x2e   :  { %536 = vst [vmem:[%s1353_s1 + $0x210] sm:$0xff] %v535_v44  ;;  %v662_v44 = vld [vmem:[%s1352_s0 + $0x1c8] sm:$0xff] }
  0x2f   :  { %538 = vst [vmem:[%s1353_s1 + $0x280] sm:$0xff] %v537_v45  ;;  %v664_v45 = vld [vmem:[%s1352_s0 + $0x238] sm:$0xff] }
  0x30   :  { %540 = vst [vmem:[%s1353_s1 + $0x2f0] sm:$0xff] %v539_v46  ;;  %v666_v46 = vld [vmem:[%s1352_s0 + $0x2a8] sm:$0xff] }
  0x31   :  { %542 = vst [vmem:[%s1353_s1 + $0x360] sm:$0xff] %v541_v47  ;;  %v668_v47 = vld [vmem:[%s1352_s0 + $0x318] sm:$0xff] }
  0x32   :  { %543 = vst [vmem:[%s1353_s1 + $0x60] sm:$0xff] %v193_v48 }
  0x33   :  { %545 = vst [vmem:[%s1353_s1 + $0xd0] sm:$0xff] %v544_v49 }
  0x34   :  { %547 = vst [vmem:[%s1353_s1 + $0x140] sm:$0xff] %v546_v50 }
  0x35   :  { %549 = vst [vmem:[%s1353_s1 + $0x1b0] sm:$0xff] %v548_v51 }
  0x36   :  { %551 = vst [vmem:[%s1353_s1 + $0x220] sm:$0xff] %v550_v52 }
  0x37   :  { %553 = vst [vmem:[%s1353_s1 + $0x290] sm:$0xff] %v552_v53 }
  0x38   :  { %555 = vst [vmem:[%s1353_s1 + $0x300] sm:$0xff] %v554_v54 }
  0x39   :  { %557 = vst [vmem:[%s1353_s1 + $0x370] sm:$0xff] %v556_v55 }
  0x3a   :  { %559 = vst [vmem:[%s1353_s1 + $0x8] sm:$0xff] %v558_v56 }
  0x3b   :  { %561 = vst [vmem:[%s1353_s1 + $0x78] sm:$0xff] %v560_v57 }
  0x3c   :  { %563 = vst [vmem:[%s1353_s1 + $0xe8] sm:$0xff] %v562_v58 }
  0x3d   :  { %565 = vst [vmem:[%s1353_s1 + $0x158] sm:$0xff] %v564_v59 }
  0x3e   :  { %567 = vst [vmem:[%s1353_s1 + $0x1c8] sm:$0xff] %v566_v60 }
  0x3f   :  { %569 = vst [vmem:[%s1353_s1 + $0x238] sm:$0xff] %v568_v61 }
  0x40   :  { %571 = vst [vmem:[%s1353_s1 + $0x2a8] sm:$0xff] %v570_v62 }
  0x41   :  { %573 = vst [vmem:[%s1353_s1 + $0x318] sm:$0xff] %v572_v63 }
  0x42   :  { %575 = vst [vmem:[%s1353_s1 + $0x18] sm:$0xff] %v574_v0 }
  0x43   :  { %577 = vst [vmem:[%s1353_s1 + $0x88] sm:$0xff] %v576_v1 }
  0x44   :  { %579 = vst [vmem:[%s1353_s1 + $0xf8] sm:$0xff] %v578_v2 }
  0x45   :  { %581 = vst [vmem:[%s1353_s1 + $0x168] sm:$0xff] %v580_v3 }
  0x46   :  { %583 = vst [vmem:[%s1353_s1 + $0x1d8] sm:$0xff] %v582_v4 }
  0x47   :  { %585 = vst [vmem:[%s1353_s1 + $0x248] sm:$0xff] %v584_v5 }
  0x48   :  { %587 = vst [vmem:[%s1353_s1 + $0x2b8] sm:$0xff] %v586_v6 }
  0x49   :  { %589 = vst [vmem:[%s1353_s1 + $0x328] sm:$0xff] %v588_v7 }
  0x4a   :  { %591 = vst [vmem:[%s1353_s1 + $0x28] sm:$0xff] %v590_v8 }
  0x4b   :  { %593 = vst [vmem:[%s1353_s1 + $0x98] sm:$0xff] %v592_v9 }
  0x4c   :  { %595 = vst [vmem:[%s1353_s1 + $0x108] sm:$0xff] %v594_v10 }
  0x4d   :  { %597 = vst [vmem:[%s1353_s1 + $0x178] sm:$0xff] %v596_v11 }
  0x4e   :  { %599 = vst [vmem:[%s1353_s1 + $0x1e8] sm:$0xff] %v598_v12 }
  0x4f   :  { %601 = vst [vmem:[%s1353_s1 + $0x258] sm:$0xff] %v600_v13 }
  0x50   :  { %603 = vst [vmem:[%s1353_s1 + $0x2c8] sm:$0xff] %v602_v14 }
  0x51   :  { %605 = vst [vmem:[%s1353_s1 + $0x338] sm:$0xff] %v604_v15 }
  0x52   :  { %607 = vst [vmem:[%s1353_s1 + $0x38] sm:$0xff] %v606_v16 }
  0x53   :  { %609 = vst [vmem:[%s1353_s1 + $0xa8] sm:$0xff] %v608_v17 }
  0x54   :  { %611 = vst [vmem:[%s1353_s1 + $0x118] sm:$0xff] %v610_v18 }
  0x55   :  { %613 = vst [vmem:[%s1353_s1 + $0x188] sm:$0xff] %v612_v19 }
  0x56   :  { %615 = vst [vmem:[%s1353_s1 + $0x1f8] sm:$0xff] %v614_v20 }
  0x57   :  { %617 = vst [vmem:[%s1353_s1 + $0x268] sm:$0xff] %v616_v21 }
  0x58   :  { %619 = vst [vmem:[%s1353_s1 + $0x2d8] sm:$0xff] %v618_v22 }
  0x59   :  { %621 = vst [vmem:[%s1353_s1 + $0x348] sm:$0xff] %v620_v23 }
  0x5a   :  { %623 = vst [vmem:[%s1353_s1 + $0x48] sm:$0xff] %v622_v24 }
  0x5b   :  { %625 = vst [vmem:[%s1353_s1 + $0xb8] sm:$0xff] %v624_v25 }
  0x5c   :  { %627 = vst [vmem:[%s1353_s1 + $0x128] sm:$0xff] %v626_v26 }
  0x5d   :  { %629 = vst [vmem:[%s1353_s1 + $0x198] sm:$0xff] %v628_v27 }
  0x5e   :  { %631 = vst [vmem:[%s1353_s1 + $0x208] sm:$0xff] %v630_v28 }
  0x5f   :  { %633 = vst [vmem:[%s1353_s1 + $0x278] sm:$0xff] %v632_v29 }
  0x60   :  { %635 = vst [vmem:[%s1353_s1 + $0x2e8] sm:$0xff] %v634_v30 }
  0x61   :  { %637 = vst [vmem:[%s1353_s1 + $0x358] sm:$0xff] %v636_v31 }
  0x62   :  { %639 = vst [vmem:[%s1353_s1 + $0x58] sm:$0xff] %v638_v32 }
  0x63   :  { %641 = vst [vmem:[%s1353_s1 + $0xc8] sm:$0xff] %v640_v33 }
  0x64   :  { %643 = vst [vmem:[%s1353_s1 + $0x138] sm:$0xff] %v642_v34 }
  0x65   :  { %645 = vst [vmem:[%s1353_s1 + $0x1a8] sm:$0xff] %v644_v35 }
  0x66   :  { %647 = vst [vmem:[%s1353_s1 + $0x218] sm:$0xff] %v646_v36 }
  0x67   :  { %649 = vst [vmem:[%s1353_s1 + $0x288] sm:$0xff] %v648_v37 }
  0x68   :  { %651 = vst [vmem:[%s1353_s1 + $0x2f8] sm:$0xff] %v650_v38 }
  0x69   :  { %653 = vst [vmem:[%s1353_s1 + $0x368] sm:$0xff] %v652_v39 }
  0x6a   :  { %655 = vst [vmem:[%s1353_s1 + $0x68] sm:$0xff] %v654_v40 }
  0x6b   :  { %657 = vst [vmem:[%s1353_s1 + $0xd8] sm:$0xff] %v656_v41 }
  0x6c   :  { %659 = vst [vmem:[%s1353_s1 + $0x148] sm:$0xff] %v658_v42 }
  0x6d   :  { %661 = vst [vmem:[%s1353_s1 + $0x1b8] sm:$0xff] %v660_v43 }
  0x6e   :  { %663 = vst [vmem:[%s1353_s1 + $0x228] sm:$0xff] %v662_v44 }
  0x6f   :  { %665 = vst [vmem:[%s1353_s1 + $0x298] sm:$0xff] %v664_v45 }
  0x70   :  { %667 = vst [vmem:[%s1353_s1 + $0x308] sm:$0xff] %v666_v46 }
  0x71   :  { %669 = vst [vmem:[%s1353_s1 + $0x378] sm:$0xff] %v668_v47 }

// kernel: forward.20
= control target key start
LH: loop header
LB: loop body
LE: loop exit
PB: predicated region body
PF: predicated region fallthrough
CT: control target
= control target key end

     0   :  { %s725_s15 = smov 0   ;;  %s727_s16 = smov 0   ;;  %s877_s0 = inlined_call_operand.vmem [shape: bf16[16,2048], index: 0, kind: input, shape index: {}]   ;;  %s878_s1 = inlined_call_operand.vmem [shape: bf16[16,16], index: 1, kind: input, shape index: {}]   ;;  %s879_s2 = inlined_call_operand.vmem [shape: f32[16,1], index: 2, kind: input, shape index: {}]   ;;  %s880_s3 = inlined_call_operand.vmem [shape: f32[16,2048], index: 3, kind: input, shape index: {}]   ;;  %s881_s4 = inlined_call_operand.vmem [shape: bf16[16,2048], index: 4, kind: output, shape index: {}]  }
   0x1   :  { %s729_s17 = smov 0  }
   0x2 LB: > { %s582_s18 = sadd.s32 4294967295, %s697_s17   ;;  %s742_s19 = sadd.s32 1, %s697_s17   ;;  %s697_s17 = sphi %s729_s17, %s886_s17   ;;  %s693_s16 = sphi %s727_s16, %s885_s16   ;;  %s689_s15 = sphi %s725_s15, %s884_s15  }
   0x3   : > { %s18_s20 = ssub.s32 %s697_s17, %s742_s19  ;;  %s21_s21 = sadd.s32 1, %s693_s16 }
   0x4   : > { %p19_p0 = scmp.eq.s32.totalorder %s18_s20, 0  ;;  %p28_p1 = scmp.ne.s32.totalorder %s693_s16, %s689_s15 }
   0x5   : > { %p29_p2 = scmp.eq.s32.totalorder %s697_s17, 0  ;;  %p126_p3 = scmp.eq.s32.totalorder %s582_s18, 3 }
   0x6   : > { %s753_s22 = scalar_select %p19_p0, %s693_s16, %s21_s21  }
   0x7   : > { %p755_p4 = por %p29_p2, %p28_p1  ;;  %p759_p5 = por %p126_p3, %p28_p1 }
   0x8   : > { %p585_p6 = scmp.ge.s32.totalorder %s697_s17, 4 }
   0xa   : > { %154 = sbr.rel (%p585_p6) target bundleno = 35 (0x23), region = 24 }
   0xf   : > { %157 = sbr.rel (!%p755_p4) target bundleno = 23 (0x17), region = 28  ;;  %s159_s25 = sand.u32 (%p755_p4), 1, %s693_s16  }
  0x10   : > { %s625_s26 = sshll.u32 (%p755_p4), %s697_s17, 4  ;;  %s586_s27 = sshll.u32 (%p755_p4), %s159_s25, 5 }
  0x11   : > { %s164_s30 = scalar_lea.vmem (%p755_p4), %s877_s0, %s625_s26  ;;  %s161_s5 = scalar_lea.vmem (%p755_p4), [#allocation2], %s586_s27 }
  0x12   : > { %v177_v0 = vld [vmem:[%s164_s30] sm:$0xff] (%p755_p4)  ;;  %v179_v1 = vld [vmem:[%s164_s30 + $0x8] sm:$0xff] (%p755_p4) }
  0x13   : > { %v181_v2 = vld [vmem:[%s164_s30 + $0x40] sm:$0xff] (%p755_p4)  ;;  %178 = vst [vmem:[%s161_s5] sm:$0xff] (%p755_p4), %v177_v0  ;;  %v183_v3 = vld [vmem:[%s164_s30 + $0x48] sm:$0xff] (%p755_p4) }
  0x14   : > { %180 = vst [vmem:[%s161_s5 + $0x8] sm:$0xff] %v179_v1 }
  0x15   : > { %182 = vst [vmem:[%s161_s5 + $0x10] sm:$0xff] %v181_v2 }
  0x16   : > { %184 = vst [vmem:[%s161_s5 + $0x18] sm:$0xff] %v183_v3 }
  0x17 PF: > { %190 = sbr.rel (!%p755_p4) target bundleno = 35 (0x23), region = 51  ;;  %s192_s6 = sand.u32 (%p755_p4), 1, %s693_s16  }
  0x18   : > { %s626_s7 = sshll.u32 (%p755_p4), %s697_s17, 5  ;;  %s589_s8 = sshll.u32 (%p755_p4), %s192_s6, 6 }
  0x19   : > { %s197_s11 = scalar_lea.vmem (%p755_p4), %s880_s3, %s626_s7  ;;  %s194_s12 = scalar_lea.vmem (%p755_p4), [#allocation3], %s589_s8 }
  0x1a   : > { %v210_v4 = vld [vmem:[%s197_s11] sm:$0xff] (%p755_p4)  ;;  %v212_v5 = vld [vmem:[%s197_s11 + $0x8] sm:$0xff] (%p755_p4)  ;;  %v214_v6 = vld [vmem:[%s197_s11 + $0x10] sm:$0xff] (%p755_p4) }
  0x1b   : > { %211 = vst [vmem:[%s194_s12] sm:$0xff] (%p755_p4), %v210_v4  ;;  %v216_v7 = vld [vmem:[%s197_s11 + $0x18] sm:$0xff] (%p755_p4)  ;;  %v218_v8 = vld [vmem:[%s197_s11 + $0x80] sm:$0xff] (%p755_p4)  ;;  %v220_v9 = vld [vmem:[%s197_s11 + $0x88] sm:$0xff] (%p755_p4) }
  0x1c   : > { %213 = vst [vmem:[%s194_s12 + $0x8] sm:$0xff] %v212_v5  ;;  %v222_v10 = vld [vmem:[%s197_s11 + $0x90] sm:$0xff]  ;;  %v224_v11 = vld [vmem:[%s197_s11 + $0x98] sm:$0xff] }
  0x1d   : > { %215 = vst [vmem:[%s194_s12 + $0x10] sm:$0xff] %v214_v6 }
  0x1e   : > { %217 = vst [vmem:[%s194_s12 + $0x18] sm:$0xff] %v216_v7 }
  0x1f   : > { %219 = vst [vmem:[%s194_s12 + $0x20] sm:$0xff] %v218_v8 }
  0x20   : > { %221 = vst [vmem:[%s194_s12 + $0x28] sm:$0xff] %v220_v9 }
  0x21   : > { %223 = vst [vmem:[%s194_s12 + $0x30] sm:$0xff] %v222_v10 }
  0x22   : > { %225 = vst [vmem:[%s194_s12 + $0x38] sm:$0xff] %v224_v11 }
  0x23 PF: > { %p592_p7 = scmp.ge.s32.totalorder %s697_s17, 1  ;;  %p230_p8 = scmp.lt.s32.totalorder %s697_s17, 5 }
  0x25   : > { %p231_p9 = pnand %p592_p7, %p230_p8 }
  0x26   : > { %s237_s13 = sand.u32 (!%p231_p9), 1, %s689_s15  }
  0x27   : > { %234 = sbr.rel (%p231_p9) target bundleno = 231 (0xe7), region = 74  ;;  %s786_s21 = sshll.u32 (!%p231_p9), %s237_s13, 5 }
  0x28   : > { %s239_s23 = scalar_lea.vmem (!%p231_p9), [#allocation2], %s786_s21  ;;  %s594_s29 = sshll.u32 (!%p231_p9), %s237_s13, 6 }
  0x29   : > { %s797_s30 = scalar_lea.vmem (!%p231_p9), [#allocation3], %s594_s29  ;;  %s846_s15 = scalar_lea.vmem (!%p231_p9), [#allocation4], %s786_s21 }
  0x2c   : > { %v282_v12 = vld [vmem:[%s879_s2] sm:$0xff]  ;;  %v699_v13 = vmov 0   ;;  %v630_v15 = vld [vmem:[%s239_s23 + $0xc] sm:$0xf0]  ;;  %v604_v18 = vld [vmem:[%s239_s23 + $0x10] sm:$0xf0] }
  0x2d   : > { %658 = vset.pattern.permute.xlu0 %v699_v13  ;;  %v602_v14 = vld [vmem:[%s239_s23] sm:$0xf]  ;;  %v628_v16 = vld [vmem:[%s239_s23 + $0x4] sm:$0xf]  ;;  %v610_v19 = vld [vmem:[%s239_s23 + $0x8] sm:$0xf] }
  0x2e   : > { %286 = vperm.xlu0 %658, %v282_v12   ;;  %v603_v17 = vor.u32 %v630_v15, %v602_v14  ;;  %v631_v20 = vld [vmem:[%s239_s23 + $0x14] sm:$0xf0]  ;;  %v607_v21 = vor.u32 %v628_v16, %v604_v18  ;;  %v629_v23 = vld [vmem:[%s239_s23 + $0xc] sm:$0xf]  ;;  %v612_v24 = vld [vmem:[%s239_s23 + $0x18] sm:$0xf0] }
  0x2f   : > { %v611_v22 = vor.u32 %v631_v20, %v610_v19  ;;  %v627_v25 = vld [vmem:[%s878_s1] sm:$0xff]  ;;  %v615_v26 = vor.u32 %v629_v23, %v612_v24  ;;  %vm319_vm0 = vcmask 130048   ;;  %v283_v27 = vld [vmem:[%s879_s2 + $0x8] sm:$0xff]  ;;  %v381_v42 = vld [vmem:[%s797_s30 + $0x10] sm:$0xff]  ;;  %s632_s5 = sshll.u32 (%p759_p5), %s582_s18, 4 }
  0x30   : > { %330 = vmatpush.bf16.msra.mxu0 %v603_v17  ;;  %344 = vmatpush.bf16.msra.mxu1 %v607_v21  ;;  %v379_v30 = vld [vmem:[%s797_s30] sm:$0xff]  ;;  %v380_v33 = vld [vmem:[%s797_s30 + $0x8] sm:$0xff]  ;;  %v382_v46 = vld [vmem:[%s797_s30 + $0x18] sm:$0xff]  ;;  %s484_s8 = scalar_lea.vmem (%p759_p5), %s881_s4, %s632_s5 }
  0x31   : > { %358 = vmatpush.bf16.msra.mxu2 %v611_v22  ;;  %372 = vmatpush.bf16.msra.mxu3 %v615_v26  ;;  %v383_v48 = vld [vmem:[%s797_s30 + $0x20] sm:$0xff]  ;;  %v384_v53 = vld [vmem:[%s797_s30 + $0x28] sm:$0xff]  ;;  %v385_v8 = vld [vmem:[%s797_s30 + $0x30] sm:$0xff] }
  0x32   : > { %v386_v13 = vld [vmem:[%s797_s30 + $0x38] sm:$0xff] }
  0x33   : > { %616 = vmatmul.msk.bf16.vlgmr.msra.gmra.mxu0 %vm319_vm0, %v627_v25  ;;  %617 = vmatmul.msk.bf16.vlgmr.msra.gmra.mxu1 %vm319_vm0, %v627_v25 }
  0x34   : > { %618 = vmatmul.msk.bf16.vlgmr.msra.gmra.mxu2 %vm319_vm0, %v627_v25  ;;  %619 = vmatmul.msk.bf16.vlgmr.msra.gmra.mxu3 %vm319_vm0, %v627_v25 }
  0x36   : > { %291 = vperm.xlu0 %658, %v283_v27  }
  0xa0   : > { %v287_v28 = vpop.permute.xlu0 %286 }
  0xa8   : > { %v292_v40 = vpop.permute.xlu0 %291 }
  0xb0   : > { %v332_v29 = vpop.f32.mrf.mxu0  ;;  %v346_v32 = vpop.f32.mrf.mxu1 }
  0xb1   : > { %v333_v31 = vadd.f32 %v332_v29, %v287_v28  ;;  %v347_v34 = vadd.f32 %v346_v32, %v287_v28 }
  0xb3   : > { %v801_v35 = vadd.f32 %v379_v30, %v333_v31  ;;  %v803_v36 = vadd.f32 %v380_v33, %v347_v34 }
  0xb5   : > { %v395_v37 = vmul.f32 %v801_v35, %v801_v35  ;;  %v396_v38 = vmul.f32 %v803_v36, %v803_v36 }
  0xb7   : > { %v403_v39 = vmul.f32 %v395_v37, %v801_v35  ;;  %v360_v41 = vpop.f32.mrf.mxu2  ;;  %v404_v43 = vmul.f32 %v396_v38, %v803_v36  ;;  %v374_v45 = vpop.f32.mrf.mxu3 }
  0xb8   : > { %v361_v44 = vadd.f32 %v360_v41, %v287_v28  ;;  %v334_v47 = vpop.f32.mrf.mxu0  ;;  %v375_v50 = vadd.f32 %v374_v45, %v287_v28  ;;  %v348_v52 = vpop.f32.mrf.mxu1 }
  0xb9   : > { %v411_v49 = vmul.f32 0.044715, %v403_v39  ;;  %v335_v51 = vadd.f32 %v334_v47, %v292_v40  ;;  %v412_v54 = vmul.f32 0.044715, %v404_v43  ;;  %v349_v56 = vadd.f32 %v348_v52, %v292_v40 }
  0xba   : > { %v815_v55 = vadd.f32 %v381_v42, %v361_v44  ;;  %v818_v58 = vadd.f32 %v382_v46, %v375_v50 }
  0xbb   : > { %v419_v57 = vadd.f32 %v411_v49, %v801_v35  ;;  %v820_v59 = vadd.f32 %v383_v48, %v335_v51  ;;  %v420_v60 = vadd.f32 %v412_v54, %v803_v36  ;;  %v825_v62 = vadd.f32 %v384_v53, %v349_v56 }
  0xbc   : > { %v397_v61 = vmul.f32 %v815_v55, %v815_v55  ;;  %v398_v0 = vmul.f32 %v818_v58, %v818_v58 }
  0xbd   : > { %v427_v63 = vmul.f32 0.7978846, %v419_v57  ;;  %v399_v1 = vmul.f32 %v820_v59, %v820_v59  ;;  %v428_v2 = vmul.f32 0.7978846, %v420_v60  ;;  %v400_v4 = vmul.f32 %v825_v62, %v825_v62 }
  0xbe   : > { %v405_v3 = vmul.f32 %v397_v61, %v815_v55  ;;  %v406_v5 = vmul.f32 %v398_v0, %v818_v58 }
  0xbf   : > { %659 = vtanh.f32 %v427_v63  ;;  %v407_v6 = vmul.f32 %v399_v1, %v820_v59  ;;  %v362_v7 = vpop.f32.mrf.mxu2  ;;  %v408_v10 = vmul.f32 %v400_v4, %v825_v62  ;;  %v376_v12 = vpop.f32.mrf.mxu3 }
  0xc0   : > { %661 = vtanh.f32 %v428_v2  ;;  %v413_v9 = vmul.f32 0.044715, %v405_v3  ;;  %v363_v11 = vadd.f32 %v362_v7, %v292_v40  ;;  %v414_v14 = vmul.f32 0.044715, %v406_v5 }
  0xc1   : > { %v415_v15 = vmul.f32 0.044715, %v407_v6  ;;  %v377_v16 = vadd.f32 %v376_v12, %v292_v40  ;;  %v416_v18 = vmul.f32 0.044715, %v408_v10 }
  0xc2   : > { %v421_v17 = vadd.f32 %v413_v9, %v815_v55  ;;  %v393_v19 = vadd.f32 %v385_v8, %v363_v11  ;;  %v422_v20 = vadd.f32 %v414_v14, %v818_v58 }
  0xc3   : > { %v423_v21 = vadd.f32 %v415_v15, %v820_v59  ;;  %v394_v22 = vadd.f32 %v386_v13, %v377_v16  ;;  %v424_v24 = vadd.f32 %v416_v18, %v825_v62 }
  0xc4   : > { %v429_v23 = vmul.f32 0.7978846, %v421_v17  ;;  %v401_v25 = vmul.f32 %v393_v19, %v393_v19  ;;  %v430_v27 = vmul.f32 0.7978846, %v422_v20 }
  0xc5   : > { %v660_v26 = vpop.eup %659  ;;  %v431_v28 = vmul.f32 0.7978846, %v423_v21  ;;  %v402_v29 = vmul.f32 %v394_v22, %v394_v22  ;;  %v432_v32 = vmul.f32 0.7978846, %v424_v24 }
  0xc6   : > { %v662_v30 = vpop.eup %661  ;;  %v443_v31 = vadd.f32 1.0, %v660_v26  ;;  %663 = vtanh.f32 %v429_v23  ;;  %v409_v33 = vmul.f32 %v401_v25, %v393_v19 }
  0xc7   : > { %v444_v34 = vadd.f32 1.0, %v662_v30  ;;  %665 = vtanh.f32 %v430_v27  ;;  %v410_v37 = vmul.f32 %v402_v29, %v394_v22 }
  0xc8   : > { %v451_v38 = vmul.f32 0.5, %v443_v31  ;;  %667 = vtanh.f32 %v431_v28  ;;  %v417_v39 = vmul.f32 0.044715, %v409_v33 }
  0xc9   : > { %v452_v40 = vmul.f32 0.5, %v444_v34  ;;  %669 = vtanh.f32 %v432_v32  ;;  %v418_v41 = vmul.f32 0.044715, %v410_v37 }
  0xca   : > { %v459_v42 = vmul.f32 %v451_v38, %v801_v35  ;;  %v425_v43 = vadd.f32 %v417_v39, %v393_v19 }
  0xcb   : > { %v460_v44 = vmul.f32 %v452_v40, %v803_v36  ;;  %v426_v45 = vadd.f32 %v418_v41, %v394_v22 }
  0xcc   : > { %v664_v46 = vpop.eup %663  ;;  %v433_v47 = vmul.f32 0.7978846, %v425_v43 }
  0xcd   : > { %v666_v48 = vpop.eup %665  ;;  %v467_v49 = vpack.c.bf16 %v460_v44, %v459_v42  ;;  %v445_v50 = vadd.f32 1.0, %v664_v46  ;;  %v434_v51 = vmul.f32 0.7978846, %v426_v45 }
  0xce   : > { %v668_v52 = vpop.eup %667  ;;  %v446_v53 = vadd.f32 1.0, %v666_v48  ;;  %671 = vtanh.f32 %v433_v47 }
  0xcf   : > { %v670_v54 = vpop.eup %669  ;;  %471 = vst [vmem:[%s846_s15] sm:$0xff] %v467_v49  ;;  %v453_v35 = vmul.f32 0.5, %v445_v50  ;;  %v447_v56 = vadd.f32 1.0, %v668_v52  ;;  %673 = vtanh.f32 %v434_v51 }
  0xd0   : > { %v454_v36 = vmul.f32 0.5, %v446_v53  ;;  %v448_v57 = vadd.f32 1.0, %v670_v54 }
  0xd1   : > { %v461_v60 = vmul.f32 %v453_v35, %v815_v55  ;;  %v455_v61 = vmul.f32 0.5, %v447_v56 }
  0xd2   : > { %v462_v63 = vmul.f32 %v454_v36, %v818_v58  ;;  %v456_v0 = vmul.f32 0.5, %v448_v57 }
  0xd3   : > { %v463_v1 = vmul.f32 %v455_v61, %v820_v59 }
  0xd4   : > { %v672_v2 = vpop.eup %671  ;;  %v468_v3 = vpack.c.bf16 %v462_v63, %v461_v60  ;;  %v464_v4 = vmul.f32 %v456_v0, %v825_v62 }
  0xd5   : > { %v674_v5 = vpop.eup %673  ;;  %v449_v6 = vadd.f32 1.0, %v672_v2 }
  0xd6   : > { %472 = vst [vmem:[%s846_s15 + $0x8] sm:$0xff] %v468_v3  ;;  %v469_v7 = vpack.c.bf16 %v464_v4, %v463_v1  ;;  %v450_v8 = vadd.f32 1.0, %v674_v5  ;;  %v497_v58 = vld [vmem:[%s846_s15] sm:$0xff] (%p759_p5) }
  0xd7   : > { %v457_v9 = vmul.f32 0.5, %v449_v6  ;;  %498 = vst [vmem:[%s484_s8] sm:$0xff] (%p759_p5), %v497_v58 }
  0xd8   : > { %473 = vst [vmem:[%s846_s15 + $0x10] sm:$0xff] %v469_v7  ;;  %v458_v10 = vmul.f32 0.5, %v450_v8 }
  0xd9   : > { %v465_v55 = vmul.f32 %v457_v9, %v393_v19 }
  0xda   : > { %v466_v11 = vmul.f32 %v458_v10, %v394_v22  ;;  %481 = sbr.rel (!%p759_p5) target bundleno = 231 (0xe7), region = 86 }
  0xdc   : > { %v470_v12 = vpack.c.bf16 %v466_v11, %v465_v55 }
  0xdd   : > { %v499_v59 = vld [vmem:[%s846_s15 + $0x8] sm:$0xff] (%p759_p5) }
  0xde   : > { %474 = vst [vmem:[%s846_s15 + $0x18] sm:$0xff] %v470_v12 }
  0xdf   : > { %v501_v62 = vld [vmem:[%s846_s15 + $0x10] sm:$0xff]  ;;  %500 = vst [vmem:[%s484_s8 + $0x8] sm:$0xff] %v499_v59 }
  0xe0   : > { %502 = vst [vmem:[%s484_s8 + $0x40] sm:$0xff] %v501_v62 }
  0xe5   : > { %v503_v13 = vld [vmem:[%s846_s15 + $0x18] sm:$0xff] }
  0xe6   : > { %504 = vst [vmem:[%s484_s8 + $0x48] sm:$0xff] %v503_v13 }
  0xe7 PF: > { %p11_p10 = scmp.ge.s32.totalorder %s742_s19, 6   ;;  %s884_s15 = smov %s693_s16 }
  0xe8   : > { %s885_s16 = smov %s753_s22  ;;  %s886_s17 = smov %s742_s19 }
  0xe9   :  { %13 = sbr.rel (!%p11_p10) target bundleno = 2 (0x2), region = 148 }

// kernel: forward.22
= control target key start
LH: loop header
LB: loop body
LE: loop exit
PB: predicated region body
PF: predicated region fallthrough
CT: control target
= control target key end

     0   :  { %s637_s15 = smov 0   ;;  %s639_s16 = smov 0   ;;  %s747_s0 = inlined_call_operand.vmem [shape: bf16[16,2048], index: 0, kind: input, shape index: {}]   ;;  %s748_s1 = inlined_call_operand.vmem [shape: bf16[16,16], index: 1, kind: input, shape index: {}]   ;;  %s749_s2 = inlined_call_operand.vmem [shape: f32[16,1], index: 2, kind: input, shape index: {}]   ;;  %s750_s3 = inlined_call_operand.vmem [shape: f32[16,2048], index: 3, kind: input, shape index: {}]   ;;  %s751_s4 = inlined_call_operand.vmem [shape: bf16[16,2048], index: 4, kind: output, shape index: {}]  }
   0x1   :  { %s641_s17 = smov 0  }
   0x2 LB: > { %s510_s18 = sadd.s32 4294967295, %s609_s17   ;;  %s654_s19 = sadd.s32 1, %s609_s17   ;;  %s609_s17 = sphi %s641_s17, %s756_s17   ;;  %s605_s16 = sphi %s639_s16, %s755_s16   ;;  %s601_s15 = sphi %s637_s15, %s754_s15  }
   0x3   : > { %s18_s20 = ssub.s32 %s609_s17, %s654_s19  ;;  %s21_s21 = sadd.s32 1, %s605_s16 }
   0x4   : > { %p19_p0 = scmp.eq.s32.totalorder %s18_s20, 0  ;;  %p28_p1 = scmp.ne.s32.totalorder %s605_s16, %s601_s15 }
   0x5   : > { %p29_p2 = scmp.eq.s32.totalorder %s609_s17, 0  ;;  %p126_p3 = scmp.eq.s32.totalorder %s510_s18, 3 }
   0x6   : > { %s665_s22 = scalar_select %p19_p0, %s605_s16, %s21_s21  }
   0x7   : > { %p667_p4 = por %p29_p2, %p28_p1  ;;  %p671_p5 = por %p126_p3, %p28_p1 }
   0x8   : > { %p513_p6 = scmp.ge.s32.totalorder %s609_s17, 4 }
   0xa   : > { %154 = sbr.rel (%p513_p6) target bundleno = 35 (0x23), region = 24 }
   0xf   : > { %157 = sbr.rel (!%p667_p4) target bundleno = 23 (0x17), region = 28  ;;  %s159_s25 = sand.u32 (%p667_p4), 1, %s605_s16  }
  0x10   : > { %s553_s26 = sshll.u32 (%p667_p4), %s609_s17, 4  ;;  %s514_s27 = sshll.u32 (%p667_p4), %s159_s25, 5 }
  0x11   : > { %s164_s30 = scalar_lea.vmem (%p667_p4), %s747_s0, %s553_s26  ;;  %s161_s5 = scalar_lea.vmem (%p667_p4), [#allocation2], %s514_s27 }
  0x12   : > { %v177_v0 = vld [vmem:[%s164_s30] sm:$0xff] (%p667_p4)  ;;  %v179_v1 = vld [vmem:[%s164_s30 + $0x8] sm:$0xff] (%p667_p4) }
  0x13   : > { %v181_v2 = vld [vmem:[%s164_s30 + $0x40] sm:$0xff] (%p667_p4)  ;;  %178 = vst [vmem:[%s161_s5] sm:$0xff] (%p667_p4), %v177_v0  ;;  %v183_v3 = vld [vmem:[%s164_s30 + $0x48] sm:$0xff] (%p667_p4) }
  0x14   : > { %180 = vst [vmem:[%s161_s5 + $0x8] sm:$0xff] %v179_v1 }
  0x15   : > { %182 = vst [vmem:[%s161_s5 + $0x10] sm:$0xff] %v181_v2 }
  0x16   : > { %184 = vst [vmem:[%s161_s5 + $0x18] sm:$0xff] %v183_v3 }
  0x17 PF: > { %190 = sbr.rel (!%p667_p4) target bundleno = 35 (0x23), region = 51  ;;  %s192_s6 = sand.u32 (%p667_p4), 1, %s605_s16  }
  0x18   : > { %s554_s7 = sshll.u32 (%p667_p4), %s609_s17, 5  ;;  %s517_s8 = sshll.u32 (%p667_p4), %s192_s6, 6 }
  0x19   : > { %s197_s11 = scalar_lea.vmem (%p667_p4), %s750_s3, %s554_s7  ;;  %s194_s12 = scalar_lea.vmem (%p667_p4), [#allocation3], %s517_s8 }
  0x1a   : > { %v210_v4 = vld [vmem:[%s197_s11] sm:$0xff] (%p667_p4)  ;;  %v212_v5 = vld [vmem:[%s197_s11 + $0x8] sm:$0xff] (%p667_p4)  ;;  %v214_v6 = vld [vmem:[%s197_s11 + $0x10] sm:$0xff] (%p667_p4) }
  0x1b   : > { %211 = vst [vmem:[%s194_s12] sm:$0xff] (%p667_p4), %v210_v4  ;;  %v216_v7 = vld [vmem:[%s197_s11 + $0x18] sm:$0xff] (%p667_p4)  ;;  %v218_v8 = vld [vmem:[%s197_s11 + $0x80] sm:$0xff] (%p667_p4)  ;;  %v220_v9 = vld [vmem:[%s197_s11 + $0x88] sm:$0xff] (%p667_p4) }
  0x1c   : > { %213 = vst [vmem:[%s194_s12 + $0x8] sm:$0xff] %v212_v5  ;;  %v222_v10 = vld [vmem:[%s197_s11 + $0x90] sm:$0xff]  ;;  %v224_v11 = vld [vmem:[%s197_s11 + $0x98] sm:$0xff] }
  0x1d   : > { %215 = vst [vmem:[%s194_s12 + $0x10] sm:$0xff] %v214_v6 }
  0x1e   : > { %217 = vst [vmem:[%s194_s12 + $0x18] sm:$0xff] %v216_v7 }
  0x1f   : > { %219 = vst [vmem:[%s194_s12 + $0x20] sm:$0xff] %v218_v8 }
  0x20   : > { %221 = vst [vmem:[%s194_s12 + $0x28] sm:$0xff] %v220_v9 }
  0x21   : > { %223 = vst [vmem:[%s194_s12 + $0x30] sm:$0xff] %v222_v10 }
  0x22   : > { %225 = vst [vmem:[%s194_s12 + $0x38] sm:$0xff] %v224_v11 }
  0x23 PF: > { %p520_p7 = scmp.ge.s32.totalorder %s609_s17, 1  ;;  %p230_p8 = scmp.lt.s32.totalorder %s609_s17, 5 }
  0x25   : > { %p231_p9 = pnand %p520_p7, %p230_p8 }
  0x26   : > { %s237_s13 = sand.u32 (!%p231_p9), 1, %s601_s15  }
  0x27   : > { %234 = sbr.rel (%p231_p9) target bundleno = 207 (0xcf), region = 74  ;;  %s698_s21 = sshll.u32 (!%p231_p9), %s237_s13, 5 }
  0x28   : > { %s239_s23 = scalar_lea.vmem (!%p231_p9), [#allocation2], %s698_s21  ;;  %s522_s29 = sshll.u32 (!%p231_p9), %s237_s13, 6 }
  0x29   : > { %s709_s30 = scalar_lea.vmem (!%p231_p9), [#allocation3], %s522_s29  ;;  %s715_s15 = scalar_lea.vmem (!%p231_p9), [#allocation4], %s698_s21 }
  0x2c   : > { %v282_v12 = vld [vmem:[%s749_s2] sm:$0xff]  ;;  %v611_v13 = vmov 0   ;;  %v558_v15 = vld [vmem:[%s239_s23 + $0xc] sm:$0xf0]  ;;  %v532_v18 = vld [vmem:[%s239_s23 + $0x10] sm:$0xf0] }
  0x2d   : > { %586 = vset.pattern.permute.xlu0 %v611_v13  ;;  %v530_v14 = vld [vmem:[%s239_s23] sm:$0xf]  ;;  %v556_v16 = vld [vmem:[%s239_s23 + $0x4] sm:$0xf]  ;;  %v538_v19 = vld [vmem:[%s239_s23 + $0x8] sm:$0xf] }
  0x2e   : > { %286 = vperm.xlu0 %586, %v282_v12   ;;  %v531_v17 = vor.u32 %v558_v15, %v530_v14  ;;  %v559_v20 = vld [vmem:[%s239_s23 + $0x14] sm:$0xf0]  ;;  %v535_v21 = vor.u32 %v556_v16, %v532_v18  ;;  %v557_v23 = vld [vmem:[%s239_s23 + $0xc] sm:$0xf]  ;;  %v540_v24 = vld [vmem:[%s239_s23 + $0x18] sm:$0xf0] }
  0x2f   : > { %v539_v22 = vor.u32 %v559_v20, %v538_v19  ;;  %v555_v25 = vld [vmem:[%s748_s1] sm:$0xff]  ;;  %v543_v26 = vor.u32 %v557_v23, %v540_v24  ;;  %vm319_vm0 = vcmask 130048   ;;  %v283_v27 = vld [vmem:[%s749_s2 + $0x8] sm:$0xff]  ;;  %v381_v40 = vld [vmem:[%s709_s30 + $0x10] sm:$0xff]  ;;  %s560_s5 = sshll.u32 (%p671_p5), %s510_s18, 4 }
  0x30   : > { %330 = vmatpush.bf16.msra.mxu0 %v531_v17  ;;  %344 = vmatpush.bf16.msra.mxu1 %v535_v21  ;;  %v379_v30 = vld [vmem:[%s709_s30] sm:$0xff]  ;;  %v380_v33 = vld [vmem:[%s709_s30 + $0x8] sm:$0xff]  ;;  %v382_v43 = vld [vmem:[%s709_s30 + $0x18] sm:$0xff]  ;;  %s412_s8 = scalar_lea.vmem (%p671_p5), %s751_s4, %s560_s5 }
  0x31   : > { %358 = vmatpush.bf16.msra.mxu2 %v539_v22  ;;  %372 = vmatpush.bf16.msra.mxu3 %v543_v26  ;;  %v383_v45 = vld [vmem:[%s709_s30 + $0x20] sm:$0xff]  ;;  %v384_v49 = vld [vmem:[%s709_s30 + $0x28] sm:$0xff]  ;;  %v385_v58 = vld [vmem:[%s709_s30 + $0x30] sm:$0xff] }
  0x32   : > { %v386_v61 = vld [vmem:[%s709_s30 + $0x38] sm:$0xff] }
  0x33   : > { %544 = vmatmul.msk.bf16.vlgmr.msra.gmra.mxu0 %vm319_vm0, %v555_v25  ;;  %545 = vmatmul.msk.bf16.vlgmr.msra.gmra.mxu1 %vm319_vm0, %v555_v25 }
  0x34   : > { %546 = vmatmul.msk.bf16.vlgmr.msra.gmra.mxu2 %vm319_vm0, %v555_v25  ;;  %547 = vmatmul.msk.bf16.vlgmr.msra.gmra.mxu3 %vm319_vm0, %v555_v25 }
  0x36   : > { %291 = vperm.xlu0 %586, %v283_v27  }
  0xa0   : > { %v287_v28 = vpop.permute.xlu0 %286 }
  0xa8   : > { %v292_v38 = vpop.permute.xlu0 %291 }
  0xb0   : > { %v332_v29 = vpop.f32.mrf.mxu0  ;;  %v346_v32 = vpop.f32.mrf.mxu1 }
  0xb1   : > { %v333_v31 = vadd.f32 %v332_v29, %v287_v28  ;;  %v347_v34 = vadd.f32 %v346_v32, %v287_v28 }
  0xb3   : > { %v387_v35 = vadd.f32 %v379_v30, %v333_v31  ;;  %v388_v36 = vadd.f32 %v380_v33, %v347_v34 }
  0xb5   : > { %v395_v37 = vpack.c.bf16 %v388_v36, %v387_v35 }
  0xb7   : > { %v360_v39 = vpop.f32.mrf.mxu2  ;;  %399 = vst [vmem:[%s715_s15] sm:$0xff] %v395_v37  ;;  %v374_v42 = vpop.f32.mrf.mxu3 }
  0xb8   : > { %v361_v41 = vadd.f32 %v360_v39, %v287_v28  ;;  %v334_v44 = vpop.f32.mrf.mxu0  ;;  %v375_v46 = vadd.f32 %v374_v42, %v287_v28  ;;  %v348_v48 = vpop.f32.mrf.mxu1 }
  0xb9   : > { %v335_v47 = vadd.f32 %v334_v44, %v292_v38  ;;  %v349_v51 = vadd.f32 %v348_v48, %v292_v38 }
  0xba   : > { %v389_v50 = vadd.f32 %v381_v40, %v361_v41  ;;  %v390_v52 = vadd.f32 %v382_v43, %v375_v46 }
  0xbb   : > { %v391_v53 = vadd.f32 %v383_v45, %v335_v47  ;;  %v392_v54 = vadd.f32 %v384_v49, %v349_v51 }
  0xbc   : > { %v396_v55 = vpack.c.bf16 %v390_v52, %v389_v50 }
  0xbd   : > { %v397_v56 = vpack.c.bf16 %v392_v54, %v391_v53 }
  0xbe   : > { %400 = vst [vmem:[%s715_s15 + $0x8] sm:$0xff] %v396_v55  ;;  %v425_v2 = vld [vmem:[%s715_s15] sm:$0xff] (%p671_p5) }
  0xbf   : > { %v362_v57 = vpop.f32.mrf.mxu2  ;;  %401 = vst [vmem:[%s715_s15 + $0x10] sm:$0xff] %v397_v56  ;;  %v376_v60 = vpop.f32.mrf.mxu3 }
  0xc0   : > { %v363_v59 = vadd.f32 %v362_v57, %v292_v38  ;;  %v377_v62 = vadd.f32 %v376_v60, %v292_v38  ;;  %426 = vst [vmem:[%s412_s8] sm:$0xff] (%p671_p5), %v425_v2 }
  0xc2   : > { %v393_v63 = vadd.f32 %v385_v58, %v363_v59  ;;  %v394_v0 = vadd.f32 %v386_v61, %v377_v62  ;;  %409 = sbr.rel (!%p671_p5) target bundleno = 207 (0xcf), region = 86 }
  0xc4   : > { %v398_v1 = vpack.c.bf16 %v394_v0, %v393_v63 }
  0xc5   : > { %v427_v3 = vld [vmem:[%s715_s15 + $0x8] sm:$0xff] (%p671_p5) }
  0xc6   : > { %402 = vst [vmem:[%s715_s15 + $0x18] sm:$0xff] %v398_v1  ;;  %v429_v4 = vld [vmem:[%s715_s15 + $0x10] sm:$0xff] (%p671_p5) }
  0xc7   : > { %428 = vst [vmem:[%s412_s8 + $0x8] sm:$0xff] %v427_v3 }
  0xc8   : > { %430 = vst [vmem:[%s412_s8 + $0x40] sm:$0xff] %v429_v4 }
  0xcd   : > { %v431_v5 = vld [vmem:[%s715_s15 + $0x18] sm:$0xff] }
  0xce   : > { %432 = vst [vmem:[%s412_s8 + $0x48] sm:$0xff] %v431_v5 }
  0xcf PF: > { %p11_p10 = scmp.ge.s32.totalorder %s654_s19, 6   ;;  %s754_s15 = smov %s605_s16 }
  0xd0   : > { %s755_s16 = smov %s665_s22  ;;  %s756_s17 = smov %s654_s19 }
  0xd1   :  { %13 = sbr.rel (!%p11_p10) target bundleno = 2 (0x2), region = 148 }

// kernel: forward.23
= control target key start
LH: loop header
LB: loop body
LE: loop exit
PB: predicated region body
PF: predicated region fallthrough
CT: control target
= control target key end

     0   :  { %s715_s18 = smov 0   ;;  %s717_s19 = smov 0   ;;  %s832_s0 = inlined_call_operand.vmem [shape: bf16[16,2048], index: 0, kind: input, shape index: {}]   ;;  %s833_s1 = inlined_call_operand.vmem [shape: bf16[16,16], index: 1, kind: input, shape index: {}]   ;;  %s834_s2 = inlined_call_operand.vmem [shape: f32[16,1], index: 2, kind: input, shape index: {}]   ;;  %s835_s3 = inlined_call_operand.vmem [shape: bf16[4,16], index: 3, kind: input, shape index: {}]   ;;  %s836_s4 = inlined_call_operand.vmem [shape: f32[4,1], index: 4, kind: input, shape index: {}]   ;;  %s837_s5 = inlined_call_operand.vmem [shape: f32[4,2048], index: 5, kind: output, shape index: {}]  }
   0x1   :  { %s719_s20 = smov 0  }
   0x2 LB: > { %s570_s21 = sadd.s32 4294967295, %s682_s20   ;;  %s732_s22 = sadd.s32 1, %s682_s20   ;;  %s682_s20 = sphi %s719_s20, %s840_s20   ;;  %s678_s19 = sphi %s717_s19, %s839_s19   ;;  %s674_s18 = sphi %s715_s18, %s838_s18  }
   0x3   : > { %s19_s23 = ssub.s32 %s682_s20, %s732_s22  ;;  %s22_s24 = sadd.s32 1, %s678_s19 }
   0x4   : > { %p20_p0 = scmp.eq.s32.totalorder %s19_s23, 0  ;;  %p29_p1 = scmp.ne.s32.totalorder %s678_s19, %s674_s18 }
   0x5   : > { %p30_p2 = scmp.eq.s32.totalorder %s682_s20, 0  ;;  %p573_p4 = scmp.ge.s32.totalorder %s682_s20, 4 }
   0x6   : > { %s741_s25 = scalar_select %p20_p0, %s678_s19, %s22_s24  }
   0x7   : > { %p31_p3 = por %p30_p2, %p29_p1  ;;  %177 = sbr.rel (%p573_p4) target bundleno = 20 (0x14), region = 32 }
   0xc   : > { %180 = sbr.rel (!%p31_p3) target bundleno = 20 (0x14), region = 36  ;;  %s182_s26 = sand.u32 (%p31_p3), 1, %s678_s19  }
   0xd   : > { %s611_s27 = sshll.u32 (%p31_p3), %s682_s20, 4  ;;  %s574_s28 = sshll.u32 (%p31_p3), %s182_s26, 5 }
   0xe   : > { %s187_s6 = scalar_lea.vmem (%p31_p3), %s832_s0, %s611_s27  ;;  %s184_s7 = scalar_lea.vmem (%p31_p3), [#allocation2], %s574_s28 }
   0xf   : > { %v200_v0 = vld [vmem:[%s187_s6] sm:$0xff] (%p31_p3)  ;;  %v202_v1 = vld [vmem:[%s187_s6 + $0x8] sm:$0xff] (%p31_p3) }
  0x10   : > { %v204_v2 = vld [vmem:[%s187_s6 + $0x40] sm:$0xff] (%p31_p3)  ;;  %201 = vst [vmem:[%s184_s7] sm:$0xff] (%p31_p3), %v200_v0  ;;  %v206_v3 = vld [vmem:[%s187_s6 + $0x48] sm:$0xff] (%p31_p3) }
  0x11   : > { %203 = vst [vmem:[%s184_s7 + $0x8] sm:$0xff] %v202_v1 }
  0x12   : > { %205 = vst [vmem:[%s184_s7 + $0x10] sm:$0xff] %v204_v2 }
  0x13   : > { %207 = vst [vmem:[%s184_s7 + $0x18] sm:$0xff] %v206_v3 }
  0x14 PF: > { %p577_p5 = scmp.ge.s32.totalorder %s682_s20, 1  ;;  %p212_p6 = scmp.lt.s32.totalorder %s682_s20, 5 }
  0x16   : > { %p213_p7 = pnand %p577_p5, %p212_p6 }
  0x17   : > { %s219_s8 = sand.u32 (!%p213_p7), 1, %s674_s18   ;;  %s579_s26 = sshll.u32 (!%p213_p7), %s570_s21, 2 }
  0x18   : > { %216 = sbr.rel (%p213_p7) target bundleno = 348 (0x15c), region = 59  ;;  %s578_s11 = sshll.u32 (!%p213_p7), %s219_s8, 5 }
  0x19   : > { %s221_s12 = scalar_lea.vmem (!%p213_p7), [#allocation2], %s578_s11  ;;  %p248_p8 = scmp.lt.s32.totalorder (!%p213_p7), %s579_s26, 15 }
  0x1d   : > { %v260_v4 = vld [vmem:[%s834_s2] sm:$0xff]  ;;  %v684_v5 = vmov 0   ;;  %v615_v7 = vld [vmem:[%s221_s12 + $0xc] sm:$0xf0]  ;;  %v589_v10 = vld [vmem:[%s221_s12 + $0x10] sm:$0xf0] }
  0x1e   : > { %642 = vset.pattern.permute.xlu0 %v684_v5  ;;  %643 = vset.pattern.permute.xlu1 %v684_v5  ;;  %v587_v6 = vld [vmem:[%s221_s12] sm:$0xf]  ;;  %v613_v8 = vld [vmem:[%s221_s12 + $0x4] sm:$0xf]  ;;  %v595_v11 = vld [vmem:[%s221_s12 + $0x8] sm:$0xf] }
  0x1f   : > { %264 = vperm.xlu0 %642, %v260_v4   ;;  %v588_v9 = vor.u32 %v615_v7, %v587_v6  ;;  %v616_v12 = vld [vmem:[%s221_s12 + $0x14] sm:$0xf0]  ;;  %v592_v13 = vor.u32 %v613_v8, %v589_v10  ;;  %v614_v15 = vld [vmem:[%s221_s12 + $0xc] sm:$0xf]  ;;  %v597_v16 = vld [vmem:[%s221_s12 + $0x18] sm:$0xf0] }
  0x20   : > { %v596_v14 = vor.u32 %v616_v12, %v595_v11  ;;  %v612_v17 = vld [vmem:[%s833_s1] sm:$0xff]  ;;  %v600_v18 = vor.u32 %v614_v15, %v597_v16  ;;  %vm297_vm0 = vcmask 130048   ;;  %v261_v19 = vld [vmem:[%s834_s2 + $0x8] sm:$0xff]  ;;  %s842_s26 = smov (!%p248_p8, %s579_s26), 15  ;;  %vm501_vm1 = vcmask 1043456  }
  0x21   : > { %308 = vmatpush.bf16.msra.mxu0 %v588_v9  ;;  %322 = vmatpush.bf16.msra.mxu1 %v592_v13  ;;  %v434_v56 = vld [vmem:[%s836_s4] sm:$0xf]  ;;  %s580_s27 = sshll.u32 %s842_s26, 2 }
  0x22   : > { %336 = vmatpush.bf16.msra.mxu2 %v596_v14  ;;  %350 = vmatpush.bf16.msra.mxu3 %v600_v18  ;;  %s251_s30 = scalar_lea.vmem %s837_s5, %s580_s27 }
  0x23   : > { %437 = vperm.xlu1 %643, %v434_v56  }
  0x24   : > { %601 = vmatmul.msk.bf16.vlgmr.msra.gmra.mxu0 %vm297_vm0, %v612_v17  ;;  %602 = vmatmul.msk.bf16.vlgmr.msra.gmra.mxu1 %vm297_vm0, %v612_v17 }
  0x25   : > { %603 = vmatmul.msk.bf16.vlgmr.msra.gmra.mxu2 %vm297_vm0, %v612_v17  ;;  %604 = vmatmul.msk.bf16.vlgmr.msra.gmra.mxu3 %vm297_vm0, %v612_v17 }
  0x27   : > { %269 = vperm.xlu0 %642, %v261_v19  }
  0x91   : > { %v265_v20 = vpop.permute.xlu0 %264 }
  0x99   : > { %v270_v30 = vpop.permute.xlu0 %269 }
  0xa1   : > { %v310_v21 = vpop.f32.mrf.mxu0  ;;  %v324_v23 = vpop.f32.mrf.mxu1 }
  0xa2   : > { %v765_v22 = vadd.f32 %v310_v21, %v265_v20  ;;  %v767_v24 = vadd.f32 %v324_v23, %v265_v20 }
  0xa4   : > { %v357_v25 = vmul.f32 %v765_v22, %v765_v22  ;;  %v358_v26 = vmul.f32 %v767_v24, %v767_v24 }
  0xa6   : > { %v365_v27 = vmul.f32 %v357_v25, %v765_v22  ;;  %v366_v28 = vmul.f32 %v358_v26, %v767_v24 }
  0xa8   : > { %v373_v29 = vmul.f32 0.044715, %v365_v27  ;;  %v338_v31 = vpop.f32.mrf.mxu2  ;;  %v374_v32 = vmul.f32 0.044715, %v366_v28  ;;  %v352_v34 = vpop.f32.mrf.mxu3 }
  0xa9   : > { %v775_v33 = vadd.f32 %v338_v31, %v265_v20  ;;  %v312_v35 = vpop.f32.mrf.mxu0  ;;  %v778_v37 = vadd.f32 %v352_v34, %v265_v20  ;;  %v326_v39 = vpop.f32.mrf.mxu1 }
  0xaa   : > { %v381_v36 = vadd.f32 %v373_v29, %v765_v22  ;;  %v780_v38 = vadd.f32 %v312_v35, %v270_v30  ;;  %v382_v40 = vadd.f32 %v374_v32, %v767_v24  ;;  %v785_v42 = vadd.f32 %v326_v39, %v270_v30 }
  0xab   : > { %v359_v41 = vmul.f32 %v775_v33, %v775_v33  ;;  %v360_v43 = vmul.f32 %v778_v37, %v778_v37 }
  0xac   : > { %v361_v44 = vmul.f32 %v780_v38, %v780_v38  ;;  %v389_v45 = vmul.f32 0.7978846, %v381_v36  ;;  %v362_v47 = vmul.f32 %v785_v42, %v785_v42  ;;  %v390_v48 = vmul.f32 0.7978846, %v382_v40 }
  0xad   : > { %v367_v46 = vmul.f32 %v359_v41, %v775_v33  ;;  %v368_v49 = vmul.f32 %v360_v43, %v778_v37 }
  0xae   : > { %v369_v50 = vmul.f32 %v361_v44, %v780_v38  ;;  %v370_v52 = vmul.f32 %v362_v47, %v785_v42  ;;  %644 = vtanh.f32 %v389_v45 }
  0xaf   : > { %v375_v51 = vmul.f32 0.044715, %v367_v46  ;;  %v376_v53 = vmul.f32 0.044715, %v368_v49  ;;  %646 = vtanh.f32 %v390_v48 }
  0xb0   : > { %v377_v54 = vmul.f32 0.044715, %v369_v50  ;;  %v340_v55 = vpop.f32.mrf.mxu2  ;;  %v378_v58 = vmul.f32 0.044715, %v370_v52  ;;  %v354_v60 = vpop.f32.mrf.mxu3 }
  0xb1   : > { %v383_v57 = vadd.f32 %v375_v51, %v775_v33  ;;  %v341_v59 = vadd.f32 %v340_v55, %v270_v30  ;;  %v384_v61 = vadd.f32 %v376_v53, %v778_v37  ;;  %v355_v63 = vadd.f32 %v354_v60, %v270_v30 }
  0xb2   : > { %v385_v62 = vadd.f32 %v377_v54, %v780_v38  ;;  %v386_v0 = vadd.f32 %v378_v58, %v785_v42 }
  0xb3   : > { %v363_v1 = vmul.f32 %v341_v59, %v341_v59  ;;  %v391_v2 = vmul.f32 0.7978846, %v383_v57  ;;  %v364_v3 = vmul.f32 %v355_v63, %v355_v63  ;;  %v392_v5 = vmul.f32 0.7978846, %v384_v61 }
  0xb4   : > { %v393_v4 = vmul.f32 0.7978846, %v385_v62  ;;  %v394_v7 = vmul.f32 0.7978846, %v386_v0  ;;  %v645_v8 = vpop.eup %644 }
  0xb5   : > { %v371_v6 = vmul.f32 %v363_v1, %v341_v59  ;;  %648 = vtanh.f32 %v391_v2  ;;  %v372_v9 = vmul.f32 %v364_v3, %v355_v63  ;;  %v647_v10 = vpop.eup %646  ;;  %v405_v14 = vadd.f32 1.0, %v645_v8 }
  0xb6   : > { %650 = vtanh.f32 %v393_v4  ;;  %v406_v16 = vadd.f32 1.0, %v647_v10 }
  0xb7   : > { %v379_v11 = vmul.f32 0.044715, %v371_v6  ;;  %652 = vtanh.f32 %v394_v7  ;;  %v380_v12 = vmul.f32 0.044715, %v372_v9  ;;  %v413_v25 = vmul.f32 0.5, %v405_v14 }
  0xb8   : > { %654 = vtanh.f32 %v392_v5  ;;  %v414_v28 = vmul.f32 0.5, %v406_v16 }
  0xb9   : > { %v387_v13 = vadd.f32 %v379_v11, %v341_v59  ;;  %v388_v15 = vadd.f32 %v380_v12, %v355_v63  ;;  %v421_v32 = vmul.f32 %v413_v25, %v765_v22  ;;  %v429_v22 = vld [vmem:[%s835_s3] sm:$0x3] }
  0xba   : > { %v422_v36 = vmul.f32 %v414_v28, %v767_v24 }
  0xbb   : > { %v649_v17 = vpop.eup %648  ;;  %v395_v18 = vmul.f32 0.7978846, %v387_v13  ;;  %v396_v20 = vmul.f32 0.7978846, %v388_v15 }
  0xbc   : > { %v651_v19 = vpop.eup %650  ;;  %v407_v31 = vadd.f32 1.0, %v649_v17 }
  0xbd   : > { %v653_v21 = vpop.eup %652  ;;  %v409_v23 = vadd.f32 1.0, %v651_v19  ;;  %656 = vtanh.f32 %v395_v18 }
  0xbe   : > { %v655_v26 = vpop.eup %654  ;;  %v410_v27 = vadd.f32 1.0, %v653_v21  ;;  %658 = vtanh.f32 %v396_v20  ;;  %v415_v46 = vmul.f32 0.5, %v407_v31 }
  0xbf   : > { %v417_v29 = vmul.f32 0.5, %v409_v23  ;;  %v408_v35 = vadd.f32 1.0, %v655_v26 }
  0xc0   : > { %v418_v30 = vmul.f32 0.5, %v410_v27  ;;  %v423_v24 = vmul.f32 %v415_v46, %v775_v33  ;;  %v438_v33 = vpop.permute.xlu1 %437 }
  0xc1   : > { %v425_v34 = vmul.f32 %v417_v29, %v780_v38  ;;  %v416_v48 = vmul.f32 0.5, %v408_v35 }
  0xc2   : > { %v426_v39 = vmul.f32 %v418_v30, %v785_v42 }
  0xc3   : > { %v657_v40 = vpop.eup %656  ;;  %v430_v41 = vpack.c.bf16 %v425_v34, %v421_v32  ;;  %v424_v50 = vmul.f32 %v416_v48, %v778_v37 }
  0xc4   : > { %v659_v43 = vpop.eup %658  ;;  %v431_v44 = vpack.c.bf16 %v426_v39, %v422_v36  ;;  %v411_v45 = vadd.f32 1.0, %v657_v40 }
  0xc5   : > { %450 = vmatpush.bf16.msrb.mxu0 %v430_v41  ;;  %v412_v47 = vadd.f32 1.0, %v659_v43 }
  0xc6   : > { %463 = vmatpush.bf16.msrb.mxu1 %v431_v44  ;;  %v419_v38 = vmul.f32 0.5, %v411_v45 }
  0xc7   : > { %v420_v49 = vmul.f32 0.5, %v412_v47 }
  0xc8   : > { %v427_v42 = vmul.f32 %v419_v38, %v341_v59  ;;  %605 = vmatmul.msk.bf16.vlgmr.msrb.gmra.mxu0 %vm297_vm0, %v429_v22 }
  0xc9   : > { %v428_v51 = vmul.f32 %v420_v49, %v355_v63  ;;  %606 = vmatmul.msk.bf16.vlgmr.msrb.gmra.mxu1 %vm297_vm0, %v429_v22 }
  0xca   : > { %v432_v52 = vpack.c.bf16 %v427_v42, %v423_v24 }
  0xcb   : > { %v433_v53 = vpack.c.bf16 %v428_v51, %v424_v50 }
  0xcc   : > { %476 = vmatpush.bf16.msrb.mxu2 %v432_v52 }
  0xcd   : > { %489 = vmatpush.bf16.msrb.mxu3 %v433_v53 }
  0xcf   : > { %607 = vmatmul.msk.bf16.vlgmr.msrb.gmra.mxu2 %vm297_vm0, %v429_v22 }
  0xd0   : > { %608 = vmatmul.msk.bf16.vlgmr.msrb.gmra.mxu3 %vm297_vm0, %v429_v22 }
 0x145   : > { %v452_v54 = vpop.f32.mrf.mxu0 }
 0x146   : > { %v465_v55 = vpop.f32.mrf.mxu1  ;;  %v453_v37 = vadd.f32 %v452_v54, %v438_v33 }
 0x147   : > { %v466_v56 = vadd.f32 %v465_v55, %v438_v33 }
 0x149   : > { %v499_v57 = vrot.slane %v466_v56, 4 }
 0x14b   : > { %v502_v58 = vsel %vm501_vm1, %v453_v37, %v499_v57 }
 0x14c   : > { %506 = vst [vmem:[%s251_s30] sm:$0xff] %v502_v58 }
 0x14d   : > { %v454_v59 = vpop.f32.mrf.mxu0 }
 0x14e   : > { %v467_v60 = vpop.f32.mrf.mxu1 }
 0x152   : > { %v478_v61 = vpop.f32.mrf.mxu2 }
 0x153   : > { %v491_v62 = vpop.f32.mrf.mxu3  ;;  %v479_v0 = vadd.f32 %v478_v61, %v438_v33 }
 0x154   : > { %v492_v63 = vadd.f32 %v491_v62, %v438_v33 }
 0x156   : > { %v500_v1 = vrot.slane %v492_v63, 4 }
 0x158   : > { %v503_v2 = vsel %vm501_vm1, %v479_v0, %v500_v1 }
 0x159   : > { %507 = vst [vmem:[%s251_s30 + $0x8] sm:$0xff] %v503_v2 }
 0x15a   : > { %v480_v3 = vpop.f32.mrf.mxu2 }
 0x15b   : > { %v493_v4 = vpop.f32.mrf.mxu3 }
 0x15c PF: > { %p12_p9 = scmp.ge.s32.totalorder %s732_s22, 6   ;;  %s838_s18 = smov %s678_s19 }
 0x15d   : > { %s839_s19 = smov %s741_s25  ;;  %s840_s20 = smov %s732_s22 }
 0x15e   :  { %14 = sbr.rel (!%p12_p9) target bundleno = 2 (0x2), region = 98 }

// kernel: forward.24
= control target key start
LH: loop header
LB: loop body
LE: loop exit
PB: predicated region body
PF: predicated region fallthrough
CT: control target
= control target key end

     0   :  { %s592_s18 = smov 0   ;;  %s594_s19 = smov 0   ;;  %s660_s0 = inlined_call_operand.vmem [shape: bf16[4,512], index: 0, kind: input, shape index: {}]   ;;  %s661_s1 = inlined_call_operand.vmem [shape: bf16[16,4], index: 1, kind: input, shape index: {}]   ;;  %s662_s2 = inlined_call_operand.vmem [shape: f32[16,1], index: 2, kind: input, shape index: {}, may-alias: {2,4}]   ;;  %s663_s3 = inlined_call_operand.vmem [shape: bf16[16,16], index: 3, kind: input, shape index: {}]   ;;  %s664_s4 = inlined_call_operand.vmem [shape: f32[16,1], index: 4, kind: input, shape index: {}, may-alias: {2,4}]   ;;  %s665_s5 = inlined_call_operand.vmem [shape: bf16[16,512], index: 5, kind: output, shape index: {}]  }
   0x1   :  { %s596_s20 = smov 0  }
   0x2 LB: > { %s605_s21 = sadd.s32 4294967295, %s559_s20   ;;  %s607_s22 = sadd.s32 1, %s559_s20   ;;  %s559_s20 = sphi %s596_s20, %s669_s20   ;;  %s555_s19 = sphi %s594_s19, %s668_s19   ;;  %s551_s18 = sphi %s592_s18, %s667_s18  }
   0x3   : > { %s129_s23 = ssub.s32 %s559_s20, %s607_s22  ;;  %s132_s24 = sadd.s32 1, %s555_s19 }
   0x4   : > { %p130_p0 = scmp.eq.s32.totalorder %s129_s23, 0  ;;  %p142_p1 = scmp.ne.s32.totalorder %s555_s19, %s551_s18 }
   0x5   : > { %p143_p2 = scmp.eq.s32.totalorder %s605_s21, 1  ;;  %p478_p3 = scmp.ge.s32.totalorder %s559_s20, 1 }
   0x6   : > { %s615_s25 = scalar_select %p130_p0, %s555_s19, %s132_s24  }
   0x7   : > { %p617_p4 = por %p143_p2, %p142_p1  ;;  %p188_p5 = scmp.lt.s32.totalorder %s559_s20, 3 }
   0x9   : > { %p189_p6 = pnand %p478_p3, %p188_p5 }
   0xa   : > { %s480_s27 = sshll.u32 (!%p189_p6), %s605_s21, 1  ;;  %s212_s23 = sand.u32 (!%p189_p6), 1, %s551_s18  }
   0xb   : > { %192 = sbr.rel (%p189_p6) target bundleno = 350 (0x15e), region = 40  ;;  %p216_p7 = scmp.lt.s32.totalorder (!%p189_p6), %s480_s27, 3 }
   0xc   : > { %s479_s24 = sshll.u32 (!%p189_p6), %s212_s23, 4 }
  0x10   : > { %v226_v0 = vld [vmem:[%s662_s2] sm:$0xff]  ;;  %v561_v1 = vmov 0   ;;  %s671_s27 = smov (!%p216_p7, %s480_s27), 3  ;;  %v227_v3 = vld [vmem:[%s662_s2 + $0x8] sm:$0xff]  ;;  %vm251_vm0 = vcmask 1041408   ;;  %vm247_vm1 = vcmask 31744  }
  0x11   : > { %527 = vset.pattern.permute.xlu0 %v561_v1  ;;  %528 = vset.pattern.permute.xlu1 %v561_v1  ;;  %s481_s30 = sshll.u32 %s671_s27, 1  ;;  %v499_v8 = vld [vmem:[%s661_s1] sm:$0xff]  ;;  %v325_v34 = vld [vmem:[%s664_s4 + $0x8] sm:$0xff]  ;;  %vm341_vm2 = vcmask 130048   ;;  %s214_s27 = scalar_lea.vmem [#allocation2], %s479_s24 }
  0x12   : > { %230 = vperm.xlu0 %527, %v226_v0   ;;  %s219_s8 = scalar_lea.vmem %s660_s0, %s481_s30  ;;  %v324_v23 = vld [vmem:[%s664_s4] sm:$0xff]  ;;  %s501_s18 = sshll.u32 (%p617_p4), %s605_s21, 3 }
  0x13   : > { %v225_v2 = vld [vmem:[%s219_s8] sm:$0xf]  ;;  %328 = vperm.xlu1 %528, %v324_v23   ;;  %s386_s30 = scalar_lea.vmem (%p617_p4), %s665_s5, %s501_s18 }
  0x14   : > { %244 = vst [vmem:[#allocation1] ss:$4 sm:$0xff] %v225_v2  ;;  %v500_v59 = vld [vmem:[%s663_s3] sm:$0xff] }
  0x1a   : > { %235 = vperm.xlu0 %527, %v227_v3  }
  0x1b   : > { %v245_v4 = vld.sshfl [vmem:[#allocation1] sm:$0xff pattern:$0x73625140]  ;;  %v246_v5 = vld.sshfl [vmem:[#allocation1 + $0x8] sm:$0xff pattern:$0x73625140]  ;;  %333 = vperm.xlu1 %528, %v325_v34  }
  0x1c   : > { %v252_v6 = vsel %vm251_vm0, %v245_v4, 0  ;;  %v254_v7 = vsel %vm251_vm0, %v246_v5, 0 }
  0x1d   : > { %263 = vmatpush.bf16.msra.mxu0 %v252_v6  ;;  %277 = vmatpush.bf16.msra.mxu1 %v254_v7 }
  0x20   : > { %486 = vmatmul.msk.bf16.vlgmr.msra.gmra.mxu0 %vm247_vm1, %v499_v8  ;;  %487 = vmatmul.msk.bf16.vlgmr.msra.gmra.mxu1 %vm247_vm1, %v499_v8 }
  0x84   : > { %v231_v9 = vpop.permute.xlu0 %230 }
  0x85   : > { %v329_v60 = vpop.permute.xlu1 %328 }
  0x8c   : > { %v236_v18 = vpop.permute.xlu0 %235 }
  0x8d   : > { %v334_v2 = vpop.permute.xlu1 %333 }
  0x9d   : > { %v265_v10 = vpop.f32.mrf.mxu0  ;;  %v279_v11 = vpop.f32.mrf.mxu1 }
  0x9e   : > { %v266_v12 = vadd.f32 %v265_v10, %v231_v9  ;;  %v280_v13 = vadd.f32 %v279_v11, %v231_v9 }
  0xa0   : > { %v284_v14 = vmul.f32 %v266_v12, %v266_v12  ;;  %v285_v15 = vmul.f32 %v280_v13, %v280_v13 }
  0xa2   : > { %v288_v16 = vmul.f32 %v284_v14, %v266_v12  ;;  %v289_v17 = vmul.f32 %v285_v15, %v280_v13 }
  0xa4   : > { %v292_v19 = vmul.f32 0.044715, %v288_v16  ;;  %v293_v20 = vmul.f32 0.044715, %v289_v17 }
  0xa5   : > { %v267_v21 = vpop.f32.mrf.mxu0  ;;  %v281_v22 = vpop.f32.mrf.mxu1 }
  0xa6   : > { %v268_v24 = vadd.f32 %v267_v21, %v236_v18  ;;  %v282_v25 = vadd.f32 %v281_v22, %v236_v18  ;;  %v296_v26 = vadd.f32 %v292_v19, %v266_v12  ;;  %v297_v27 = vadd.f32 %v293_v20, %v280_v13 }
  0xa8   : > { %v286_v28 = vmul.f32 %v268_v24, %v268_v24  ;;  %v287_v29 = vmul.f32 %v282_v25, %v282_v25  ;;  %v300_v30 = vmul.f32 0.7978846, %v296_v26  ;;  %v301_v31 = vmul.f32 0.7978846, %v297_v27 }
  0xaa   : > { %v290_v32 = vmul.f32 %v286_v28, %v268_v24  ;;  %v291_v33 = vmul.f32 %v287_v29, %v282_v25  ;;  %529 = vtanh.f32 %v300_v30 }
  0xab   : > { %531 = vtanh.f32 %v301_v31 }
  0xac   : > { %v294_v35 = vmul.f32 0.044715, %v290_v32  ;;  %v295_v36 = vmul.f32 0.044715, %v291_v33 }
  0xae   : > { %v298_v37 = vadd.f32 %v294_v35, %v268_v24  ;;  %v299_v38 = vadd.f32 %v295_v36, %v282_v25 }
  0xb0   : > { %v302_v39 = vmul.f32 0.7978846, %v298_v37  ;;  %v303_v40 = vmul.f32 0.7978846, %v299_v38  ;;  %v530_v41 = vpop.eup %529 }
  0xb1   : > { %v532_v42 = vpop.eup %531  ;;  %v308_v43 = vadd.f32 1.0, %v530_v41 }
  0xb2   : > { %533 = vtanh.f32 %v302_v39  ;;  %v309_v44 = vadd.f32 1.0, %v532_v42 }
  0xb3   : > { %535 = vtanh.f32 %v303_v40  ;;  %v312_v48 = vmul.f32 0.5, %v308_v43 }
  0xb4   : > { %v313_v50 = vmul.f32 0.5, %v309_v44 }
  0xb5   : > { %v316_v53 = vmul.f32 %v312_v48, %v266_v12 }
  0xb6   : > { %v317_v55 = vmul.f32 %v313_v50, %v280_v13 }
  0xb8   : > { %v534_v45 = vpop.eup %533 }
  0xb9   : > { %v536_v46 = vpop.eup %535  ;;  %v310_v47 = vadd.f32 1.0, %v534_v45 }
  0xba   : > { %v311_v49 = vadd.f32 1.0, %v536_v46 }
  0xbb   : > { %v314_v51 = vmul.f32 0.5, %v310_v47 }
  0xbc   : > { %v315_v52 = vmul.f32 0.5, %v311_v49 }
  0xbd   : > { %v318_v54 = vmul.f32 %v314_v51, %v268_v24 }
  0xbe   : > { %v319_v56 = vmul.f32 %v315_v52, %v282_v25 }
  0xbf   : > { %v322_v57 = vpack.c.bf16 %v318_v54, %v316_v53 }
  0xc0   : > { %v323_v58 = vpack.c.bf16 %v319_v56, %v317_v55 }
  0xc1   : > { %352 = vmatpush.bf16.msra.mxu2 %v322_v57 }
  0xc2   : > { %366 = vmatpush.bf16.msra.mxu3 %v323_v58 }
  0xc4   : > { %492 = vmatmul.msk.bf16.vlgmr.msra.gmra.mxu2 %vm341_vm2, %v500_v59 }
  0xc5   : > { %493 = vmatmul.msk.bf16.vlgmr.msra.gmra.mxu3 %vm341_vm2, %v500_v59 }
 0x147   : > { %v354_v61 = vpop.f32.mrf.mxu2 }
 0x148   : > { %v355_v62 = vadd.f32 %v354_v61, %v329_v60  ;;  %v368_v63 = vpop.f32.mrf.mxu3 }
 0x149   : > { %v369_v0 = vadd.f32 %v368_v63, %v329_v60 }
 0x14b   : > { %v373_v1 = vpack.c.bf16 %v369_v0, %v355_v62 }
 0x14d   : > { %375 = vst [vmem:[%s214_s27] sm:$0xff] %v373_v1 }
 0x14f   : > { %v356_v3 = vpop.f32.mrf.mxu2 }
 0x150   : > { %v357_v4 = vadd.f32 %v356_v3, %v334_v2  ;;  %v370_v5 = vpop.f32.mrf.mxu3 }
 0x151   : > { %v371_v6 = vadd.f32 %v370_v5, %v334_v2  ;;  %383 = sbr.rel (!%p617_p4) target bundleno = 350 (0x15e), region = 44 }
 0x153   : > { %v374_v7 = vpack.c.bf16 %v371_v6, %v357_v4 }
 0x154   : > { %v417_v8 = vld [vmem:[%s214_s27] sm:$0xff] (%p617_p4) }
 0x155   : > { %376 = vst [vmem:[%s214_s27 + $0x8] sm:$0xff] %v374_v7 }
 0x156   : > { %418 = vst [vmem:[%s386_s30] sm:$0xff] %v417_v8 }
 0x15c   : > { %v419_v9 = vld [vmem:[%s214_s27 + $0x8] sm:$0xff] }
 0x15d   : > { %420 = vst [vmem:[%s386_s30 + $0x10] sm:$0xff] %v419_v9 }
 0x15e PF: > { %p12_p8 = scmp.ge.s32.totalorder %s607_s22, 4   ;;  %s667_s18 = smov %s555_s19 }
 0x15f   : > { %s668_s19 = smov %s615_s25  ;;  %s669_s20 = smov %s607_s22 }
 0x160   :  { %14 = sbr.rel (!%p12_p8) target bundleno = 2 (0x2), region = 108 }

// kernel: forward.25
= control target key start
LH: loop header
LB: loop body
LE: loop exit
PB: predicated region body
PF: predicated region fallthrough
CT: control target
= control target key end

     0   :  { %s1422_s18 = smov 0   ;;  %s1685_s0 = inlined_call_operand.vmem [shape: bf16[40,2,16], index: 0, kind: input, shape index: {}]   ;;  %s1686_s1 = inlined_call_operand.vmem [shape: bf16[40,2,16], index: 1, kind: input, shape index: {}]   ;;  %s1687_s2 = inlined_call_operand.vmem [shape: bf16[40,16,16], index: 2, kind: input, shape index: {}]   ;;  %s1688_s3 = inlined_call_operand.vmem [shape: bf16[40,16,16], index: 3, kind: input, shape index: {}]   ;;  %s1689_s4 = inlined_call_operand.vmem [shape: f32[40,2,16], index: 4, kind: output, shape index: {0}]   ;;  %s1690_s5 = inlined_call_operand.vmem [shape: f32[40,2,16], index: 5, kind: output, shape index: {1}]  }
   0x1 LB: > { %s1221_s19 = sadd.s32 4294967295, %s1390_s18   ;;  %p1225_p0 = scmp.ge.s32.totalorder %s1390_s18, 1  ;;  %s1390_s18 = sphi %s1422_s18, %s16_s18  }
   0x2   : > { %p224_p1 = scmp.lt.s32.totalorder %s1390_s18, 5 }
   0x4   : > { %p225_p2 = pnand %p1225_p0, %p224_p1 }
   0x5   : > { %s272_s20 = smul.u32 (!%p225_p2), 10, %s1221_s19 }
   0x6   : > { %228 = sbr.rel (%p225_p2) target bundleno = 303 (0x12f), region = 36 }
   0x7   : > { %p273_p3 = scmp.lt.s32.totalorder (!%p225_p2), %s272_s20, 39 }
   0xb   : > { %s1692_s20 = smov (!%p273_p3, %s272_s20), 39  ;;  %vm375_vm0 = vcmask 130048   ;;  %vm820_vm1 = vcmask 123904  }
   0xc   : > { %s1354_s21 = sshll.u32 %s1692_s20, 3  ;;  %s1437_s24 = scalar_lea.vmem %s1685_s0, %s1692_s20 }
   0xd   : > { %s287_s27 = scalar_lea.vmem %s1687_s2, %s1354_s21  ;;  %s1451_s30 = scalar_lea.vmem %s1688_s3, %s1354_s21  ;;  %v1456_v4 = vld [vmem:[%s1437_s24] sm:$0x1]  ;;  %v1463_v6 = vld [vmem:[%s1437_s24 + $0x1] sm:$0x1]  ;;  %v1466_v7 = vld [vmem:[%s1437_s24 + $0x2] sm:$0x1] }
   0xe   : > { %v1442_v0 = vld [vmem:[%s287_s27] sm:$0xff]  ;;  %v1444_v1 = vld [vmem:[%s287_s27 + $0x8] sm:$0xff]  ;;  %v1446_v2 = vld [vmem:[%s287_s27 + $0x10] sm:$0xff]  ;;  %s1545_s8 = scalar_lea.vmem %s1686_s1, %s1692_s20  ;;  %s1230_s9 = sshll.u32 %s1692_s20, 1 }
   0xf   : > { %v1453_v3 = vld [vmem:[%s287_s27 + $0x18] sm:$0xff]  ;;  %v1458_v5 = vld [vmem:[%s287_s27 + $0x30] sm:$0xff]  ;;  %386 = vmatpush.bf16.msra.mxu0 %v1442_v0  ;;  %408 = vmatpush.bf16.msra.mxu1 %v1444_v1  ;;  %v1473_v9 = vld [vmem:[%s1437_s24 + $0x3] sm:$0x1]  ;;  %s1633_s12 = scalar_lea.vmem %s1689_s4, %s1230_s9  ;;  %s1660_s15 = scalar_lea.vmem %s1690_s5, %s1230_s9 }
  0x10   : > { %v1468_v8 = vld [vmem:[%s287_s27 + $0x38] sm:$0xff]  ;;  %430 = vmatpush.bf16.msra.mxu2 %v1446_v2  ;;  %452 = vmatpush.bf16.msra.mxu3 %v1453_v3  ;;  %v1475_v10 = vld [vmem:[%s287_s27 + $0x20] sm:$0xff]  ;;  %v1477_v11 = vld [vmem:[%s287_s27 + $0x28] sm:$0xff] }
  0x11   : > { %v1482_v12 = vld [vmem:[%s1451_s30] sm:$0xff]  ;;  %v1485_v13 = vld [vmem:[%s1451_s30 + $0x8] sm:$0xff]  ;;  %v1524_v22 = vld [vmem:[%s1451_s30 + $0x10] sm:$0xff] }
  0x12   : > { %1236 = vmatmul.msk.bf16.vlgmr.msra.gmra.mxu0 %vm375_vm0, %v1456_v4  ;;  %1241 = vmatmul.msk.bf16.vlgmr.msra.gmra.mxu1 %vm375_vm0, %v1463_v6  ;;  %v1491_v14 = vld [vmem:[%s287_s27 + $0x40] sm:$0xff]  ;;  %v1493_v15 = vld [vmem:[%s287_s27 + $0x48] sm:$0xff]  ;;  %v1527_v23 = vld [vmem:[%s1451_s30 + $0x18] sm:$0xff] }
  0x13   : > { %1246 = vmatmul.msk.bf16.vlgmr.msra.gmra.mxu2 %vm375_vm0, %v1466_v7  ;;  %1251 = vmatmul.msk.bf16.vlgmr.msra.gmra.mxu3 %vm375_vm0, %v1473_v9  ;;  %v1506_v16 = vld [vmem:[%s1437_s24 + $0x4] sm:$0x1]  ;;  %v1509_v17 = vld [vmem:[%s1437_s24 + $0x5] sm:$0x1]  ;;  %v1512_v18 = vld [vmem:[%s1437_s24 + $0x6] sm:$0x1] }
  0x14   : > { %518 = vmatpush.bf16.msrb.mxu2 %v1458_v5  ;;  %540 = vmatpush.bf16.msrb.mxu3 %v1468_v8  ;;  %v1515_v19 = vld [vmem:[%s1437_s24 + $0x7] sm:$0x1]  ;;  %v1521_v21 = vld [vmem:[%s1451_s30 + $0x28] sm:$0xff]  ;;  %v319_v26 = vld [vmem:[%s1545_s8] sm:$0x1] }
  0x15   : > { %474 = vmatpush.bf16.msrb.mxu0 %v1475_v10  ;;  %496 = vmatpush.bf16.msrb.mxu1 %v1477_v11  ;;  %v1518_v20 = vld [vmem:[%s1451_s30 + $0x20] sm:$0xff]  ;;  %v1548_v24 = vld [vmem:[%s1437_s24 + $0x8] sm:$0x1]  ;;  %v1551_v25 = vld [vmem:[%s1437_s24 + $0x9] sm:$0x1] }
  0x16   : > { %v320_v27 = vld [vmem:[%s1545_s8 + $0x1] sm:$0x1]  ;;  %v1375_v29 = vld [vmem:[%s1451_s30 + $0x48] sm:$0xff]  ;;  %v1372_v30 = vld [vmem:[%s1451_s30 + $0x30] sm:$0xff] }
  0x17   : > { %v1374_v28 = vld [vmem:[%s1451_s30 + $0x40] sm:$0xff]  ;;  %v1373_v31 = vld [vmem:[%s1451_s30 + $0x38] sm:$0xff]  ;;  %v327_v38 = vld [vmem:[%s1545_s8 + $0x8] sm:$0x1] }
  0x18   : > { %606 = vmatpush.bf16.msra.mxu2 %v1482_v12  ;;  %628 = vmatpush.bf16.msra.mxu3 %v1485_v13  ;;  %v321_v32 = vld [vmem:[%s1545_s8 + $0x2] sm:$0x1]  ;;  %v322_v33 = vld [vmem:[%s1545_s8 + $0x3] sm:$0x1]  ;;  %v323_v34 = vld [vmem:[%s1545_s8 + $0x4] sm:$0x1] }
  0x19   : > { %562 = vmatpush.bf16.msra.mxu0 %v1491_v14  ;;  %584 = vmatpush.bf16.msra.mxu1 %v1493_v15  ;;  %v324_v35 = vld [vmem:[%s1545_s8 + $0x5] sm:$0x1]  ;;  %v325_v36 = vld [vmem:[%s1545_s8 + $0x6] sm:$0x1]  ;;  %v326_v37 = vld [vmem:[%s1545_s8 + $0x7] sm:$0x1] }
  0x1a   : > { %v328_v39 = vld [vmem:[%s1545_s8 + $0x9] sm:$0x1] }
  0x22   : > { %1256 = vmatmul.msk.bf16.vlgmr.msrb.gmra.mxu0 %vm375_vm0, %v1506_v16  ;;  %1261 = vmatmul.msk.bf16.vlgmr.msrb.gmra.mxu1 %vm375_vm0, %v1509_v17 }
  0x23   : > { %1266 = vmatmul.msk.bf16.vlgmr.msrb.gmra.mxu2 %vm375_vm0, %v1512_v18  ;;  %1271 = vmatmul.msk.bf16.vlgmr.msrb.gmra.mxu3 %vm375_vm0, %v1515_v19 }
  0x24   : > { %694 = vmatpush.bf16.msrb.mxu2 %v1518_v20  ;;  %716 = vmatpush.bf16.msrb.mxu3 %v1521_v21 }
  0x25   : > { %650 = vmatpush.bf16.msrb.mxu0 %v1524_v22  ;;  %672 = vmatpush.bf16.msrb.mxu1 %v1527_v23 }
  0x32   : > { %1276 = vmatmul.msk.bf16.vlgmr.msra.gmra.mxu0 %vm375_vm0, %v1548_v24  ;;  %1281 = vmatmul.msk.bf16.vlgmr.msra.gmra.mxu1 %vm375_vm0, %v1551_v25 }
  0x33   : > { %1286 = vmatmul.msk.bf16.vlgmr.msra.gmra.mxu2 %vm375_vm0, %v319_v26  ;;  %1291 = vmatmul.msk.bf16.vlgmr.msra.gmra.mxu3 %vm375_vm0, %v320_v27 }
  0x34   : > { %782 = vmatpush.bf16.msra.mxu2 %v1374_v28  ;;  %804 = vmatpush.bf16.msra.mxu3 %v1375_v29 }
  0x35   : > { %738 = vmatpush.bf16.msra.mxu0 %v1372_v30  ;;  %760 = vmatpush.bf16.msra.mxu1 %v1373_v31 }
  0x42   : > { %1296 = vmatmul.msk.bf16.vlgmr.msrb.gmra.mxu0 %vm375_vm0, %v321_v32  ;;  %1301 = vmatmul.msk.bf16.vlgmr.msrb.gmra.mxu1 %vm375_vm0, %v322_v33 }
  0x43   : > { %1306 = vmatmul.msk.bf16.vlgmr.msrb.gmra.mxu2 %vm375_vm0, %v323_v34  ;;  %1311 = vmatmul.msk.bf16.vlgmr.msrb.gmra.mxu3 %vm375_vm0, %v324_v35 }
  0x44   : > { %864 = vmatpush.bf16.msrb.mxu2 %v1446_v2  ;;  %877 = vmatpush.bf16.msrb.mxu3 %v1453_v3 }
  0x45   : > { %838 = vmatpush.bf16.msrb.mxu0 %v1442_v0  ;;  %851 = vmatpush.bf16.msrb.mxu1 %v1444_v1 }
  0x52   : > { %1316 = vmatmul.msk.bf16.vlgmr.msra.gmra.mxu0 %vm375_vm0, %v325_v36  ;;  %1321 = vmatmul.msk.bf16.vlgmr.msra.gmra.mxu1 %vm375_vm0, %v326_v37 }
  0x53   : > { %1326 = vmatmul.msk.bf16.vlgmr.msra.gmra.mxu2 %vm375_vm0, %v327_v38  ;;  %1331 = vmatmul.msk.bf16.vlgmr.msra.gmra.mxu3 %vm375_vm0, %v328_v39 }
  0x54   : > { %916 = vmatpush.bf16.msra.mxu2 %v1458_v5  ;;  %929 = vmatpush.bf16.msra.mxu3 %v1468_v8 }
  0x55   : > { %890 = vmatpush.bf16.msra.mxu0 %v1475_v10  ;;  %903 = vmatpush.bf16.msra.mxu1 %v1477_v11 }
  0x62   : > { %1332 = vmatmul.msk.bf16.vlgmr.msrb.gmra.mxu0 %vm375_vm0, %v319_v26  ;;  %1333 = vmatmul.msk.bf16.vlgmr.msrb.gmra.mxu1 %vm375_vm0, %v320_v27 }
  0x63   : > { %1334 = vmatmul.msk.bf16.vlgmr.msrb.gmra.mxu2 %vm375_vm0, %v321_v32  ;;  %1335 = vmatmul.msk.bf16.vlgmr.msrb.gmra.mxu3 %vm375_vm0, %v322_v33 }
  0x64   : > { %968 = vmatpush.bf16.msrb.mxu2 %v1482_v12  ;;  %981 = vmatpush.bf16.msrb.mxu3 %v1485_v13 }
  0x65   : > { %942 = vmatpush.bf16.msrb.mxu0 %v1491_v14  ;;  %955 = vmatpush.bf16.msrb.mxu1 %v1493_v15 }
  0x72   : > { %1336 = vmatmul.msk.bf16.vlgmr.msra.gmra.mxu0 %vm375_vm0, %v323_v34  ;;  %1337 = vmatmul.msk.bf16.vlgmr.msra.gmra.mxu1 %vm375_vm0, %v324_v35 }
  0x73   : > { %1338 = vmatmul.msk.bf16.vlgmr.msra.gmra.mxu2 %vm375_vm0, %v325_v36  ;;  %1339 = vmatmul.msk.bf16.vlgmr.msra.gmra.mxu3 %vm375_vm0, %v326_v37 }
  0x74   : > { %1020 = vmatpush.bf16.msra.mxu2 %v1518_v20  ;;  %1033 = vmatpush.bf16.msra.mxu3 %v1521_v21 }
  0x75   : > { %994 = vmatpush.bf16.msra.mxu0 %v1524_v22  ;;  %1007 = vmatpush.bf16.msra.mxu1 %v1527_v23 }
  0x82   : > { %1340 = vmatmul.msk.bf16.vlgmr.msrb.gmra.mxu0 %vm375_vm0, %v327_v38  ;;  %1341 = vmatmul.msk.bf16.vlgmr.msrb.gmra.mxu1 %vm375_vm0, %v328_v39 }
  0x83   : > { %1342 = vmatmul.msk.bf16.vlgmr.msrb.gmra.mxu2 %vm375_vm0, %v1456_v4  ;;  %1343 = vmatmul.msk.bf16.vlgmr.msrb.gmra.mxu3 %vm375_vm0, %v1463_v6 }
  0x84   : > { %1072 = vmatpush.bf16.msrb.mxu2 %v1374_v28  ;;  %1085 = vmatpush.bf16.msrb.mxu3 %v1375_v29 }
  0x85   : > { %1046 = vmatpush.bf16.msrb.mxu0 %v1372_v30  ;;  %1059 = vmatpush.bf16.msrb.mxu1 %v1373_v31 }
  0x8f   : > { %v388_v40 = vpop.f32.mrf.mxu0  ;;  %v410_v41 = vpop.f32.mrf.mxu1 }
  0x92   : > { %1344 = vmatmul.msk.bf16.vlgmr.msra.gmra.mxu0 %vm375_vm0, %v1466_v7  ;;  %1345 = vmatmul.msk.bf16.vlgmr.msra.gmra.mxu1 %vm375_vm0, %v1473_v9 }
  0x93   : > { %1346 = vmatmul.msk.bf16.vlgmr.msra.gmra.mxu2 %vm375_vm0, %v1506_v16  ;;  %1347 = vmatmul.msk.bf16.vlgmr.msra.gmra.mxu3 %vm375_vm0, %v1509_v17 }
  0x96   : > { %v432_v42 = vpop.f32.mrf.mxu2  ;;  %v454_v43 = vpop.f32.mrf.mxu3 }
  0x97   : > { %v390_v44 = vpop.f32.mrf.mxu0  ;;  %v412_v45 = vpop.f32.mrf.mxu1 }
  0x9e   : > { %v434_v46 = vpop.f32.mrf.mxu2  ;;  %v456_v47 = vpop.f32.mrf.mxu3 }
  0x9f   : > { %v476_v48 = vpop.f32.mrf.mxu0  ;;  %v498_v49 = vpop.f32.mrf.mxu1 }
  0xa2   : > { %1348 = vmatmul.msk.bf16.vlgmr.msrb.gmra.mxu0 %vm375_vm0, %v1512_v18  ;;  %1349 = vmatmul.msk.bf16.vlgmr.msrb.gmra.mxu1 %vm375_vm0, %v1515_v19 }
  0xa3   : > { %1350 = vmatmul.msk.bf16.vlgmr.msrb.gmra.mxu2 %vm375_vm0, %v1548_v24  ;;  %1351 = vmatmul.msk.bf16.vlgmr.msrb.gmra.mxu3 %vm375_vm0, %v1551_v25 }
  0xa6   : > { %v520_v50 = vpop.f32.mrf.mxu2  ;;  %v542_v51 = vpop.f32.mrf.mxu3 }
  0xa7   : > { %v478_v52 = vpop.f32.mrf.mxu0  ;;  %v500_v53 = vpop.f32.mrf.mxu1 }
  0xae   : > { %v522_v54 = vpop.f32.mrf.mxu2  ;;  %v544_v55 = vpop.f32.mrf.mxu3 }
  0xaf   : > { %v564_v56 = vpop.f32.mrf.mxu0  ;;  %v586_v57 = vpop.f32.mrf.mxu1 }
  0xb6   : > { %v608_v58 = vpop.f32.mrf.mxu2  ;;  %v630_v59 = vpop.f32.mrf.mxu3 }
  0xb7   : > { %v810_v60 = vsub.f32 %v388_v40, %v608_v58  ;;  %v811_v61 = vsub.f32 %v410_v41, %v630_v59  ;;  %v566_v62 = vpop.f32.mrf.mxu0  ;;  %v588_v63 = vpop.f32.mrf.mxu1 }
  0xb9   : > { %821 = vst.msk [vmem:[%s1633_s12] sm:$0x3] %vm820_vm1, %v810_v60 }
  0xba   : > { %822 = vst.msk [vmem:[%s1633_s12 + $0x2] sm:$0x3] %vm820_vm1, %v811_v61 }
  0xbe   : > { %v610_v0 = vpop.f32.mrf.mxu2  ;;  %v632_v1 = vpop.f32.mrf.mxu3 }
  0xbf   : > { %v652_v2 = vpop.f32.mrf.mxu0  ;;  %v674_v3 = vpop.f32.mrf.mxu1 }
  0xc0   : > { %v812_v4 = vsub.f32 %v432_v42, %v652_v2  ;;  %v813_v5 = vsub.f32 %v454_v43, %v674_v3 }
  0xc2   : > { %823 = vst.msk [vmem:[%s1633_s12 + $0x4] sm:$0x3] %vm820_vm1, %v812_v4 }
  0xc3   : > { %824 = vst.msk [vmem:[%s1633_s12 + $0x6] sm:$0x3] %vm820_vm1, %v813_v5 }
  0xc6   : > { %v696_v6 = vpop.f32.mrf.mxu2  ;;  %v718_v7 = vpop.f32.mrf.mxu3 }
  0xc7   : > { %v814_v8 = vsub.f32 %v476_v48, %v696_v6  ;;  %v815_v9 = vsub.f32 %v498_v49, %v718_v7  ;;  %v654_v10 = vpop.f32.mrf.mxu0  ;;  %v676_v11 = vpop.f32.mrf.mxu1 }
  0xc9   : > { %825 = vst.msk [vmem:[%s1633_s12 + $0x8] sm:$0x3] %vm820_vm1, %v814_v8 }
  0xca   : > { %826 = vst.msk [vmem:[%s1633_s12 + $0xa] sm:$0x3] %vm820_vm1, %v815_v9 }
  0xce   : > { %v698_v12 = vpop.f32.mrf.mxu2  ;;  %v720_v13 = vpop.f32.mrf.mxu3 }
  0xcf   : > { %v740_v14 = vpop.f32.mrf.mxu0  ;;  %v762_v15 = vpop.f32.mrf.mxu1 }
  0xd0   : > { %v816_v16 = vsub.f32 %v520_v50, %v740_v14  ;;  %v817_v17 = vsub.f32 %v542_v51, %v762_v15 }
  0xd2   : > { %827 = vst.msk [vmem:[%s1633_s12 + $0xc] sm:$0x3] %vm820_vm1, %v816_v16 }
  0xd3   : > { %828 = vst.msk [vmem:[%s1633_s12 + $0xe] sm:$0x3] %vm820_vm1, %v817_v17 }
  0xd6   : > { %v784_v18 = vpop.f32.mrf.mxu2  ;;  %v806_v19 = vpop.f32.mrf.mxu3 }
  0xd7   : > { %v818_v20 = vsub.f32 %v564_v56, %v784_v18  ;;  %v819_v21 = vsub.f32 %v586_v57, %v806_v19  ;;  %v742_v22 = vpop.f32.mrf.mxu0  ;;  %v764_v23 = vpop.f32.mrf.mxu1 }
  0xd9   : > { %829 = vst.msk [vmem:[%s1633_s12 + $0x10] sm:$0x3] %vm820_vm1, %v818_v20 }
  0xda   : > { %830 = vst.msk [vmem:[%s1633_s12 + $0x12] sm:$0x3] %vm820_vm1, %v819_v21 }
  0xde   : > { %v786_v24 = vpop.f32.mrf.mxu2  ;;  %v808_v25 = vpop.f32.mrf.mxu3 }
  0xdf   : > { %v840_v26 = vpop.f32.mrf.mxu0  ;;  %v853_v27 = vpop.f32.mrf.mxu1 }
  0xe6   : > { %v866_v28 = vpop.f32.mrf.mxu2  ;;  %v879_v29 = vpop.f32.mrf.mxu3 }
  0xe7   : > { %v842_v30 = vpop.f32.mrf.mxu0  ;;  %v855_v31 = vpop.f32.mrf.mxu1 }
  0xee   : > { %v868_v32 = vpop.f32.mrf.mxu2  ;;  %v881_v33 = vpop.f32.mrf.mxu3 }
  0xef   : > { %v892_v34 = vpop.f32.mrf.mxu0  ;;  %v905_v35 = vpop.f32.mrf.mxu1 }
  0xf6   : > { %v918_v36 = vpop.f32.mrf.mxu2  ;;  %v931_v37 = vpop.f32.mrf.mxu3 }
  0xf7   : > { %v894_v38 = vpop.f32.mrf.mxu0  ;;  %v907_v39 = vpop.f32.mrf.mxu1 }
  0xfe   : > { %v920_v40 = vpop.f32.mrf.mxu2  ;;  %v933_v41 = vpop.f32.mrf.mxu3 }
  0xff   : > { %v944_v42 = vpop.f32.mrf.mxu0  ;;  %v957_v43 = vpop.f32.mrf.mxu1 }
 0x106   : > { %v970_v44 = vpop.f32.mrf.mxu2  ;;  %v983_v45 = vpop.f32.mrf.mxu3 }
 0x107   : > { %v971_v46 = vadd.f32 %v970_v44, %v840_v26  ;;  %v984_v47 = vadd.f32 %v983_v45, %v853_v27  ;;  %v946_v48 = vpop.f32.mrf.mxu0  ;;  %v959_v49 = vpop.f32.mrf.mxu1 }
 0x109   : > { %1091 = vst.msk [vmem:[%s1660_s15] sm:$0x3] %vm820_vm1, %v971_v46 }
 0x10a   : > { %1092 = vst.msk [vmem:[%s1660_s15 + $0x2] sm:$0x3] %vm820_vm1, %v984_v47 }
 0x10e   : > { %v972_v50 = vpop.f32.mrf.mxu2  ;;  %v985_v51 = vpop.f32.mrf.mxu3 }
 0x10f   : > { %v996_v52 = vpop.f32.mrf.mxu0  ;;  %v1009_v53 = vpop.f32.mrf.mxu1 }
 0x110   : > { %v997_v54 = vadd.f32 %v996_v52, %v866_v28  ;;  %v1010_v55 = vadd.f32 %v1009_v53, %v879_v29 }
 0x112   : > { %1093 = vst.msk [vmem:[%s1660_s15 + $0x4] sm:$0x3] %vm820_vm1, %v997_v54 }
 0x113   : > { %1094 = vst.msk [vmem:[%s1660_s15 + $0x6] sm:$0x3] %vm820_vm1, %v1010_v55 }
 0x116   : > { %v1022_v56 = vpop.f32.mrf.mxu2  ;;  %v1035_v57 = vpop.f32.mrf.mxu3 }
 0x117   : > { %v1023_v58 = vadd.f32 %v1022_v56, %v892_v34  ;;  %v1036_v59 = vadd.f32 %v1035_v57, %v905_v35  ;;  %v998_v60 = vpop.f32.mrf.mxu0  ;;  %v1011_v61 = vpop.f32.mrf.mxu1 }
 0x119   : > { %1095 = vst.msk [vmem:[%s1660_s15 + $0x8] sm:$0x3] %vm820_vm1, %v1023_v58 }
 0x11a   : > { %1096 = vst.msk [vmem:[%s1660_s15 + $0xa] sm:$0x3] %vm820_vm1, %v1036_v59 }
 0x11e   : > { %v1024_v62 = vpop.f32.mrf.mxu2  ;;  %v1037_v63 = vpop.f32.mrf.mxu3 }
 0x11f   : > { %v1048_v0 = vpop.f32.mrf.mxu0  ;;  %v1061_v1 = vpop.f32.mrf.mxu1 }
 0x120   : > { %v1049_v2 = vadd.f32 %v1048_v0, %v918_v36  ;;  %v1062_v3 = vadd.f32 %v1061_v1, %v931_v37 }
 0x122   : > { %1097 = vst.msk [vmem:[%s1660_s15 + $0xc] sm:$0x3] %vm820_vm1, %v1049_v2 }
 0x123   : > { %1098 = vst.msk [vmem:[%s1660_s15 + $0xe] sm:$0x3] %vm820_vm1, %v1062_v3 }
 0x126   : > { %v1074_v4 = vpop.f32.mrf.mxu2  ;;  %v1087_v5 = vpop.f32.mrf.mxu3 }
 0x127   : > { %v1075_v6 = vadd.f32 %v1074_v4, %v944_v42  ;;  %v1088_v7 = vadd.f32 %v1087_v5, %v957_v43  ;;  %v1050_v8 = vpop.f32.mrf.mxu0  ;;  %v1063_v9 = vpop.f32.mrf.mxu1 }
 0x129   : > { %1099 = vst.msk [vmem:[%s1660_s15 + $0x10] sm:$0x3] %vm820_vm1, %v1075_v6 }
 0x12a   : > { %1100 = vst.msk [vmem:[%s1660_s15 + $0x12] sm:$0x3] %vm820_vm1, %v1088_v7 }
 0x12e   : > { %v1076_v10 = vpop.f32.mrf.mxu2  ;;  %v1089_v11 = vpop.f32.mrf.mxu3 }
 0x12f PF: > { %s16_s18 = sadd.s32 1, %s1390_s18  }
 0x130   : > { %p13_p4 = scmp.ge.s32.totalorder %s16_s18, 6  }
 0x132   :  { %15 = sbr.rel (!%p13_p4) target bundleno = 1 (0x1), region = 87 }

// kernel: reverse.16
= control target key start
LH: loop header
LB: loop body
LE: loop exit
PB: predicated region body
PF: predicated region fallthrough
CT: control target
= control target key end

     0   :  { %s344_s0 = inlined_call_operand.vmem [shape: f32[16,2,16,7], index: 0, kind: input, shape index: {}]   ;;  %s345_s1 = inlined_call_operand.vmem [shape: f32[16,2,16,7], index: 1, kind: output, shape index: {}]  }
   0x1   :  { %v112_v0 = vld [vmem:[%s344_s0 + $0x60] sm:$0xff]  ;;  %v113_v1 = vld [vmem:[%s344_s0 + $0xd0] sm:$0xff]  ;;  %v138_v14 = vld [vmem:[%s344_s0 + $0x68] sm:$0xff] }
   0x2   :  { %v115_v2 = vld [vmem:[%s344_s0 + $0x50] sm:$0xff]  ;;  %4 = vst [vmem:[%s345_s1] sm:$0xff] %v112_v0  ;;  %v117_v3 = vld [vmem:[%s344_s0 + $0xc0] sm:$0xff]  ;;  %v140_v15 = vld [vmem:[%s344_s0 + $0xd8] sm:$0xff] }
   0x3   :  { %114 = vst [vmem:[%s345_s1 + $0x70] sm:$0xff] %v113_v1  ;;  %v119_v4 = vld [vmem:[%s344_s0 + $0x40] sm:$0xff]  ;;  %v121_v5 = vld [vmem:[%s344_s0 + $0xb0] sm:$0xff]  ;;  %v142_v16 = vld [vmem:[%s344_s0 + $0x58] sm:$0xff] }
   0x4   :  { %116 = vst [vmem:[%s345_s1 + $0x10] sm:$0xff] %v115_v2  ;;  %v123_v6 = vld [vmem:[%s344_s0 + $0x30] sm:$0xff]  ;;  %v125_v7 = vld [vmem:[%s344_s0 + $0xa0] sm:$0xff]  ;;  %v144_v17 = vld [vmem:[%s344_s0 + $0xc8] sm:$0xff] }
   0x5   :  { %118 = vst [vmem:[%s345_s1 + $0x80] sm:$0xff] %v117_v3  ;;  %v127_v8 = vld [vmem:[%s344_s0 + $0x20] sm:$0xff]  ;;  %v129_v9 = vld [vmem:[%s344_s0 + $0x90] sm:$0xff]  ;;  %v146_v18 = vld [vmem:[%s344_s0 + $0x48] sm:$0xff] }
   0x6   :  { %120 = vst [vmem:[%s345_s1 + $0x20] sm:$0xff] %v119_v4  ;;  %v131_v10 = vld [vmem:[%s344_s0 + $0x10] sm:$0xff]  ;;  %v133_v11 = vld [vmem:[%s344_s0 + $0x80] sm:$0xff]  ;;  %v148_v19 = vld [vmem:[%s344_s0 + $0xb8] sm:$0xff] }
   0x7   :  { %122 = vst [vmem:[%s345_s1 + $0x90] sm:$0xff] %v121_v5  ;;  %v49_v12 = vld [vmem:[%s344_s0] sm:$0xff]  ;;  %v136_v13 = vld [vmem:[%s344_s0 + $0x70] sm:$0xff]  ;;  %v150_v20 = vld [vmem:[%s344_s0 + $0x38] sm:$0xff] }
   0x8   :  { %124 = vst [vmem:[%s345_s1 + $0x30] sm:$0xff] %v123_v6  ;;  %v152_v21 = vld [vmem:[%s344_s0 + $0xa8] sm:$0xff]  ;;  %v156_v23 = vld [vmem:[%s344_s0 + $0x98] sm:$0xff] }
   0x9   :  { %126 = vst [vmem:[%s345_s1 + $0xa0] sm:$0xff] %v125_v7  ;;  %v154_v22 = vld [vmem:[%s344_s0 + $0x28] sm:$0xff]  ;;  %v158_v24 = vld [vmem:[%s344_s0 + $0x18] sm:$0xff] }
   0xa   :  { %128 = vst [vmem:[%s345_s1 + $0x40] sm:$0xff] %v127_v8  ;;  %v160_v25 = vld [vmem:[%s344_s0 + $0x88] sm:$0xff]  ;;  %v164_v27 = vld [vmem:[%s344_s0 + $0x78] sm:$0xff] }
   0xb   :  { %130 = vst [vmem:[%s345_s1 + $0xb0] sm:$0xff] %v129_v9  ;;  %v162_v26 = vld [vmem:[%s344_s0 + $0x8] sm:$0xff] }
   0xc   :  { %132 = vst [vmem:[%s345_s1 + $0x50] sm:$0xff] %v131_v10 }
   0xd   :  { %134 = vst [vmem:[%s345_s1 + $0xc0] sm:$0xff] %v133_v11 }
   0xe   :  { %135 = vst [vmem:[%s345_s1 + $0x60] sm:$0xff] %v49_v12 }
   0xf   :  { %137 = vst [vmem:[%s345_s1 + $0xd0] sm:$0xff] %v136_v13 }
  0x10   :  { %139 = vst [vmem:[%s345_s1 + $0x8] sm:$0xff] %v138_v14 }
  0x11   :  { %141 = vst [vmem:[%s345_s1 + $0x78] sm:$0xff] %v140_v15 }
  0x12   :  { %143 = vst [vmem:[%s345_s1 + $0x18] sm:$0xff] %v142_v16 }
  0x13   :  { %145 = vst [vmem:[%s345_s1 + $0x88] sm:$0xff] %v144_v17 }
  0x14   :  { %147 = vst [vmem:[%s345_s1 + $0x28] sm:$0xff] %v146_v18 }
  0x15   :  { %149 = vst [vmem:[%s345_s1 + $0x98] sm:$0xff] %v148_v19 }
  0x16   :  { %151 = vst [vmem:[%s345_s1 + $0x38] sm:$0xff] %v150_v20 }
  0x17   :  { %153 = vst [vmem:[%s345_s1 + $0xa8] sm:$0xff] %v152_v21 }
  0x18   :  { %155 = vst [vmem:[%s345_s1 + $0x48] sm:$0xff] %v154_v22 }
  0x19   :  { %157 = vst [vmem:[%s345_s1 + $0xb8] sm:$0xff] %v156_v23 }
  0x1a   :  { %159 = vst [vmem:[%s345_s1 + $0x58] sm:$0xff] %v158_v24 }
  0x1b   :  { %161 = vst [vmem:[%s345_s1 + $0xc8] sm:$0xff] %v160_v25 }
  0x1c   :  { %163 = vst [vmem:[%s345_s1 + $0x68] sm:$0xff] %v162_v26 }
  0x1d   :  { %165 = vst [vmem:[%s345_s1 + $0xd8] sm:$0xff] %v164_v27 }

// kernel: forward.26
= control target key start
LH: loop header
LB: loop body
LE: loop exit
PB: predicated region body
PF: predicated region fallthrough
CT: control target
= control target key end

     0   :  { %s637_s15 = smov 0   ;;  %s639_s16 = smov 0   ;;  %s723_s0 = inlined_call_operand.vmem [shape: bf16[16,512], index: 0, kind: input, shape index: {}]   ;;  %s724_s1 = inlined_call_operand.vmem [shape: bf16[16,16], index: 1, kind: input, shape index: {}]   ;;  %s725_s2 = inlined_call_operand.vmem [shape: f32[16,1], index: 2, kind: input, shape index: {}]   ;;  %s726_s3 = inlined_call_operand.vmem [shape: f32[16,512], index: 3, kind: input, shape index: {}]   ;;  %s727_s4 = inlined_call_operand.vmem [shape: bf16[16,512], index: 4, kind: output, shape index: {}]  }
   0x1   :  { %s641_s17 = smov 0  }
   0x2 LB: > { %s514_s18 = sadd.s32 4294967295, %s609_s17   ;;  %s654_s19 = sadd.s32 1, %s609_s17   ;;  %s609_s17 = sphi %s641_s17, %s732_s17   ;;  %s605_s16 = sphi %s639_s16, %s731_s16   ;;  %s601_s15 = sphi %s637_s15, %s730_s15  }
   0x3   : > { %s18_s20 = ssub.s32 %s609_s17, %s654_s19  ;;  %s21_s21 = sadd.s32 1, %s605_s16 }
   0x4   : > { %p19_p0 = scmp.eq.s32.totalorder %s18_s20, 0  ;;  %p28_p1 = scmp.ne.s32.totalorder %s605_s16, %s601_s15 }
   0x5   : > { %p29_p2 = scmp.eq.s32.totalorder %s609_s17, 0  ;;  %p126_p3 = scmp.eq.s32.totalorder %s514_s18, 1 }
   0x6   : > { %s665_s22 = scalar_select %p19_p0, %s605_s16, %s21_s21  }
   0x7   : > { %p667_p4 = por %p29_p2, %p28_p1  ;;  %p671_p5 = por %p126_p3, %p28_p1 }
   0x8   : > { %p517_p6 = scmp.ge.s32.totalorder %s609_s17, 2 }
   0xa   : > { %154 = sbr.rel (%p517_p6) target bundleno = 29 (0x1d), region = 24 }
   0xf   : > { %157 = sbr.rel (!%p667_p4) target bundleno = 21 (0x15), region = 28  ;;  %s159_s25 = sand.u32 (%p667_p4), 1, %s605_s16  }
  0x10   : > { %s547_s26 = sshll.u32 (%p667_p4), %s609_s17, 3  ;;  %s518_s27 = sshll.u32 (%p667_p4), %s159_s25, 4 }
  0x11   : > { %s164_s30 = scalar_lea.vmem (%p667_p4), %s723_s0, %s547_s26  ;;  %s161_s5 = scalar_lea.vmem (%p667_p4), [#allocation2], %s518_s27 }
  0x12   : > { %v195_v0 = vld [vmem:[%s164_s30] sm:$0xff] (%p667_p4)  ;;  %v197_v1 = vld [vmem:[%s164_s30 + $0x10] sm:$0xff] (%p667_p4) }
  0x13   : > { %196 = vst [vmem:[%s161_s5] sm:$0xff] (%p667_p4), %v195_v0 }
  0x14   : > { %198 = vst [vmem:[%s161_s5 + $0x8] sm:$0xff] %v197_v1 }
  0x15 PF: > { %204 = sbr.rel (!%p667_p4) target bundleno = 29 (0x1d), region = 66  ;;  %s206_s6 = sand.u32 (%p667_p4), 1, %s605_s16  }
  0x16   : > { %s548_s7 = sshll.u32 (%p667_p4), %s609_s17, 4  ;;  %s521_s8 = sshll.u32 (%p667_p4), %s206_s6, 5 }
  0x17   : > { %s211_s11 = scalar_lea.vmem (%p667_p4), %s726_s3, %s548_s7  ;;  %s208_s12 = scalar_lea.vmem (%p667_p4), [#allocation3], %s521_s8 }
  0x18   : > { %v224_v2 = vld [vmem:[%s211_s11] sm:$0xff] (%p667_p4)  ;;  %v226_v3 = vld [vmem:[%s211_s11 + $0x8] sm:$0xff] (%p667_p4) }
  0x19   : > { %v228_v4 = vld [vmem:[%s211_s11 + $0x20] sm:$0xff] (%p667_p4)  ;;  %225 = vst [vmem:[%s208_s12] sm:$0xff] (%p667_p4), %v224_v2  ;;  %v230_v5 = vld [vmem:[%s211_s11 + $0x28] sm:$0xff] (%p667_p4) }
  0x1a   : > { %227 = vst [vmem:[%s208_s12 + $0x8] sm:$0xff] %v226_v3 }
  0x1b   : > { %229 = vst [vmem:[%s208_s12 + $0x10] sm:$0xff] %v228_v4 }
  0x1c   : > { %231 = vst [vmem:[%s208_s12 + $0x18] sm:$0xff] %v230_v5 }
  0x1d PF: > { %p524_p7 = scmp.ge.s32.totalorder %s609_s17, 1  ;;  %p236_p8 = scmp.lt.s32.totalorder %s609_s17, 3 }
  0x1f   : > { %p237_p9 = pnand %p524_p7, %p236_p8 }
  0x20   : > { %s243_s13 = sand.u32 (!%p237_p9), 1, %s601_s15  }
  0x21   : > { %240 = sbr.rel (%p237_p9) target bundleno = 218 (0xda), region = 89  ;;  %s696_s21 = sshll.u32 (!%p237_p9), %s243_s13, 4 }
  0x22   : > { %s245_s23 = scalar_lea.vmem (!%p237_p9), [#allocation2], %s696_s21  ;;  %s526_s28 = sshll.u32 (!%p237_p9), %s243_s13, 5 }
  0x23   : > { %s252_s29 = scalar_lea.vmem (!%p237_p9), [#allocation3], %s526_s28  ;;  %s277_s30 = scalar_lea.vmem (!%p237_p9), [#allocation4], %s696_s21 }
  0x26   : > { %v286_v6 = vld [vmem:[%s725_s2] sm:$0xff]  ;;  %v611_v7 = vmov 0   ;;  %v551_v9 = vld [vmem:[%s245_s23 + $0x4] sm:$0xf0]  ;;  %v536_v12 = vld [vmem:[%s245_s23 + $0x8] sm:$0xf0] }
  0x27   : > { %578 = vset.pattern.permute.xlu0 %v611_v7  ;;  %v534_v8 = vld [vmem:[%s245_s23] sm:$0xf]  ;;  %v550_v10 = vld [vmem:[%s245_s23 + $0x4] sm:$0xf]  ;;  %vm313_vm0 = vcmask 130048   ;;  %v287_v15 = vld [vmem:[%s725_s2 + $0x8] sm:$0xff] }
  0x28   : > { %290 = vperm.xlu0 %578, %v286_v6   ;;  %v535_v11 = vor.u32 %v551_v9, %v534_v8  ;;  %v539_v13 = vor.u32 %v550_v10, %v536_v12  ;;  %v549_v14 = vld [vmem:[%s724_s1] sm:$0xff]  ;;  %v346_v21 = vld [vmem:[%s252_s29 + $0x8] sm:$0xff]  ;;  %v347_v31 = vld [vmem:[%s252_s29 + $0x10] sm:$0xff]  ;;  %s552_s5 = sshll.u32 (%p671_p5), %s514_s18, 3 }
  0x29   : > { %v345_v18 = vld [vmem:[%s252_s29] sm:$0xff]  ;;  %v348_v35 = vld [vmem:[%s252_s29 + $0x18] sm:$0xff]  ;;  %s402_s8 = scalar_lea.vmem (%p671_p5), %s727_s4, %s552_s5 }
  0x2a   : > { %324 = vmatpush.bf16.msra.mxu0 %v535_v11  ;;  %338 = vmatpush.bf16.msra.mxu1 %v539_v13 }
  0x2d   : > { %540 = vmatmul.msk.bf16.vlgmr.msra.gmra.mxu0 %vm313_vm0, %v549_v14  ;;  %541 = vmatmul.msk.bf16.vlgmr.msra.gmra.mxu1 %vm313_vm0, %v549_v14 }
  0x30   : > { %295 = vperm.xlu0 %578, %v287_v15  }
  0x9a   : > { %v291_v16 = vpop.permute.xlu0 %290 }
  0xa2   : > { %v296_v28 = vpop.permute.xlu0 %295 }
  0xaa   : > { %v326_v17 = vpop.f32.mrf.mxu0  ;;  %v340_v20 = vpop.f32.mrf.mxu1 }
  0xab   : > { %v327_v19 = vadd.f32 %v326_v17, %v291_v16  ;;  %v341_v22 = vadd.f32 %v340_v20, %v291_v16 }
  0xad   : > { %v349_v23 = vadd.f32 %v345_v18, %v327_v19  ;;  %v350_v24 = vadd.f32 %v346_v21, %v341_v22 }
  0xaf   : > { %v353_v25 = vmul.f32 %v349_v23, %v349_v23  ;;  %v354_v26 = vmul.f32 %v350_v24, %v350_v24 }
  0xb1   : > { %v357_v27 = vmul.f32 %v353_v25, %v349_v23  ;;  %v358_v29 = vmul.f32 %v354_v26, %v350_v24 }
  0xb2   : > { %v328_v30 = vpop.f32.mrf.mxu0  ;;  %v342_v34 = vpop.f32.mrf.mxu1 }
  0xb3   : > { %v361_v32 = vmul.f32 0.044715, %v357_v27  ;;  %v329_v33 = vadd.f32 %v328_v30, %v296_v28  ;;  %v362_v36 = vmul.f32 0.044715, %v358_v29  ;;  %v343_v37 = vadd.f32 %v342_v34, %v296_v28 }
  0xb5   : > { %v365_v38 = vadd.f32 %v361_v32, %v349_v23  ;;  %v351_v39 = vadd.f32 %v347_v31, %v329_v33  ;;  %v366_v40 = vadd.f32 %v362_v36, %v350_v24  ;;  %v352_v41 = vadd.f32 %v348_v35, %v343_v37 }
  0xb7   : > { %v369_v42 = vmul.f32 0.7978846, %v365_v38  ;;  %v355_v43 = vmul.f32 %v351_v39, %v351_v39  ;;  %v370_v44 = vmul.f32 0.7978846, %v366_v40  ;;  %v356_v45 = vmul.f32 %v352_v41, %v352_v41 }
  0xb9   : > { %579 = vtanh.f32 %v369_v42  ;;  %v359_v46 = vmul.f32 %v355_v43, %v351_v39  ;;  %v360_v47 = vmul.f32 %v356_v45, %v352_v41 }
  0xba   : > { %581 = vtanh.f32 %v370_v44 }
  0xbb   : > { %v363_v48 = vmul.f32 0.044715, %v359_v46  ;;  %v364_v49 = vmul.f32 0.044715, %v360_v47 }
  0xbd   : > { %v367_v50 = vadd.f32 %v363_v48, %v351_v39  ;;  %v368_v51 = vadd.f32 %v364_v49, %v352_v41 }
  0xbf   : > { %v580_v52 = vpop.eup %579  ;;  %v371_v53 = vmul.f32 0.7978846, %v367_v50  ;;  %v372_v56 = vmul.f32 0.7978846, %v368_v51 }
  0xc0   : > { %v582_v54 = vpop.eup %581  ;;  %v377_v55 = vadd.f32 1.0, %v580_v52 }
  0xc1   : > { %v378_v57 = vadd.f32 1.0, %v582_v54  ;;  %583 = vtanh.f32 %v371_v53 }
  0xc2   : > { %v381_v58 = vmul.f32 0.5, %v377_v55  ;;  %585 = vtanh.f32 %v372_v56 }
  0xc3   : > { %v382_v59 = vmul.f32 0.5, %v378_v57 }
  0xc4   : > { %v385_v60 = vmul.f32 %v381_v58, %v349_v23 }
  0xc5   : > { %v386_v61 = vmul.f32 %v382_v59, %v350_v24 }
  0xc7   : > { %v584_v62 = vpop.eup %583  ;;  %v389_v63 = vpack.c.bf16 %v386_v61, %v385_v60 }
  0xc8   : > { %v586_v0 = vpop.eup %585  ;;  %v379_v1 = vadd.f32 1.0, %v584_v62 }
  0xc9   : > { %391 = vst [vmem:[%s277_s30] sm:$0xff] %v389_v63  ;;  %v380_v2 = vadd.f32 1.0, %v586_v0 }
  0xca   : > { %v383_v3 = vmul.f32 0.5, %v379_v1 }
  0xcb   : > { %v384_v4 = vmul.f32 0.5, %v380_v2 }
  0xcc   : > { %v387_v5 = vmul.f32 %v383_v3, %v351_v39 }
  0xcd   : > { %v388_v6 = vmul.f32 %v384_v4, %v352_v41  ;;  %399 = sbr.rel (!%p671_p5) target bundleno = 218 (0xda), region = 101 }
  0xcf   : > { %v390_v7 = vpack.c.bf16 %v388_v6, %v387_v5 }
  0xd0   : > { %v433_v8 = vld [vmem:[%s277_s30] sm:$0xff] (%p671_p5) }
  0xd1   : > { %392 = vst [vmem:[%s277_s30 + $0x8] sm:$0xff] %v390_v7 }
  0xd2   : > { %434 = vst [vmem:[%s402_s8] sm:$0xff] %v433_v8 }
  0xd8   : > { %v435_v9 = vld [vmem:[%s277_s30 + $0x8] sm:$0xff] }
  0xd9   : > { %436 = vst [vmem:[%s402_s8 + $0x10] sm:$0xff] %v435_v9 }
  0xda PF: > { %p11_p10 = scmp.ge.s32.totalorder %s654_s19, 4   ;;  %s730_s15 = smov %s605_s16 }
  0xdb   : > { %s731_s16 = smov %s665_s22  ;;  %s732_s17 = smov %s654_s19 }
  0xdc   :  { %13 = sbr.rel (!%p11_p10) target bundleno = 2 (0x2), region = 178 }

// kernel: forward.28
= control target key start
LH: loop header
LB: loop body
LE: loop exit
PB: predicated region body
PF: predicated region fallthrough
CT: control target
= control target key end

     0   :  { %s593_s15 = smov 0   ;;  %s595_s16 = smov 0   ;;  %s679_s0 = inlined_call_operand.vmem [shape: bf16[16,512], index: 0, kind: input, shape index: {}]   ;;  %s680_s1 = inlined_call_operand.vmem [shape: bf16[16,16], index: 1, kind: input, shape index: {}]   ;;  %s681_s2 = inlined_call_operand.vmem [shape: f32[16,1], index: 2, kind: input, shape index: {}]   ;;  %s682_s3 = inlined_call_operand.vmem [shape: f32[16,512], index: 3, kind: input, shape index: {}]   ;;  %s683_s4 = inlined_call_operand.vmem [shape: bf16[16,512], index: 4, kind: output, shape index: {}]  }
   0x1   :  { %s597_s17 = smov 0  }
   0x2 LB: > { %s478_s18 = sadd.s32 4294967295, %s565_s17   ;;  %s610_s19 = sadd.s32 1, %s565_s17   ;;  %s565_s17 = sphi %s597_s17, %s688_s17   ;;  %s561_s16 = sphi %s595_s16, %s687_s16   ;;  %s557_s15 = sphi %s593_s15, %s686_s15  }
   0x3   : > { %s18_s20 = ssub.s32 %s565_s17, %s610_s19  ;;  %s21_s21 = sadd.s32 1, %s561_s16 }
   0x4   : > { %p19_p0 = scmp.eq.s32.totalorder %s18_s20, 0  ;;  %p28_p1 = scmp.ne.s32.totalorder %s561_s16, %s557_s15 }
   0x5   : > { %p29_p2 = scmp.eq.s32.totalorder %s565_s17, 0  ;;  %p126_p3 = scmp.eq.s32.totalorder %s478_s18, 1 }
   0x6   : > { %s621_s22 = scalar_select %p19_p0, %s561_s16, %s21_s21  }
   0x7   : > { %p623_p4 = por %p29_p2, %p28_p1  ;;  %p627_p5 = por %p126_p3, %p28_p1 }
   0x8   : > { %p481_p6 = scmp.ge.s32.totalorder %s565_s17, 2 }
   0xa   : > { %154 = sbr.rel (%p481_p6) target bundleno = 29 (0x1d), region = 24 }
   0xf   : > { %157 = sbr.rel (!%p623_p4) target bundleno = 21 (0x15), region = 28  ;;  %s159_s25 = sand.u32 (%p623_p4), 1, %s561_s16  }
  0x10   : > { %s511_s26 = sshll.u32 (%p623_p4), %s565_s17, 3  ;;  %s482_s27 = sshll.u32 (%p623_p4), %s159_s25, 4 }
  0x11   : > { %s164_s30 = scalar_lea.vmem (%p623_p4), %s679_s0, %s511_s26  ;;  %s161_s5 = scalar_lea.vmem (%p623_p4), [#allocation2], %s482_s27 }
  0x12   : > { %v195_v0 = vld [vmem:[%s164_s30] sm:$0xff] (%p623_p4)  ;;  %v197_v1 = vld [vmem:[%s164_s30 + $0x10] sm:$0xff] (%p623_p4) }
  0x13   : > { %196 = vst [vmem:[%s161_s5] sm:$0xff] (%p623_p4), %v195_v0 }
  0x14   : > { %198 = vst [vmem:[%s161_s5 + $0x8] sm:$0xff] %v197_v1 }
  0x15 PF: > { %204 = sbr.rel (!%p623_p4) target bundleno = 29 (0x1d), region = 66  ;;  %s206_s6 = sand.u32 (%p623_p4), 1, %s561_s16  }
  0x16   : > { %s512_s7 = sshll.u32 (%p623_p4), %s565_s17, 4  ;;  %s485_s8 = sshll.u32 (%p623_p4), %s206_s6, 5 }
  0x17   : > { %s211_s11 = scalar_lea.vmem (%p623_p4), %s682_s3, %s512_s7  ;;  %s208_s12 = scalar_lea.vmem (%p623_p4), [#allocation3], %s485_s8 }
  0x18   : > { %v224_v2 = vld [vmem:[%s211_s11] sm:$0xff] (%p623_p4)  ;;  %v226_v3 = vld [vmem:[%s211_s11 + $0x8] sm:$0xff] (%p623_p4) }
  0x19   : > { %v228_v4 = vld [vmem:[%s211_s11 + $0x20] sm:$0xff] (%p623_p4)  ;;  %225 = vst [vmem:[%s208_s12] sm:$0xff] (%p623_p4), %v224_v2  ;;  %v230_v5 = vld [vmem:[%s211_s11 + $0x28] sm:$0xff] (%p623_p4) }
  0x1a   : > { %227 = vst [vmem:[%s208_s12 + $0x8] sm:$0xff] %v226_v3 }
  0x1b   : > { %229 = vst [vmem:[%s208_s12 + $0x10] sm:$0xff] %v228_v4 }
  0x1c   : > { %231 = vst [vmem:[%s208_s12 + $0x18] sm:$0xff] %v230_v5 }
  0x1d PF: > { %p488_p7 = scmp.ge.s32.totalorder %s565_s17, 1  ;;  %p236_p8 = scmp.lt.s32.totalorder %s565_s17, 3 }
  0x1f   : > { %p237_p9 = pnand %p488_p7, %p236_p8 }
  0x20   : > { %s243_s13 = sand.u32 (!%p237_p9), 1, %s557_s15  }
  0x21   : > { %240 = sbr.rel (%p237_p9) target bundleno = 194 (0xc2), region = 89  ;;  %s652_s21 = sshll.u32 (!%p237_p9), %s243_s13, 4 }
  0x22   : > { %s245_s23 = scalar_lea.vmem (!%p237_p9), [#allocation2], %s652_s21  ;;  %s490_s28 = sshll.u32 (!%p237_p9), %s243_s13, 5 }
  0x23   : > { %s252_s29 = scalar_lea.vmem (!%p237_p9), [#allocation3], %s490_s28  ;;  %s277_s30 = scalar_lea.vmem (!%p237_p9), [#allocation4], %s652_s21 }
  0x26   : > { %v286_v6 = vld [vmem:[%s681_s2] sm:$0xff]  ;;  %v567_v7 = vmov 0   ;;  %v515_v9 = vld [vmem:[%s245_s23 + $0x4] sm:$0xf0]  ;;  %v500_v12 = vld [vmem:[%s245_s23 + $0x8] sm:$0xf0] }
  0x27   : > { %542 = vset.pattern.permute.xlu0 %v567_v7  ;;  %v498_v8 = vld [vmem:[%s245_s23] sm:$0xf]  ;;  %v514_v10 = vld [vmem:[%s245_s23 + $0x4] sm:$0xf]  ;;  %vm313_vm0 = vcmask 130048   ;;  %v287_v15 = vld [vmem:[%s681_s2 + $0x8] sm:$0xff] }
  0x28   : > { %290 = vperm.xlu0 %542, %v286_v6   ;;  %v499_v11 = vor.u32 %v515_v9, %v498_v8  ;;  %v503_v13 = vor.u32 %v514_v10, %v500_v12  ;;  %v513_v14 = vld [vmem:[%s680_s1] sm:$0xff]  ;;  %v346_v21 = vld [vmem:[%s252_s29 + $0x8] sm:$0xff]  ;;  %v347_v28 = vld [vmem:[%s252_s29 + $0x10] sm:$0xff]  ;;  %s516_s5 = sshll.u32 (%p627_p5), %s478_s18, 3 }
  0x29   : > { %v345_v18 = vld [vmem:[%s252_s29] sm:$0xff]  ;;  %v348_v31 = vld [vmem:[%s252_s29 + $0x18] sm:$0xff]  ;;  %s366_s8 = scalar_lea.vmem (%p627_p5), %s683_s4, %s516_s5 }
  0x2a   : > { %324 = vmatpush.bf16.msra.mxu0 %v499_v11  ;;  %338 = vmatpush.bf16.msra.mxu1 %v503_v13 }
  0x2d   : > { %504 = vmatmul.msk.bf16.vlgmr.msra.gmra.mxu0 %vm313_vm0, %v513_v14  ;;  %505 = vmatmul.msk.bf16.vlgmr.msra.gmra.mxu1 %vm313_vm0, %v513_v14 }
  0x30   : > { %295 = vperm.xlu0 %542, %v287_v15  }
  0x9a   : > { %v291_v16 = vpop.permute.xlu0 %290 }
  0xa2   : > { %v296_v26 = vpop.permute.xlu0 %295 }
  0xaa   : > { %v326_v17 = vpop.f32.mrf.mxu0  ;;  %v340_v20 = vpop.f32.mrf.mxu1 }
  0xab   : > { %v327_v19 = vadd.f32 %v326_v17, %v291_v16  ;;  %v341_v22 = vadd.f32 %v340_v20, %v291_v16 }
  0xad   : > { %v349_v23 = vadd.f32 %v345_v18, %v327_v19  ;;  %v350_v24 = vadd.f32 %v346_v21, %v341_v22 }
  0xaf   : > { %v353_v25 = vpack.c.bf16 %v350_v24, %v349_v23 }
  0xb1   : > { %355 = vst [vmem:[%s277_s30] sm:$0xff] %v353_v25 }
  0xb2   : > { %v328_v27 = vpop.f32.mrf.mxu0  ;;  %v342_v30 = vpop.f32.mrf.mxu1 }
  0xb3   : > { %v329_v29 = vadd.f32 %v328_v27, %v296_v26  ;;  %v343_v32 = vadd.f32 %v342_v30, %v296_v26 }
  0xb5   : > { %v351_v33 = vadd.f32 %v347_v28, %v329_v29  ;;  %v352_v34 = vadd.f32 %v348_v31, %v343_v32  ;;  %363 = sbr.rel (!%p627_p5) target bundleno = 194 (0xc2), region = 101 }
  0xb7   : > { %v354_v35 = vpack.c.bf16 %v352_v34, %v351_v33 }
  0xb8   : > { %v397_v36 = vld [vmem:[%s277_s30] sm:$0xff] (%p627_p5) }
  0xb9   : > { %356 = vst [vmem:[%s277_s30 + $0x8] sm:$0xff] %v354_v35 }
  0xba   : > { %398 = vst [vmem:[%s366_s8] sm:$0xff] %v397_v36 }
  0xc0   : > { %v399_v37 = vld [vmem:[%s277_s30 + $0x8] sm:$0xff] }
  0xc1   : > { %400 = vst [vmem:[%s366_s8 + $0x10] sm:$0xff] %v399_v37 }
  0xc2 PF: > { %p11_p10 = scmp.ge.s32.totalorder %s610_s19, 4   ;;  %s686_s15 = smov %s561_s16 }
  0xc3   : > { %s687_s16 = smov %s621_s22  ;;  %s688_s17 = smov %s610_s19 }
  0xc4   :  { %13 = sbr.rel (!%p11_p10) target bundleno = 2 (0x2), region = 178 }

// kernel: forward.29
= control target key start
LH: loop header
LB: loop body
LE: loop exit
PB: predicated region body
PF: predicated region fallthrough
CT: control target
= control target key end

     0   :  { %s597_s18 = smov 0   ;;  %s599_s19 = smov 0   ;;  %s668_s0 = inlined_call_operand.vmem [shape: bf16[16,512], index: 0, kind: input, shape index: {}]   ;;  %s669_s1 = inlined_call_operand.vmem [shape: bf16[16,16], index: 1, kind: input, shape index: {}]   ;;  %s670_s2 = inlined_call_operand.vmem [shape: f32[16,1], index: 2, kind: input, shape index: {}]   ;;  %s671_s3 = inlined_call_operand.vmem [shape: bf16[4,16], index: 3, kind: input, shape index: {}]   ;;  %s672_s4 = inlined_call_operand.vmem [shape: f32[4,1], index: 4, kind: input, shape index: {}]   ;;  %s673_s5 = inlined_call_operand.vmem [shape: f32[4,512], index: 5, kind: output, shape index: {}]  }
   0x1   :  { %s601_s20 = smov 0  }
   0x2 LB: > { %s474_s21 = sadd.s32 4294967295, %s564_s20   ;;  %s614_s22 = sadd.s32 1, %s564_s20   ;;  %s564_s20 = sphi %s601_s20, %s676_s20   ;;  %s560_s19 = sphi %s599_s19, %s675_s19   ;;  %s556_s18 = sphi %s597_s18, %s674_s18  }
   0x3   : > { %s19_s23 = ssub.s32 %s564_s20, %s614_s22  ;;  %s22_s24 = sadd.s32 1, %s560_s19 }
   0x4   : > { %p20_p0 = scmp.eq.s32.totalorder %s19_s23, 0  ;;  %p29_p1 = scmp.ne.s32.totalorder %s560_s19, %s556_s18 }
   0x5   : > { %p30_p2 = scmp.eq.s32.totalorder %s564_s20, 0  ;;  %p477_p4 = scmp.ge.s32.totalorder %s564_s20, 2 }
   0x6   : > { %s623_s25 = scalar_select %p20_p0, %s560_s19, %s22_s24  }
   0x7   : > { %p31_p3 = por %p30_p2, %p29_p1  ;;  %177 = sbr.rel (%p477_p4) target bundleno = 18 (0x12), region = 32 }
   0xc   : > { %180 = sbr.rel (!%p31_p3) target bundleno = 18 (0x12), region = 36  ;;  %s182_s26 = sand.u32 (%p31_p3), 1, %s560_s19  }
   0xd   : > { %s503_s27 = sshll.u32 (%p31_p3), %s564_s20, 3  ;;  %s478_s28 = sshll.u32 (%p31_p3), %s182_s26, 4 }
   0xe   : > { %s187_s6 = scalar_lea.vmem (%p31_p3), %s668_s0, %s503_s27  ;;  %s184_s7 = scalar_lea.vmem (%p31_p3), [#allocation2], %s478_s28 }
   0xf   : > { %v218_v0 = vld [vmem:[%s187_s6] sm:$0xff] (%p31_p3)  ;;  %v220_v1 = vld [vmem:[%s187_s6 + $0x10] sm:$0xff] (%p31_p3) }
  0x10   : > { %219 = vst [vmem:[%s184_s7] sm:$0xff] (%p31_p3), %v218_v0 }
  0x11   : > { %221 = vst [vmem:[%s184_s7 + $0x8] sm:$0xff] %v220_v1 }
  0x12 PF: > { %p481_p5 = scmp.ge.s32.totalorder %s564_s20, 1  ;;  %p226_p6 = scmp.lt.s32.totalorder %s564_s20, 3 }
  0x14   : > { %p227_p7 = pnand %p481_p5, %p226_p6 }
  0x15   : > { %s233_s8 = sand.u32 (!%p227_p7), 1, %s556_s18   ;;  %s483_s26 = sshll.u32 (!%p227_p7), %s474_s21, 1 }
  0x16   : > { %230 = sbr.rel (%p227_p7) target bundleno = 339 (0x153), region = 74  ;;  %s482_s11 = sshll.u32 (!%p227_p7), %s233_s8, 4 }
  0x17   : > { %s235_s12 = scalar_lea.vmem (!%p227_p7), [#allocation2], %s482_s11  ;;  %p262_p8 = scmp.lt.s32.totalorder (!%p227_p7), %s483_s26, 3 }
  0x1b   : > { %v272_v2 = vld [vmem:[%s670_s2] sm:$0xff]  ;;  %v566_v3 = vmov 0   ;;  %v506_v5 = vld [vmem:[%s235_s12 + $0x4] sm:$0xf0]  ;;  %v493_v8 = vld [vmem:[%s235_s12 + $0x8] sm:$0xf0] }
  0x1c   : > { %532 = vset.pattern.permute.xlu0 %v566_v3  ;;  %533 = vset.pattern.permute.xlu1 %v566_v3  ;;  %v491_v4 = vld [vmem:[%s235_s12] sm:$0xf]  ;;  %v505_v6 = vld [vmem:[%s235_s12 + $0x4] sm:$0xf]  ;;  %vm299_vm0 = vcmask 130048   ;;  %v273_v11 = vld [vmem:[%s670_s2 + $0x8] sm:$0xff] }
  0x1d   : > { %276 = vperm.xlu0 %532, %v272_v2   ;;  %v492_v7 = vor.u32 %v506_v5, %v491_v4  ;;  %v496_v9 = vor.u32 %v505_v6, %v493_v8  ;;  %v504_v10 = vld [vmem:[%s669_s1] sm:$0xff]  ;;  %s678_s26 = smov (!%p262_p8, %s483_s26), 3  ;;  %vm408_vm1 = vcmask 1043456  }
  0x1e   : > { %v370_v25 = vld [vmem:[%s672_s4] sm:$0xf]  ;;  %s484_s27 = sshll.u32 %s678_s26, 2 }
  0x1f   : > { %310 = vmatpush.bf16.msra.mxu0 %v492_v7  ;;  %324 = vmatpush.bf16.msra.mxu1 %v496_v9  ;;  %v367_v61 = vld [vmem:[%s671_s3] sm:$0x3]  ;;  %s265_s30 = scalar_lea.vmem %s673_s5, %s484_s27 }
  0x20   : > { %373 = vperm.xlu1 %533, %v370_v25  }
  0x22   : > { %497 = vmatmul.msk.bf16.vlgmr.msra.gmra.mxu0 %vm299_vm0, %v504_v10  ;;  %498 = vmatmul.msk.bf16.vlgmr.msra.gmra.mxu1 %vm299_vm0, %v504_v10 }
  0x25   : > { %281 = vperm.xlu0 %532, %v273_v11  }
  0x8f   : > { %v277_v12 = vpop.permute.xlu0 %276 }
  0x92   : > { %v374_v62 = vpop.permute.xlu1 %373 }
  0x97   : > { %v282_v22 = vpop.permute.xlu0 %281 }
  0x9f   : > { %v312_v13 = vpop.f32.mrf.mxu0  ;;  %v326_v15 = vpop.f32.mrf.mxu1 }
  0xa0   : > { %v313_v14 = vadd.f32 %v312_v13, %v277_v12  ;;  %v327_v16 = vadd.f32 %v326_v15, %v277_v12 }
  0xa2   : > { %v331_v17 = vmul.f32 %v313_v14, %v313_v14  ;;  %v332_v18 = vmul.f32 %v327_v16, %v327_v16 }
  0xa4   : > { %v335_v19 = vmul.f32 %v331_v17, %v313_v14  ;;  %v336_v20 = vmul.f32 %v332_v18, %v327_v16 }
  0xa6   : > { %v339_v21 = vmul.f32 0.044715, %v335_v19  ;;  %v340_v23 = vmul.f32 0.044715, %v336_v20 }
  0xa7   : > { %v314_v24 = vpop.f32.mrf.mxu0  ;;  %v328_v27 = vpop.f32.mrf.mxu1 }
  0xa8   : > { %v315_v26 = vadd.f32 %v314_v24, %v282_v22  ;;  %v343_v28 = vadd.f32 %v339_v21, %v313_v14  ;;  %v329_v29 = vadd.f32 %v328_v27, %v282_v22  ;;  %v344_v30 = vadd.f32 %v340_v23, %v327_v16 }
  0xaa   : > { %v333_v31 = vmul.f32 %v315_v26, %v315_v26  ;;  %v347_v32 = vmul.f32 0.7978846, %v343_v28  ;;  %v334_v33 = vmul.f32 %v329_v29, %v329_v29  ;;  %v348_v34 = vmul.f32 0.7978846, %v344_v30 }
  0xac   : > { %v337_v35 = vmul.f32 %v333_v31, %v315_v26  ;;  %v338_v36 = vmul.f32 %v334_v33, %v329_v29  ;;  %534 = vtanh.f32 %v347_v32 }
  0xad   : > { %536 = vtanh.f32 %v348_v34 }
  0xae   : > { %v341_v37 = vmul.f32 0.044715, %v337_v35  ;;  %v342_v38 = vmul.f32 0.044715, %v338_v36 }
  0xb0   : > { %v345_v39 = vadd.f32 %v341_v37, %v315_v26  ;;  %v346_v40 = vadd.f32 %v342_v38, %v329_v29 }
  0xb2   : > { %v349_v41 = vmul.f32 0.7978846, %v345_v39  ;;  %v350_v42 = vmul.f32 0.7978846, %v346_v40  ;;  %v535_v43 = vpop.eup %534 }
  0xb3   : > { %v537_v44 = vpop.eup %536  ;;  %v355_v45 = vadd.f32 1.0, %v535_v43 }
  0xb4   : > { %538 = vtanh.f32 %v349_v41  ;;  %v356_v46 = vadd.f32 1.0, %v537_v44 }
  0xb5   : > { %540 = vtanh.f32 %v350_v42  ;;  %v359_v50 = vmul.f32 0.5, %v355_v45 }
  0xb6   : > { %v360_v52 = vmul.f32 0.5, %v356_v46 }
  0xb7   : > { %v363_v55 = vmul.f32 %v359_v50, %v313_v14 }
  0xb8   : > { %v364_v57 = vmul.f32 %v360_v52, %v327_v16 }
  0xba   : > { %v539_v47 = vpop.eup %538 }
  0xbb   : > { %v541_v48 = vpop.eup %540  ;;  %v357_v49 = vadd.f32 1.0, %v539_v47 }
  0xbc   : > { %v358_v51 = vadd.f32 1.0, %v541_v48 }
  0xbd   : > { %v361_v53 = vmul.f32 0.5, %v357_v49 }
  0xbe   : > { %v362_v54 = vmul.f32 0.5, %v358_v51 }
  0xbf   : > { %v365_v56 = vmul.f32 %v361_v53, %v315_v26 }
  0xc0   : > { %v366_v58 = vmul.f32 %v362_v54, %v329_v29 }
  0xc1   : > { %v368_v59 = vpack.c.bf16 %v365_v56, %v363_v55 }
  0xc2   : > { %v369_v60 = vpack.c.bf16 %v366_v58, %v364_v57 }
  0xc3   : > { %386 = vmatpush.bf16.msra.mxu2 %v368_v59 }
  0xc4   : > { %399 = vmatpush.bf16.msra.mxu3 %v369_v60 }
  0xc6   : > { %499 = vmatmul.msk.bf16.vlgmr.msra.gmra.mxu2 %vm299_vm0, %v367_v61 }
  0xc7   : > { %500 = vmatmul.msk.bf16.vlgmr.msra.gmra.mxu3 %vm299_vm0, %v367_v61 }
 0x149   : > { %v388_v63 = vpop.f32.mrf.mxu2 }
 0x14a   : > { %v401_v0 = vpop.f32.mrf.mxu3  ;;  %v389_v2 = vadd.f32 %v388_v63, %v374_v62 }
 0x14b   : > { %v402_v1 = vadd.f32 %v401_v0, %v374_v62 }
 0x14d   : > { %v407_v3 = vrot.slane %v402_v1, 4 }
 0x14f   : > { %v409_v4 = vsel %vm408_vm1, %v389_v2, %v407_v3 }
 0x150   : > { %411 = vst [vmem:[%s265_s30] sm:$0xff] %v409_v4 }
 0x151   : > { %v390_v5 = vpop.f32.mrf.mxu2 }
 0x152   : > { %v403_v6 = vpop.f32.mrf.mxu3 }
 0x153 PF: > { %p12_p9 = scmp.ge.s32.totalorder %s614_s22, 4   ;;  %s674_s18 = smov %s560_s19 }
 0x154   : > { %s675_s19 = smov %s623_s25  ;;  %s676_s20 = smov %s614_s22 }
 0x155   :  { %14 = sbr.rel (!%p12_p9) target bundleno = 2 (0x2), region = 113 }

</bundles_post_ra>
